<compile_context>
chip_gen: v7x
topology: tpu7x:2x2x1
jax: 0.10.0
libtpu: 0.0.40
codegen_flags: <defaults>
</compile_context>

<pallas_src>
import functools

import numpy as np

import jax
import jax.numpy as jnp
from jax import lax
from jax.experimental import pallas as pl
from jax.experimental.pallas import tpu as pltpu


MAX_TILE_B = 128  # upper bound on images per grid step (VMEM ~14 MiB at 128)


def _round_up(x, m):
    return (x + m - 1) // m * m


def _choose_tile_b(batch, max_tile=MAX_TILE_B):
    """Images per grid step: multiple of 32 (keeps every in-kernel f32/bf16 sublane
    slice aligned), in [32, max_tile], and sized so the grid has >= 2 steps when
    the batch is big enough (v7x has 2 TensorCores; 'parallel' splits the grid)."""
    if batch >= 2 * max_tile:
        return max_tile
    tb = _round_up(_round_up(batch, 2) // 2, 32)   # ~half the batch -> grid ~2
    return int(max(32, min(max_tile, tb)))


# ----------------------------- fused Pallas kernel -----------------------------

def _cnn_fused_kernel(xq_ref, w1_ref, b1_ref, w2_ref, b2_ref, wfc_ref, bfc_ref,
                      out_ref, *, tb):
    f32 = jnp.float32
    bf16 = jnp.bfloat16

    # ---- conv1 + bias + ReLU + 2x2 max-pool (one matmul + lane-block max) ----
    # xq rows are (quad q, image b) for this tile: row = q*tb + b, each row holds
    # 4 consecutive padded-input rows (4*30 = 120 lanes, zero-padded to 128), bf16.
    xq = xq_ref[...]                                            # (8*tb, 128) bf16
    # Previous quad of the same image = rows shifted down by tb; the first tb
    # rows are garbage but only feed the masked "padded pool1 row 0" outputs.
    prev = jnp.concatenate([xq[0:tb], xq[0:7 * tb]], axis=0)    # (8*tb, 128)
    x1 = jnp.concatenate([prev, xq], axis=-1)                   # (8*tb, 256) bf16
    y1 = jnp.dot(x1, w1_ref[...], preferred_element_type=f32)   # (8*tb, 1024) f32
    m1 = jnp.maximum(jnp.maximum(y1[:, 0:256], y1[:, 256:512]),
                     jnp.maximum(y1[:, 512:768], y1[:, 768:1024]))
    h1 = jnp.maximum(m1 + b1_ref[...], 0.0)                     # (8*tb, 256) f32
    # h1 row (rp, b) holds padded pool1 rows (2*rp, 2*rp+1) of image b as two
    # 128-lane blocks [8z | 14 cols x 8 ch | 8z].  Zero the two vertical-padding
    # rows the matmul cannot produce: (rp=0, low half) and (rp=7, high half).
    # NOTE: the rp=0 garbage 'prev' rows are safe ONLY because this mask covers
    # exactly the w1t columns that read them; keep the cnn_reference allclose
    # check whenever prepare_params or this masking is touched.
    rows = lax.broadcasted_iota(jnp.int32, h1.shape, 0)
    lanes = lax.broadcasted_iota(jnp.int32, h1.shape, 1)
    pad_top = jnp.logical_and(rows < tb, lanes < 128)
    pad_bot = jnp.logical_and(rows >= 7 * tb, lanes >= 128)
    h1 = jnp.where(jnp.logical_or(pad_top, pad_bot), 0.0, h1)

    # ---- conv2 + bias + ReLU + 2x2 max-pool ----------------------------------
    # p2 row (ip2, b) = 4 consecutive padded pool1 rows 2*ip2 .. 2*ip2+3.
    p2 = jnp.concatenate([h1[0:7 * tb], h1[tb:8 * tb]], axis=-1).astype(bf16)  # (7*tb, 512)
    y2 = jnp.dot(p2, w2_ref[...], preferred_element_type=f32)   # (7*tb, 1024) f32
    m2 = jnp.maximum(jnp.maximum(y2[:, 0:256], y2[:, 256:512]),
                     jnp.maximum(y2[:, 512:768], y2[:, 768:1024]))
    h2 = jnp.maximum(m2 + b2_ref[...], 0.0)                     # (7*tb, 256) f32

    # ---- fc: ONE (tb, 1792) x (1792, 128) matmul -----------------------------
    # h2's seven sublane-aligned (tb, 256) blocks (one per pooled row ip2) are
    # lane-concatenated to match wfct's row order (ip2*256 + feature); the torch
    # NCHW flatten order is folded into wfct at prepare time.  Bias fused here.
    h2b = h2.astype(bf16)
    lhs = jnp.concatenate([h2b[i * tb:(i + 1) * tb, :] for i in range(7)],
                          axis=-1)                              # (tb, 1792) bf16
    out_ref[...] = (jnp.dot(lhs, wfc_ref[...], preferred_element_type=f32)
                    + bfc_ref[...])                             # (tb, 128) f32


# --------------------- one-time parameter packing (host side) ---------------------

def prepare_params(params, num_classes):
    """Fold conv taps + 2x2 pooling + layout + flatten order into matmul weights."""
    w1 = np.asarray(params["w1"], np.float32)     # (8, 1, 3, 3)
    b1 = np.asarray(params["b1"], np.float32)     # (8,)
    w2 = np.asarray(params["w2"], np.float32)     # (32, 8, 3, 3)
    b2 = np.asarray(params["b2"], np.float32)     # (32,)
    wfc = np.asarray(params["wfc"], np.float32)   # (nc, 1568)
    bfc = np.asarray(params["bfc"], np.float32)   # (nc,)

    # conv1: K = (qsel, dr, j') = qsel*128 + dr*30 + j'   (padded-input row 4*rp + 4*qsel + dr - 4)
    #        N = di*512 + dj*256 + pos*128 + 8 + jp*8 + co
    w1t = np.zeros((256, 1024), np.float32)
    for di in range(2):
        for dj in range(2):
            for pos in range(2):
                for jp in range(14):
                    for co in range(8):
                        c = di * 512 + dj * 256 + pos * 128 + 8 + jp * 8 + co
                        for ky in range(3):
                            rho = ky + 2 * pos - 2 + di
                            qsel, dr = divmod(rho + 4, 4)
                            for kx in range(3):
                                jj = kx + 2 * jp + dj            # padded-input column
                                w1t[qsel * 128 + dr * 30 + jj, c] = w1[co, 0, ky, kx]
    b1row = np.zeros((1, 256), np.float32)
    for pos in range(2):
        for jp in range(14):
            for co in range(8):
                b1row[0, pos * 128 + 8 + jp * 8 + co] = b1[co]

    # conv2: K = s*128 + 8 + jp1*8 + ci   (padded pool1 row 2*ip2 + s, padded col jp1+1)
    #        N = di*512 + dj*256 + jp2*32 + co   (lanes 224..255 of each block unused/zero)
    w2t = np.zeros((512, 1024), np.float32)
    for di in range(2):
        for dj in range(2):
            for jp2 in range(7):
                for co in range(32):
                    c = di * 512 + dj * 256 + jp2 * 32 + co
                    for ky in range(3):
                        s = ky + di
                        for kx in range(3):
                            jp1 = kx + 2 * jp2 + dj - 1
                            if 0 <= jp1 < 14:
                                for ci in range(8):
                                    w2t[s * 128 + 8 + jp1 * 8 + ci, c] = w2[co, ci, ky, kx]
    b2row = np.zeros((1, 256), np.float32)
    for jp2 in range(7):
        for co in range(32):
            b2row[0, jp2 * 32 + co] = b2[co]

    # fc: rows = ip2*256 + (jp2*32 + co2), matching h2's (row, lane) layout; N padded to 128.
    wfct = np.zeros((7 * 256, 128), np.float32)
    wr = wfc.reshape(num_classes, 32, 7, 7)            # (n, c, h, w)
    wr = np.transpose(wr, (2, 3, 1, 0))                # (h, w, c, n)
    blocks = wr.reshape(7, 224, num_classes)
    for h in range(7):
        wfct[h * 256:h * 256 + 224, :num_classes] = blocks[h]
    bfcrow = np.zeros((1, 128), np.float32)
    bfcrow[0, :num_classes] = bfc

    return {
        "w1t": jnp.asarray(w1t, jnp.bfloat16),
        "b1row": jnp.asarray(b1row),
        "w2t": jnp.asarray(w2t, jnp.bfloat16),
        "b2row": jnp.asarray(b2row),
        "wfct": jnp.asarray(wfct, jnp.bfloat16),
        "bfcrow": jnp.asarray(bfcrow),
    }


# ------------------------------ forward wrapper ------------------------------

def _pack_input(x, tb):
    """(B,1,28,28) f32 -> (B*8, 128) bf16: per image, 8 'quads' of 4 padded rows x
    30 cols, tile-local row order = (quad slow, image fast).  Pure layout; shipped
    as bf16 because the kernel feeds it straight to the bf16 MXU matmul."""
    B = x.shape[0]
    g = B // tb
    xp = jnp.pad(x[:, 0], ((0, 0), (1, 3), (1, 1))).astype(jnp.bfloat16)  # (B, 32, 30)
    xq = xp.reshape(B, 8, 120)
    xq = jnp.pad(xq, ((0, 0), (0, 0), (0, 8)))             # (B, 8, 128)
    xq = xq.reshape(g, tb, 8, 128).transpose(0, 2, 1, 3)   # (g, quad, image, 128)
    return xq.reshape(g * 8 * tb, 128)


def cnn_forward(x, prepped, *, num_classes=10):
    B = x.shape[0]
    tb = _choose_tile_b(B)
    assert tb % 8 == 0, tb           # in-kernel sublane slices need 8-row alignment
    B_pad = _round_up(B, tb)
    if B_pad != B:                   # pad batch with zero images instead of asserting
        x = jnp.pad(x, ((0, B_pad - B), (0, 0), (0, 0), (0, 0)))
    G = B_pad // tb
    xq = _pack_input(x, tb)          # (B_pad*8, 128) bf16
    # NOTE: the packing above is a tiny separate XLA relayout pass; it could be
    # fused into the pallas_call via CompilerParams(allow_input_fusion=...), left
    # out here to keep the compile path maximally robust.

    out = pl.pallas_call(
        functools.partial(_cnn_fused_kernel, tb=tb),
        out_shape=jax.ShapeDtypeStruct((B_pad, 128), jnp.float32),
        grid_spec=pltpu.PrefetchScalarGridSpec(
            num_scalar_prefetch=0,
            grid=(G,),
            in_specs=[
                pl.BlockSpec((8 * tb, 128), lambda g: (g, 0)),   # packed input tile (bf16)
                pl.BlockSpec((256, 1024), lambda g: (0, 0)),     # conv1 Toeplitz weight
                pl.BlockSpec((1, 256), lambda g: (0, 0)),        # conv1 bias row
                pl.BlockSpec((512, 1024), lambda g: (0, 0)),     # conv2 Toeplitz weight
                pl.BlockSpec((1, 256), lambda g: (0, 0)),        # conv2 bias row
                pl.BlockSpec((7 * 256, 128), lambda g: (0, 0)),  # fc weight (flatten folded in)
                pl.BlockSpec((1, 128), lambda g: (0, 0)),        # fc bias row
            ],
            out_specs=pl.BlockSpec((tb, 128), lambda g: (g, 0)),
        ),
        compiler_params=pltpu.CompilerParams(
            dimension_semantics=("parallel",),        # v7x: both TCs split the batch grid
            vmem_limit_bytes=32 * 1024 * 1024,        # explicit: v5e default is only 16 MiB
        ),
    )(xq, prepped["w1t"], prepped["b1row"], prepped["w2t"], prepped["b2row"],
      prepped["wfct"], prepped["bfcrow"])
    return out[:B, :num_classes]


# ------------------- pure-JAX reference (correctness check) -------------------

def cnn_reference(x_nchw, params):
    def conv(x, w, b):
        y = lax.conv_general_dilated(
            x, w, window_strides=(1, 1), padding=((1, 1), (1, 1)),
            dimension_numbers=("NCHW", "OIHW", "NCHW"),
            precision=lax.Precision.HIGHEST)
        return jax.nn.relu(y + b.reshape(1, -1, 1, 1))

    def pool(x):
        return lax.reduce_window(x, -jnp.inf, lax.max,
                                 (1, 1, 2, 2), (1, 1, 2, 2), "VALID")

    h = pool(conv(x_nchw, params["w1"], params["b1"]))
    h = pool(conv(h, params["w2"], params["b2"]))
    h = h.reshape(h.shape[0], -1)
    return h @ params["wfc"].T + params["bfc"]


# ------------------------------------ main ------------------------------------

if __name__ == "__main__":
    num_classes = 10
    batch = 48    # not a multiple of the chosen tile (32) -> exercises batch
                  # padding; padded batch = 64 -> grid of 2 (both v7x TCs get work)

    key = jax.random.PRNGKey(0)
    kx, k1, k2, k3, k4, k5, k6 = jax.random.split(key, 7)

    # deterministic synthetic parameters (shapes from CNN.__init__)
    params = {
        "w1": 0.1 * jax.random.normal(k1, (8, 1, 3, 3), jnp.float32),
        "b1": 0.1 * jax.random.normal(k2, (8,), jnp.float32),
        "w2": 0.1 * jax.random.normal(k3, (32, 8, 3, 3), jnp.float32),
        "b2": 0.1 * jax.random.normal(k4, (32,), jnp.float32),
        "wfc": 0.05 * jax.random.normal(k5, (num_classes, 32 * 7 * 7), jnp.float32),
        "bfc": 0.05 * jax.random.normal(k6, (num_classes,), jnp.float32),
    }

    # MNIST-like input; 28x28 is forced by the 32*7*7 fc1 input size
    x = jax.random.normal(kx, (batch, 1, 28, 28), jnp.float32)

    prepped = prepare_params(params, num_classes)          # one-time weight packing
    fwd = jax.jit(functools.partial(cnn_forward, num_classes=num_classes))

    out = jax.block_until_ready(fwd(x, prepped))
    ref = jax.block_until_ready(cnn_reference(x, params))

    assert out.shape == (batch, num_classes), out.shape
    # bf16 MXU operands / bf16 packed inputs with f32 accumulation -> ~1e-2 level
    # agreement vs the float32 HIGHEST-precision reference.  Do NOT tighten.
    assert jnp.allclose(out, ref, atol=4e-2, rtol=4e-2), float(jnp.max(jnp.abs(out - ref)))

    print("KERNEL_OK")
</pallas_src>

<mosaic_0001>
module attributes {stable_mosaic.version = 11 : i64} {
  func.func @_cnn_fused_kernel(%arg0: i32, %arg1: memref<256x128xbf16, #tpu.memory_space<vmem>>, %arg2: memref<256x1024xbf16, #tpu.memory_space<vmem>>, %arg3: memref<1x256xf32, #tpu.memory_space<vmem>>, %arg4: memref<512x1024xbf16, #tpu.memory_space<vmem>>, %arg5: memref<1x256xf32, #tpu.memory_space<vmem>>, %arg6: memref<1792x128xbf16, #tpu.memory_space<vmem>>, %arg7: memref<1x128xf32, #tpu.memory_space<vmem>>, %arg8: memref<32x128xf32, #tpu.memory_space<vmem>>) attributes {dimension_semantics = [#tpu.dimension_semantics<parallel>], iteration_bounds = array<i64: 2>, scalar_prefetch = 0 : i64, scratch_operands = 0 : i64, tpu.core_type = #tpu.core_type<tc>, window_params = [{transform_indices = @transform_0, window_bounds = array<i64: 256, 128>}, {pipeline_mode = #tpu.pipeline_mode<synchronous>, transform_indices = @transform_1, window_bounds = array<i64: 256, 1024>}, {pipeline_mode = #tpu.pipeline_mode<synchronous>, transform_indices = @transform_2, window_bounds = array<i64: 1, 256>}, {pipeline_mode = #tpu.pipeline_mode<synchronous>, transform_indices = @transform_3, window_bounds = array<i64: 512, 1024>}, {pipeline_mode = #tpu.pipeline_mode<synchronous>, transform_indices = @transform_4, window_bounds = array<i64: 1, 256>}, {pipeline_mode = #tpu.pipeline_mode<synchronous>, transform_indices = @transform_5, window_bounds = array<i64: 1792, 128>}, {pipeline_mode = #tpu.pipeline_mode<synchronous>, transform_indices = @transform_6, window_bounds = array<i64: 1, 128>}, {transform_indices = @transform_7, window_bounds = array<i64: 32, 128>}]} {
    %c0 = arith.constant 0 : index
    %c0_0 = arith.constant 0 : index
    %0 = vector.load %arg1[%c0, %c0_0] : memref<256x128xbf16, #tpu.memory_space<vmem>>, vector<256x128xbf16>
    %1 = vector.extract_strided_slice %0 {offsets = [0, 0], sizes = [32, 128], strides = [1, 1]} : vector<256x128xbf16> to vector<32x128xbf16>
    %2 = vector.extract_strided_slice %0 {offsets = [0, 0], sizes = [224, 128], strides = [1, 1]} : vector<256x128xbf16> to vector<224x128xbf16>
    %3 = tpu.concatenate %1, %2 in 0 : vector<32x128xbf16>, vector<224x128xbf16> -> vector<256x128xbf16>
    %4 = tpu.concatenate %3, %0 in 1 : vector<256x128xbf16>, vector<256x128xbf16> -> vector<256x256xbf16>
    %c0_1 = arith.constant 0 : index
    %c0_2 = arith.constant 0 : index
    %5 = vector.load %arg2[%c0_1, %c0_2] : memref<256x1024xbf16, #tpu.memory_space<vmem>>, vector<256x1024xbf16>
    %cst = arith.constant dense<0.000000e+00> : vector<256x1024xf32>
    %6 = tpu.matmul %4, %5, %cst {dimension_numbers = #tpu.dot_dimension_numbers<[1], [0], [0], [1], [0, 0, 1, 1], [], []>} : vector<256x256xbf16>, vector<256x1024xbf16>, vector<256x1024xf32> -> vector<256x1024xf32>
    %7 = vector.extract_strided_slice %6 {offsets = [0, 0], sizes = [256, 256], strides = [1, 1]} : vector<256x1024xf32> to vector<256x256xf32>
    %8 = vector.extract_strided_slice %6 {offsets = [0, 256], sizes = [256, 256], strides = [1, 1]} : vector<256x1024xf32> to vector<256x256xf32>
    %9 = arith.maximumf %7, %8 : vector<256x256xf32>
    %10 = vector.extract_strided_slice %6 {offsets = [0, 512], sizes = [256, 256], strides = [1, 1]} : vector<256x1024xf32> to vector<256x256xf32>
    %11 = vector.extract_strided_slice %6 {offsets = [0, 768], sizes = [256, 256], strides = [1, 1]} : vector<256x1024xf32> to vector<256x256xf32>
    %12 = arith.maximumf %10, %11 : vector<256x256xf32>
    %13 = arith.maximumf %9, %12 : vector<256x256xf32>
    %c0_3 = arith.constant 0 : index
    %c0_4 = arith.constant 0 : index
    %14 = vector.load %arg3[%c0_3, %c0_4] : memref<1x256xf32, #tpu.memory_space<vmem>>, vector<1x256xf32>
    %15 = vector.broadcast %14 : vector<1x256xf32> to vector<256x256xf32>
    %16 = arith.addf %13, %15 : vector<256x256xf32>
    %cst_5 = arith.constant 0.000000e+00 : f32
    %17 = vector.broadcast %cst_5 : f32 to vector<256x256xf32>
    %18 = arith.maximumf %16, %17 : vector<256x256xf32>
    %19 = tpu.iota {dimensions = array<i32: 0>} : vector<256x256xi32>
    %20 = tpu.iota {dimensions = array<i32: 1>} : vector<256x256xi32>
    %c32_i32 = arith.constant 32 : i32
    %21 = vector.broadcast %c32_i32 : i32 to vector<256x256xi32>
    %22 = arith.cmpi slt, %19, %21 : vector<256x256xi32>
    %c128_i32 = arith.constant 128 : i32
    %23 = vector.broadcast %c128_i32 : i32 to vector<256x256xi32>
    %24 = arith.cmpi slt, %20, %23 : vector<256x256xi32>
    %25 = arith.andi %22, %24 : vector<256x256xi1>
    %c224_i32 = arith.constant 224 : i32
    %26 = vector.broadcast %c224_i32 : i32 to vector<256x256xi32>
    %27 = arith.cmpi sge, %19, %26 : vector<256x256xi32>
    %c128_i32_6 = arith.constant 128 : i32
    %28 = vector.broadcast %c128_i32_6 : i32 to vector<256x256xi32>
    %29 = arith.cmpi sge, %20, %28 : vector<256x256xi32>
    %30 = arith.andi %27, %29 : vector<256x256xi1>
    %31 = arith.ori %25, %30 : vector<256x256xi1>
    %cst_7 = arith.constant 0.000000e+00 : f32
    %32 = vector.broadcast %cst_7 : f32 to vector<256x256xf32>
    %33 = arith.select %31, %32, %18 : vector<256x256xi1>, vector<256x256xf32>
    %34 = vector.extract_strided_slice %33 {offsets = [0, 0], sizes = [224, 256], strides = [1, 1]} : vector<256x256xf32> to vector<224x256xf32>
    %35 = vector.extract_strided_slice %33 {offsets = [32, 0], sizes = [224, 256], strides = [1, 1]} : vector<256x256xf32> to vector<224x256xf32>
    %36 = tpu.concatenate %34, %35 in 1 : vector<224x256xf32>, vector<224x256xf32> -> vector<224x512xf32>
    %37 = arith.truncf %36 : vector<224x512xf32> to vector<224x512xbf16>
    %c0_8 = arith.constant 0 : index
    %c0_9 = arith.constant 0 : index
    %38 = vector.load %arg4[%c0_8, %c0_9] : memref<512x1024xbf16, #tpu.memory_space<vmem>>, vector<512x1024xbf16>
    %cst_10 = arith.constant dense<0.000000e+00> : vector<224x1024xf32>
    %39 = tpu.matmul %37, %38, %cst_10 {dimension_numbers = #tpu.dot_dimension_numbers<[1], [0], [0], [1], [0, 0, 1, 1], [], []>} : vector<224x512xbf16>, vector<512x1024xbf16>, vector<224x1024xf32> -> vector<224x1024xf32>
    %40 = vector.extract_strided_slice %39 {offsets = [0, 0], sizes = [224, 256], strides = [1, 1]} : vector<224x1024xf32> to vector<224x256xf32>
    %41 = vector.extract_strided_slice %39 {offsets = [0, 256], sizes = [224, 256], strides = [1, 1]} : vector<224x1024xf32> to vector<224x256xf32>
    %42 = arith.maximumf %40, %41 : vector<224x256xf32>
    %43 = vector.extract_strided_slice %39 {offsets = [0, 512], sizes = [224, 256], strides = [1, 1]} : vector<224x1024xf32> to vector<224x256xf32>
    %44 = vector.extract_strided_slice %39 {offsets = [0, 768], sizes = [224, 256], strides = [1, 1]} : vector<224x1024xf32> to vector<224x256xf32>
    %45 = arith.maximumf %43, %44 : vector<224x256xf32>
    %46 = arith.maximumf %42, %45 : vector<224x256xf32>
    %c0_11 = arith.constant 0 : index
    %c0_12 = arith.constant 0 : index
    %47 = vector.load %arg5[%c0_11, %c0_12] : memref<1x256xf32, #tpu.memory_space<vmem>>, vector<1x256xf32>
    %48 = vector.broadcast %47 : vector<1x256xf32> to vector<224x256xf32>
    %49 = arith.addf %46, %48 : vector<224x256xf32>
    %cst_13 = arith.constant 0.000000e+00 : f32
    %50 = vector.broadcast %cst_13 : f32 to vector<224x256xf32>
    %51 = arith.maximumf %49, %50 : vector<224x256xf32>
    %52 = arith.truncf %51 : vector<224x256xf32> to vector<224x256xbf16>
    %53 = vector.extract_strided_slice %52 {offsets = [0, 0], sizes = [32, 256], strides = [1, 1]} : vector<224x256xbf16> to vector<32x256xbf16>
    %54 = vector.extract_strided_slice %52 {offsets = [32, 0], sizes = [32, 256], strides = [1, 1]} : vector<224x256xbf16> to vector<32x256xbf16>
    %55 = vector.extract_strided_slice %52 {offsets = [64, 0], sizes = [32, 256], strides = [1, 1]} : vector<224x256xbf16> to vector<32x256xbf16>
    %56 = vector.extract_strided_slice %52 {offsets = [96, 0], sizes = [32, 256], strides = [1, 1]} : vector<224x256xbf16> to vector<32x256xbf16>
    %57 = vector.extract_strided_slice %52 {offsets = [128, 0], sizes = [32, 256], strides = [1, 1]} : vector<224x256xbf16> to vector<32x256xbf16>
    %58 = vector.extract_strided_slice %52 {offsets = [160, 0], sizes = [32, 256], strides = [1, 1]} : vector<224x256xbf16> to vector<32x256xbf16>
    %59 = vector.extract_strided_slice %52 {offsets = [192, 0], sizes = [32, 256], strides = [1, 1]} : vector<224x256xbf16> to vector<32x256xbf16>
    %60 = tpu.concatenate %53, %54, %55, %56, %57, %58, %59 in 1 : vector<32x256xbf16>, vector<32x256xbf16>, vector<32x256xbf16>, vector<32x256xbf16>, vector<32x256xbf16>, vector<32x256xbf16>, vector<32x256xbf16> -> vector<32x1792xbf16>
    %c0_14 = arith.constant 0 : index
    %c0_15 = arith.constant 0 : index
    %61 = vector.load %arg6[%c0_14, %c0_15] : memref<1792x128xbf16, #tpu.memory_space<vmem>>, vector<1792x128xbf16>
    %cst_16 = arith.constant dense<0.000000e+00> : vector<32x128xf32>
    %62 = tpu.matmul %60, %61, %cst_16 {dimension_numbers = #tpu.dot_dimension_numbers<[1], [0], [0], [1], [0, 0, 1, 1], [], []>} : vector<32x1792xbf16>, vector<1792x128xbf16>, vector<32x128xf32> -> vector<32x128xf32>
    %c0_17 = arith.constant 0 : index
    %c0_18 = arith.constant 0 : index
    %63 = vector.load %arg7[%c0_17, %c0_18] : memref<1x128xf32, #tpu.memory_space<vmem>>, vector<1x128xf32>
    %64 = vector.broadcast %63 : vector<1x128xf32> to vector<32x128xf32>
    %65 = arith.addf %62, %64 : vector<32x128xf32>
    %c0_19 = arith.constant 0 : index
    %c0_20 = arith.constant 0 : index
    %66 = vector.load %arg8[%c0_19, %c0_20] : memref<32x128xf32, #tpu.memory_space<vmem>>, vector<32x128xf32>
    tpu.vector_store %arg8[%c0_19, %c0_20], %65 {strides = array<i32>} : memref<32x128xf32, #tpu.memory_space<vmem>>, vector<32x128xf32>,
    return
  }
  func.func @transform_0(%arg0: i32) -> (i32, i32) {
    %c0_i32 = arith.constant 0 : i32
    %c0_i32_0 = arith.constant 0 : i32
    return %arg0, %c0_i32 : i32, i32
  }
  func.func @transform_1(%arg0: i32) -> (i32, i32) {
    %c0_i32 = arith.constant 0 : i32
    %c0_i32_0 = arith.constant 0 : i32
    %c0_i32_1 = arith.constant 0 : i32
    return %c0_i32, %c0_i32_0 : i32, i32
  }
  func.func @transform_2(%arg0: i32) -> (i32, i32) {
    %c0_i32 = arith.constant 0 : i32
    %c0_i32_0 = arith.constant 0 : i32
    %c0_i32_1 = arith.constant 0 : i32
    return %c0_i32, %c0_i32_0 : i32, i32
  }
  func.func @transform_3(%arg0: i32) -> (i32, i32) {
    %c0_i32 = arith.constant 0 : i32
    %c0_i32_0 = arith.constant 0 : i32
    %c0_i32_1 = arith.constant 0 : i32
    return %c0_i32, %c0_i32_0 : i32, i32
  }
  func.func @transform_4(%arg0: i32) -> (i32, i32) {
    %c0_i32 = arith.constant 0 : i32
    %c0_i32_0 = arith.constant 0 : i32
    %c0_i32_1 = arith.constant 0 : i32
    return %c0_i32, %c0_i32_0 : i32, i32
  }
  func.func @transform_5(%arg0: i32) -> (i32, i32) {
    %c0_i32 = arith.constant 0 : i32
    %c0_i32_0 = arith.constant 0 : i32
    %c0_i32_1 = arith.constant 0 : i32
    return %c0_i32, %c0_i32_0 : i32, i32
  }
  func.func @transform_6(%arg0: i32) -> (i32, i32) {
    %c0_i32 = arith.constant 0 : i32
    %c0_i32_0 = arith.constant 0 : i32
    %c0_i32_1 = arith.constant 0 : i32
    return %c0_i32, %c0_i32_0 : i32, i32
  }
  func.func @transform_7(%arg0: i32) -> (i32, i32) {
    %c0_i32 = arith.constant 0 : i32
    %c0_i32_0 = arith.constant 0 : i32
    return %arg0, %c0_i32 : i32, i32
  }
}

</mosaic_0001>

<bundles_post_ra>
// kernel: cnn_forward.1
= control target key start
LH: loop header
LB: loop body
LE: loop exit
PB: predicated region body
PF: predicated region fallthrough
CT: control target
= control target key end

     0   :  { %s8370_s24 = smov 0   ;;  %s11791_s0 = inlined_call_operand.vmem [shape: bf16[512,128], index: 0, kind: input, shape index: {}]   ;;  %s11792_s1 = inlined_call_operand.vmem [shape: bf16[256,1024], index: 1, kind: input, shape index: {}]   ;;  %s11793_s2 = inlined_call_operand.vmem [shape: f32[1,256], index: 2, kind: input, shape index: {}]   ;;  %s11794_s3 = inlined_call_operand.vmem [shape: bf16[512,1024], index: 3, kind: input, shape index: {}]   ;;  %s11795_s4 = inlined_call_operand.vmem [shape: f32[1,256], index: 4, kind: input, shape index: {}]   ;;  %s11796_s5 = inlined_call_operand.vmem [shape: bf16[1792,128], index: 5, kind: input, shape index: {}]   ;;  %s11797_s6 = inlined_call_operand.vmem [shape: f32[1,128], index: 6, kind: input, shape index: {}]   ;;  %s11798_s7 = inlined_call_operand.vmem [shape: f32[64,128], index: 7, kind: output, shape index: {}]  }
   0x1 LB: > { %s7221_s25 = sadd.s32 4294967295, %s8327_s24   ;;  %p7225_p0 = scmp.ge.s32.totalorder %s8327_s24, 1  ;;  %s8327_s24 = sphi %s8370_s24, %s17_s24  }
   0x2   : > { %p238_p1 = scmp.lt.s32.totalorder %s8327_s24, 3 }
   0x4   : > { %p239_p2 = pnand %p7225_p0, %p238_p1 }
   0x6   : > { %242 = sbr.rel (%p239_p2) target bundleno = 1331 (0x533), region = 48 }
   0xd   : > { %v411_v0 = vld [vmem:[%s11792_s1] sm:$0xff]  ;;  %v412_v2 = vld [vmem:[%s11792_s1 + $0x8] sm:$0xff]  ;;  %s7226_s29 = sshll.u32 %s7221_s25, 5  ;;  %s7228_s12 = sshll.u32 %s7221_s25, 2 }
   0xe   : > { %v415_v1 = vld [vmem:[%s11792_s1 + $0x20] sm:$0xff]  ;;  %v416_v4 = vld [vmem:[%s11792_s1 + $0x28] sm:$0xff]  ;;  %p271_p3 = scmp.lt.s32.totalorder %s7226_s29, 63  ;;  %p277_p4 = scmp.lt.s32.totalorder %s7228_s12, 7 }
   0xf   : > { %v7247_v3 = vcombine.high %v411_v0, %v415_v1  ;;  %v7246_v5 = vcombine.low %v411_v0, %v415_v1  ;;  %v419_v6 = vld [vmem:[%s11792_s1 + $0x40] sm:$0xff]  ;;  %v7249_v8 = vcombine.high %v412_v2, %v416_v4  ;;  %v7248_v9 = vcombine.low %v412_v2, %v416_v4  ;;  %v420_v11 = vld [vmem:[%s11792_s1 + $0x48] sm:$0xff] }
  0x10   : > { %v423_v7 = vld [vmem:[%s11792_s1 + $0x60] sm:$0xff]  ;;  %v424_v12 = vld [vmem:[%s11792_s1 + $0x68] sm:$0xff]  ;;  %s12339_s29 = smov (!%p271_p3, %s7226_s29), 63  ;;  %s12341_s12 = smov (!%p277_p4, %s7228_s12), 7 }
  0x11   : > { %v7255_v10 = vcombine.high %v419_v6, %v423_v7  ;;  %v427_v13 = vld [vmem:[%s11792_s1 + $0x80] sm:$0xff]  ;;  %1179 = vmatprep.subr.bf16.mxu0 %v7247_v3  ;;  %v7257_v14 = vcombine.high %v420_v11, %v424_v12  ;;  %v428_v16 = vld [vmem:[%s11792_s1 + $0x88] sm:$0xff]  ;;  %1372 = vmatprep.subr.bf16.mxu1 %v7249_v8  ;;  %v7254_v18 = vcombine.low %v419_v6, %v423_v7  ;;  %s7227_s11 = sshll.u32 %s12339_s29, 2 }
  0x12   : > { %v431_v15 = vld [vmem:[%s11792_s1 + $0xa0] sm:$0xff]  ;;  %v432_v17 = vld [vmem:[%s11792_s1 + $0xa8] sm:$0xff]  ;;  %1180 = vmatpush1.bf16.msra.mxu0 %v7246_v5  ;;  %1373 = vmatpush1.bf16.msra.mxu1 %v7248_v9  ;;  %v7256_v19 = vcombine.low %v420_v11, %v424_v12  ;;  %s8467_s21 = scalar_lea.vmem %s11791_s0, %s7227_s11 }
  0x13   : > { %1181 = vmatprep.subr.bf16.mxu0 %v7255_v10  ;;  %v7263_v20 = vcombine.high %v427_v13, %v431_v15  ;;  %1374 = vmatprep.subr.bf16.mxu1 %v7257_v14  ;;  %v7265_v21 = vcombine.high %v428_v16, %v432_v17  ;;  %v435_v22 = vld [vmem:[%s11792_s1 + $0xc0] sm:$0xff]  ;;  %v436_v24 = vld [vmem:[%s11792_s1 + $0xc8] sm:$0xff]  ;;  %v7262_v26 = vcombine.low %v427_v13, %v431_v15 }
  0x14   : > { %v439_v23 = vld [vmem:[%s11792_s1 + $0xe0] sm:$0xff]  ;;  %v440_v25 = vld [vmem:[%s11792_s1 + $0xe8] sm:$0xff]  ;;  %v7264_v27 = vcombine.low %v428_v16, %v432_v17 }
  0x15   : > { %v7271_v28 = vcombine.high %v435_v22, %v439_v23  ;;  %v7273_v29 = vcombine.high %v436_v24, %v440_v25  ;;  %v443_v30 = vld [vmem:[%s11792_s1 + $0x100] sm:$0xff]  ;;  %v444_v32 = vld [vmem:[%s11792_s1 + $0x108] sm:$0xff]  ;;  %v7270_v34 = vcombine.low %v435_v22, %v439_v23  ;;  %v7272_v35 = vcombine.low %v436_v24, %v440_v25 }
  0x16   : > { %1182 = vmatpush1.bf16.msra.mxu0 %v7254_v18  ;;  %1375 = vmatpush1.bf16.msra.mxu1 %v7256_v19  ;;  %v447_v31 = vld [vmem:[%s11792_s1 + $0x120] sm:$0xff]  ;;  %v448_v33 = vld [vmem:[%s11792_s1 + $0x128] sm:$0xff] }
  0x17   : > { %1183 = vmatprep.subr.bf16.mxu0 %v7263_v20  ;;  %1376 = vmatprep.subr.bf16.mxu1 %v7265_v21  ;;  %v7279_v36 = vcombine.high %v443_v30, %v447_v31  ;;  %v7281_v37 = vcombine.high %v444_v32, %v448_v33  ;;  %v451_v38 = vld [vmem:[%s11792_s1 + $0x140] sm:$0xff]  ;;  %v452_v40 = vld [vmem:[%s11792_s1 + $0x148] sm:$0xff]  ;;  %v7278_v42 = vcombine.low %v443_v30, %v447_v31 }
  0x18   : > { %v455_v39 = vld [vmem:[%s11792_s1 + $0x160] sm:$0xff]  ;;  %v456_v41 = vld [vmem:[%s11792_s1 + $0x168] sm:$0xff]  ;;  %v7280_v43 = vcombine.low %v444_v32, %v448_v33 }
  0x19   : > { %v7287_v44 = vcombine.high %v451_v38, %v455_v39  ;;  %v7289_v45 = vcombine.high %v452_v40, %v456_v41  ;;  %v459_v46 = vld [vmem:[%s11792_s1 + $0x180] sm:$0xff]  ;;  %v460_v48 = vld [vmem:[%s11792_s1 + $0x188] sm:$0xff]  ;;  %v7286_v50 = vcombine.low %v451_v38, %v455_v39  ;;  %v7288_v51 = vcombine.low %v452_v40, %v456_v41 }
  0x1a   : > { %1184 = vmatpush1.bf16.msra.mxu0 %v7262_v26  ;;  %1377 = vmatpush1.bf16.msra.mxu1 %v7264_v27  ;;  %v463_v47 = vld [vmem:[%s11792_s1 + $0x1a0] sm:$0xff]  ;;  %v464_v49 = vld [vmem:[%s11792_s1 + $0x1a8] sm:$0xff] }
  0x1b   : > { %1185 = vmatprep.subr.bf16.mxu0 %v7271_v28  ;;  %1378 = vmatprep.subr.bf16.mxu1 %v7273_v29  ;;  %v7295_v52 = vcombine.high %v459_v46, %v463_v47  ;;  %v7297_v53 = vcombine.high %v460_v48, %v464_v49  ;;  %v467_v54 = vld [vmem:[%s11792_s1 + $0x1c0] sm:$0xff]  ;;  %v468_v57 = vld [vmem:[%s11792_s1 + $0x1c8] sm:$0xff]  ;;  %v7294_v59 = vcombine.low %v459_v46, %v463_v47 }
  0x1c   : > { %v471_v55 = vld [vmem:[%s11792_s1 + $0x1e0] sm:$0xff]  ;;  %v472_v58 = vld [vmem:[%s11792_s1 + $0x1e8] sm:$0xff]  ;;  %v7296_v60 = vcombine.low %v460_v48, %v464_v49 }
  0x1d   : > { %v8476_v56 = vld [vmem:[%s8467_s21] sm:$0xff]   ;;  %v7303_v61 = vcombine.high %v467_v54, %v471_v55  ;;  %v7305_v63 = vcombine.high %v468_v57, %v472_v58  ;;  %v476_v1 = vld [vmem:[%s11792_s1 + $0x208] sm:$0xff]  ;;  %v7302_v3 = vcombine.low %v467_v54, %v471_v55  ;;  %v7304_v4 = vcombine.low %v468_v57, %v472_v58 }
  0x1e   : > { %1186 = vmatpush1.bf16.msra.mxu0 %v7270_v34  ;;  %1379 = vmatpush1.bf16.msra.mxu1 %v7272_v35  ;;  %v475_v62 = vld [vmem:[%s11792_s1 + $0x200] sm:$0xff]  ;;  %v480_v2 = vld [vmem:[%s11792_s1 + $0x228] sm:$0xff] }
  0x1f   : > { %1187 = vmatprep.subr.bf16.mxu0 %v7279_v36  ;;  %1380 = vmatprep.subr.bf16.mxu1 %v7281_v37  ;;  %v479_v0 = vld [vmem:[%s11792_s1 + $0x220] sm:$0xff]  ;;  %v7313_v6 = vcombine.high %v476_v1, %v480_v2  ;;  %v484_v9 = vld [vmem:[%s11792_s1 + $0x248] sm:$0xff]  ;;  %v7312_v12 = vcombine.low %v476_v1, %v480_v2  ;;  %v414_v1 = vld [vmem:[%s11792_s1 + $0x18] sm:$0xff] }
  0x20   : > { %1211 = vmatprep.mubr.bf16.mxu0 %v8476_v56  ;;  %1404 = vmatprep.mubr.bf16.mxu1 %v8476_v56  ;;  %v7311_v5 = vcombine.high %v475_v62, %v479_v0  ;;  %v483_v7 = vld [vmem:[%s11792_s1 + $0x240] sm:$0xff]  ;;  %v488_v10 = vld [vmem:[%s11792_s1 + $0x268] sm:$0xff]  ;;  %v7310_v11 = vcombine.low %v475_v62, %v479_v0  ;;  %v417_v62 = vld [vmem:[%s11792_s1 + $0x30] sm:$0xff] }
  0x21   : > { %v487_v8 = vld [vmem:[%s11792_s1 + $0x260] sm:$0xff]  ;;  %v7321_v14 = vcombine.high %v484_v9, %v488_v10  ;;  %v492_v17 = vld [vmem:[%s11792_s1 + $0x288] sm:$0xff]  ;;  %v7320_v20 = vcombine.low %v484_v9, %v488_v10  ;;  %v418_v2 = vld [vmem:[%s11792_s1 + $0x38] sm:$0xff] }
  0x22   : > { %1188 = vmatpush1.bf16.msra.mxu0 %v7278_v42  ;;  %1381 = vmatpush1.bf16.msra.mxu1 %v7280_v43  ;;  %v7319_v13 = vcombine.high %v483_v7, %v487_v8  ;;  %v491_v15 = vld [vmem:[%s11792_s1 + $0x280] sm:$0xff]  ;;  %v496_v18 = vld [vmem:[%s11792_s1 + $0x2a8] sm:$0xff]  ;;  %v7318_v19 = vcombine.low %v483_v7, %v487_v8  ;;  %v421_v7 = vld [vmem:[%s11792_s1 + $0x50] sm:$0xff]  ;;  %v7253_v9 = vcombine.high %v414_v1, %v418_v2 }
  0x23   : > { %1189 = vmatprep.subr.bf16.mxu0 %v7287_v44  ;;  %1382 = vmatprep.subr.bf16.mxu1 %v7289_v45  ;;  %v495_v16 = vld [vmem:[%s11792_s1 + $0x2a0] sm:$0xff]  ;;  %v7329_v22 = vcombine.high %v492_v17, %v496_v18  ;;  %v500_v25 = vld [vmem:[%s11792_s1 + $0x2c8] sm:$0xff]  ;;  %v7328_v28 = vcombine.low %v492_v17, %v496_v18  ;;  %v425_v8 = vld [vmem:[%s11792_s1 + $0x70] sm:$0xff] }
  0x24   : > { %v7327_v21 = vcombine.high %v491_v15, %v495_v16  ;;  %v499_v23 = vld [vmem:[%s11792_s1 + $0x2c0] sm:$0xff]  ;;  %v504_v26 = vld [vmem:[%s11792_s1 + $0x2e8] sm:$0xff]  ;;  %v7326_v27 = vcombine.low %v491_v15, %v495_v16  ;;  %v422_v10 = vld [vmem:[%s11792_s1 + $0x58] sm:$0xff]  ;;  %v7252_v16 = vcombine.low %v414_v1, %v418_v2 }
  0x25   : > { %v503_v24 = vld [vmem:[%s11792_s1 + $0x2e0] sm:$0xff]  ;;  %v7337_v31 = vcombine.high %v500_v25, %v504_v26  ;;  %v508_v33 = vld [vmem:[%s11792_s1 + $0x308] sm:$0xff]  ;;  %v7336_v36 = vcombine.low %v500_v25, %v504_v26  ;;  %v433_v15 = vld [vmem:[%s11792_s1 + $0xb0] sm:$0xff] }
  0x26   : > { %1190 = vmatpush1.bf16.msra.mxu0 %v7286_v50  ;;  %1383 = vmatpush1.bf16.msra.mxu1 %v7288_v51  ;;  %v7335_v29 = vcombine.high %v499_v23, %v503_v24  ;;  %v507_v30 = vld [vmem:[%s11792_s1 + $0x300] sm:$0xff]  ;;  %v512_v34 = vld [vmem:[%s11792_s1 + $0x328] sm:$0xff]  ;;  %v7334_v35 = vcombine.low %v499_v23, %v503_v24  ;;  %v430_v17 = vld [vmem:[%s11792_s1 + $0x98] sm:$0xff] }
  0x27   : > { %1191 = vmatprep.subr.bf16.mxu0 %v7295_v52  ;;  %1384 = vmatprep.subr.bf16.mxu1 %v7297_v53  ;;  %v511_v32 = vld [vmem:[%s11792_s1 + $0x320] sm:$0xff]  ;;  %v7345_v38 = vcombine.high %v508_v33, %v512_v34  ;;  %v516_v41 = vld [vmem:[%s11792_s1 + $0x348] sm:$0xff]  ;;  %v7344_v44 = vcombine.low %v508_v33, %v512_v34  ;;  %v434_v18 = vld [vmem:[%s11792_s1 + $0xb8] sm:$0xff] }
  0x28   : > { %v7343_v37 = vcombine.high %v507_v30, %v511_v32  ;;  %v515_v39 = vld [vmem:[%s11792_s1 + $0x340] sm:$0xff]  ;;  %v520_v42 = vld [vmem:[%s11792_s1 + $0x368] sm:$0xff]  ;;  %v7342_v43 = vcombine.low %v507_v30, %v511_v32  ;;  %v437_v24 = vld [vmem:[%s11792_s1 + $0xd0] sm:$0xff]  ;;  %v7268_v33 = vcombine.low %v430_v17, %v434_v18 }
  0x29   : > { %v519_v40 = vld [vmem:[%s11792_s1 + $0x360] sm:$0xff]  ;;  %v7353_v46 = vcombine.high %v516_v41, %v520_v42  ;;  %v524_v49 = vld [vmem:[%s11792_s1 + $0x388] sm:$0xff]  ;;  %v7352_v52 = vcombine.low %v516_v41, %v520_v42  ;;  %v441_v25 = vld [vmem:[%s11792_s1 + $0xf0] sm:$0xff] }
  0x2a   : > { %1192 = vmatpush1.bf16.msra.mxu0 %v7294_v59  ;;  %1385 = vmatpush1.bf16.msra.mxu1 %v7296_v60  ;;  %v7351_v45 = vcombine.high %v515_v39, %v519_v40  ;;  %v523_v47 = vld [vmem:[%s11792_s1 + $0x380] sm:$0xff]  ;;  %v528_v50 = vld [vmem:[%s11792_s1 + $0x3a8] sm:$0xff]  ;;  %v7350_v51 = vcombine.low %v515_v39, %v519_v40  ;;  %v8632_v26 = vld [vmem:[%s8467_s21 + $0x10] sm:$0xff]   ;;  %v7275_v34 = vcombine.high %v437_v24, %v441_v25 }
  0x2b   : > { %1193 = vmatprep.subr.bf16.mxu0 %v7303_v61  ;;  %1386 = vmatprep.subr.bf16.mxu1 %v7305_v63  ;;  %v527_v48 = vld [vmem:[%s11792_s1 + $0x3a0] sm:$0xff]  ;;  %v7361_v55 = vcombine.high %v524_v49, %v528_v50  ;;  %v532_v58 = vld [vmem:[%s11792_s1 + $0x3c8] sm:$0xff]  ;;  %v413_v61 = vld [vmem:[%s11792_s1 + $0x10] sm:$0xff]  ;;  %v7360_v63 = vcombine.low %v524_v49, %v528_v50 }
  0x2c   : > { %v7359_v53 = vcombine.high %v523_v47, %v527_v48  ;;  %v531_v54 = vld [vmem:[%s11792_s1 + $0x3c0] sm:$0xff]  ;;  %v536_v59 = vld [vmem:[%s11792_s1 + $0x3e8] sm:$0xff]  ;;  %v7358_v60 = vcombine.low %v523_v47, %v527_v48  ;;  %v449_v32 = vld [vmem:[%s11792_s1 + $0x130] sm:$0xff] }
  0x2d   : > { %v535_v57 = vld [vmem:[%s11792_s1 + $0x3e0] sm:$0xff]  ;;  %v453_v39 = vld [vmem:[%s11792_s1 + $0x150] sm:$0xff]  ;;  %v8663_v41 = vld [vmem:[%s8467_s21 + $0x18] sm:$0xff]  }
  0x2e   : > { %1194 = vmatpush1.bf16.msra.mxu0 %v7302_v3  ;;  %1387 = vmatpush1.bf16.msra.mxu1 %v7304_v4  ;;  %v7367_v0 = vcombine.high %v531_v54, %v535_v57  ;;  %v7369_v3 = vcombine.high %v532_v58, %v536_v59  ;;  %v7366_v4 = vcombine.low %v531_v54, %v535_v57  ;;  %v457_v40 = vld [vmem:[%s11792_s1 + $0x170] sm:$0xff] }
  0x2f   : > { %1195 = vmatprep.subr.bf16.mxu0 %v7311_v5  ;;  %1388 = vmatprep.subr.bf16.mxu1 %v7313_v6  ;;  %v7368_v5 = vcombine.low %v532_v58, %v536_v59  ;;  %v7251_v6 = vcombine.high %v413_v61, %v417_v62  ;;  %v461_v48 = vld [vmem:[%s11792_s1 + $0x190] sm:$0xff]  ;;  %v8694_v59 = vld [vmem:[%s8467_s21 + $0x20] sm:$0xff]  }
  0x30   : > { %v465_v49 = vld [vmem:[%s11792_s1 + $0x1b0] sm:$0xff] }
  0x31   : > { %v469_v57 = vld [vmem:[%s11792_s1 + $0x1d0] sm:$0xff] }
  0x32   : > { %1196 = vmatpush1.bf16.msra.mxu0 %v7310_v11  ;;  %1389 = vmatpush1.bf16.msra.mxu1 %v7312_v12  ;;  %v426_v11 = vld [vmem:[%s11792_s1 + $0x78] sm:$0xff]  ;;  %v8607_v12 = vld [vmem:[%s8467_s21 + $0x8] sm:$0xff]   ;;  %v473_v58 = vld [vmem:[%s11792_s1 + $0x1f0] sm:$0xff] }
  0x33   : > { %1197 = vmatprep.subr.bf16.mxu0 %v7319_v13  ;;  %1390 = vmatprep.subr.bf16.mxu1 %v7321_v14  ;;  %v7250_v13 = vcombine.low %v413_v61, %v417_v62  ;;  %v429_v14 = vld [vmem:[%s11792_s1 + $0x90] sm:$0xff]  ;;  %v470_v61 = vld [vmem:[%s11792_s1 + $0x1d8] sm:$0xff] }
  0x34   : > { %v7267_v23 = vcombine.high %v429_v14, %v433_v15  ;;  %v7266_v30 = vcombine.low %v429_v14, %v433_v15  ;;  %v474_v62 = vld [vmem:[%s11792_s1 + $0x1f8] sm:$0xff]  ;;  %v477_v1 = vld [vmem:[%s11792_s1 + $0x210] sm:$0xff] }
  0x35   : > { %v481_v2 = vld [vmem:[%s11792_s1 + $0x230] sm:$0xff]  ;;  %v486_v15 = vld [vmem:[%s11792_s1 + $0x258] sm:$0xff] }
  0x36   : > { %1198 = vmatpush1.bf16.msra.mxu0 %v7318_v19  ;;  %1391 = vmatpush1.bf16.msra.mxu1 %v7320_v20  ;;  %v7259_v19 = vcombine.high %v421_v7, %v425_v8  ;;  %v7261_v20 = vcombine.high %v422_v10, %v426_v11  ;;  %v7315_v14 = vcombine.high %v477_v1, %v481_v2 }
  0x37   : > { %1199 = vmatprep.subr.bf16.mxu0 %v7327_v21  ;;  %1392 = vmatprep.subr.bf16.mxu1 %v7329_v22  ;;  %v7258_v21 = vcombine.low %v421_v7, %v425_v8  ;;  %v7260_v22 = vcombine.low %v422_v10, %v426_v11  ;;  %v7309_v7 = vcombine.high %v470_v61, %v474_v62  ;;  %v489_v10 = vld [vmem:[%s11792_s1 + $0x270] sm:$0xff]  ;;  %v8725_v11 = vld [vmem:[%s8467_s21 + $0x28] sm:$0xff]  }
  0x38   : > { %v7306_v8 = vcombine.low %v469_v57, %v473_v58 }
  0x3a   : > { %1200 = vmatpush1.bf16.msra.mxu0 %v7326_v27  ;;  %1393 = vmatpush1.bf16.msra.mxu1 %v7328_v28  ;;  %v7269_v27 = vcombine.high %v430_v17, %v434_v18  ;;  %v438_v28 = vld [vmem:[%s11792_s1 + $0xd8] sm:$0xff]  ;;  %v7314_v18 = vcombine.low %v477_v1, %v481_v2  ;;  %v537_v1 = vld [vmem:[%s11792_s1 + $0x3f0] sm:$0xff]  ;;  %v8818_v2 = vld [vmem:[%s8467_s21 + $0x40] sm:$0xff]  }
  0x3b   : > { %1201 = vmatprep.subr.bf16.mxu0 %v7335_v29  ;;  %1394 = vmatprep.subr.bf16.mxu1 %v7337_v31  ;;  %v442_v29 = vld [vmem:[%s11792_s1 + $0xf8] sm:$0xff]  ;;  %v445_v31 = vld [vmem:[%s11792_s1 + $0x110] sm:$0xff] }
  0x3c   : > { %v7276_v42 = vcombine.low %v438_v28, %v442_v29  ;;  %v7282_v47 = vcombine.low %v445_v31, %v449_v32 }
  0x3e   : > { %1202 = vmatpush1.bf16.msra.mxu0 %v7334_v35  ;;  %1395 = vmatpush1.bf16.msra.mxu1 %v7336_v36  ;;  %v446_v35 = vld [vmem:[%s11792_s1 + $0x118] sm:$0xff] }
  0x3f   : > { %1203 = vmatprep.subr.bf16.mxu0 %v7343_v37  ;;  %1396 = vmatprep.subr.bf16.mxu1 %v7345_v38  ;;  %v450_v36 = vld [vmem:[%s11792_s1 + $0x138] sm:$0xff]  ;;  %v7277_v37 = vcombine.high %v438_v28, %v442_v29  ;;  %v7274_v38 = vcombine.low %v437_v24, %v441_v25  ;;  %v501_v28 = vld [vmem:[%s11792_s1 + $0x2d0] sm:$0xff] }
  0x40   : > { %v7284_v50 = vcombine.low %v446_v35, %v450_v36  ;;  %v498_v24 = vld [vmem:[%s11792_s1 + $0x2b8] sm:$0xff]  ;;  %v505_v29 = vld [vmem:[%s11792_s1 + $0x2f0] sm:$0xff] }
  0x42   : > { %1204 = vmatpush1.bf16.msra.mxu0 %v7342_v43  ;;  %1397 = vmatpush1.bf16.msra.mxu1 %v7344_v44  ;;  %v7283_v43 = vcombine.high %v445_v31, %v449_v32  ;;  %v454_v44 = vld [vmem:[%s11792_s1 + $0x158] sm:$0xff] }
  0x43   : > { %1205 = vmatprep.subr.bf16.mxu0 %v7351_v45  ;;  %1398 = vmatprep.subr.bf16.mxu1 %v7353_v46  ;;  %v458_v45 = vld [vmem:[%s11792_s1 + $0x178] sm:$0xff]  ;;  %v7285_v46 = vcombine.high %v446_v35, %v450_v36 }
  0x44   : > { %v7293_v54 = vcombine.high %v454_v44, %v458_v45 }
  0x46   : > { %1206 = vmatpush1.bf16.msra.mxu0 %v7350_v51  ;;  %1399 = vmatpush1.bf16.msra.mxu1 %v7352_v52  ;;  %v7291_v51 = vcombine.high %v453_v39, %v457_v40  ;;  %v462_v52 = vld [vmem:[%s11792_s1 + $0x198] sm:$0xff] }
  0x47   : > { %1207 = vmatprep.subr.bf16.mxu0 %v7359_v53  ;;  %1400 = vmatprep.subr.bf16.mxu1 %v7361_v55  ;;  %v466_v53 = vld [vmem:[%s11792_s1 + $0x1b8] sm:$0xff]  ;;  %v7290_v55 = vcombine.low %v453_v39, %v457_v40  ;;  %v7339_v40 = vcombine.high %v501_v28, %v505_v29 }
  0x4a   : > { %1208 = vmatpush1.bf16.msra.mxu0 %v7358_v60  ;;  %1401 = vmatpush1.bf16.msra.mxu1 %v7360_v63  ;;  %v7292_v60 = vcombine.low %v454_v44, %v458_v45  ;;  %v7301_v63 = vcombine.high %v462_v52, %v466_v53  ;;  %v7338_v45 = vcombine.low %v501_v28, %v505_v29  ;;  %v8878_v28 = vld [vmem:[%s8467_s21 + $0x70] sm:$0xff]   ;;  %v8885_v29 = vld [vmem:[%s8467_s21 + $0x78] sm:$0xff]  }
  0x4b   : > { %1209 = vmatprep.subr.bf16.mxu0 %v7367_v0  ;;  %1402 = vmatprep.subr.bf16.mxu1 %v7369_v3  ;;  %v7298_v0 = vcombine.low %v461_v48, %v465_v49  ;;  %v7300_v3 = vcombine.low %v462_v52, %v466_v53  ;;  %v522_v52 = vld [vmem:[%s11792_s1 + $0x378] sm:$0xff] }
  0x4e   : > { %1210 = vmatpush1.bf16.msra.mxu0 %v7366_v4  ;;  %1403 = vmatpush1.bf16.msra.mxu1 %v7368_v5  ;;  %v7307_v4 = vcombine.high %v469_v57, %v473_v58  ;;  %v478_v5 = vld [vmem:[%s11792_s1 + $0x218] sm:$0xff]  ;;  %v529_v57 = vld [vmem:[%s11792_s1 + $0x3b0] sm:$0xff] }
  0x4f   : > { %1565 = vmatprep.subr.bf16.mxu0 %v7251_v6  ;;  %1758 = vmatprep.subr.bf16.mxu1 %v7253_v9  ;;  %v482_v6 = vld [vmem:[%s11792_s1 + $0x238] sm:$0xff]  ;;  %v485_v9 = vld [vmem:[%s11792_s1 + $0x250] sm:$0xff] }
  0x50   : > { %v7317_v17 = vcombine.high %v478_v5, %v482_v6 }
  0x51   : > { %1212 = vmatmul.mubr.bf16.vlgmr.msra.gmra.mrb[0].mxu0 %v8476_v56  ;;  %1405 = vmatmul.mubr.bf16.vlgmr.msra.gmra.mrb[0].mxu1 %v8476_v56 }
  0x52   : > { %1566 = vmatpush1.bf16.msra.mxu0 %v7250_v13  ;;  %1759 = vmatpush1.bf16.msra.mxu1 %v7252_v16  ;;  %v7308_v13 = vcombine.low %v470_v61, %v474_v62  ;;  %v490_v16 = vld [vmem:[%s11792_s1 + $0x278] sm:$0xff] }
  0x53   : > { %1221 = vmatprep.mubr.bf16.mxu0 %v8607_v12  ;;  %1414 = vmatprep.mubr.bf16.mxu1 %v8607_v12  ;;  %v7325_v25 = vcombine.high %v486_v15, %v490_v16  ;;  %v7324_v31 = vcombine.low %v486_v15, %v490_v16  ;;  %v530_v61 = vld [vmem:[%s11792_s1 + $0x3b8] sm:$0xff]  ;;  %v8831_v15 = vld [vmem:[%s8467_s21 + $0x48] sm:$0xff]  }
  0x54   : > { %1567 = vmatprep.subr.bf16.mxu0 %v7259_v19  ;;  %1760 = vmatprep.subr.bf16.mxu1 %v7261_v20  ;;  %v493_v19 = vld [vmem:[%s11792_s1 + $0x290] sm:$0xff] }
  0x55   : > { %v497_v20 = vld [vmem:[%s11792_s1 + $0x2b0] sm:$0xff] }
  0x56   : > { %1568 = vmatpush1.bf16.msra.mxu0 %v7258_v21  ;;  %1761 = vmatpush1.bf16.msra.mxu1 %v7260_v22  ;;  %v7316_v21 = vcombine.low %v478_v5, %v482_v6  ;;  %v7323_v22 = vcombine.high %v485_v9, %v489_v10  ;;  %v7331_v32 = vcombine.high %v493_v19, %v497_v20  ;;  %v534_v5 = vld [vmem:[%s11792_s1 + $0x3d8] sm:$0xff] }
  0x57   : > { %1569 = vmatprep.subr.bf16.mxu0 %v7267_v23  ;;  %1762 = vmatprep.subr.bf16.mxu1 %v7269_v27  ;;  %v494_v23 = vld [vmem:[%s11792_s1 + $0x298] sm:$0xff]  ;;  %v7322_v27 = vcombine.low %v485_v9, %v489_v10  ;;  %v7330_v36 = vcombine.low %v493_v19, %v497_v20  ;;  %v8852_v19 = vld [vmem:[%s8467_s21 + $0x60] sm:$0xff]   ;;  %v8859_v20 = vld [vmem:[%s8467_s21 + $0x68] sm:$0xff]  }
  0x58   : > { %v7333_v35 = vcombine.high %v494_v23, %v498_v24  ;;  %v7332_v39 = vcombine.low %v494_v23, %v498_v24  ;;  %v538_v6 = vld [vmem:[%s11792_s1 + $0x3f8] sm:$0xff]  ;;  %v2676_v23 = vld [vmem:[%s11794_s3 + $0x8] sm:$0xff] }
  0x59   : > { %1222 = vmatmul.mubr.bf16.gmra.mrb[4].mxu0 %v8607_v12  ;;  %1415 = vmatmul.mubr.bf16.gmra.mrb[4].mxu1 %v8607_v12  ;;  %v7372_v16 = vcombine.low %v534_v5, %v538_v6 }
  0x5a   : > { %1231 = vmatprep.mubr.bf16.mxu0 %v8632_v26  ;;  %1424 = vmatprep.mubr.bf16.mxu1 %v8632_v26 }
  0x5b   : > { %1570 = vmatpush1.bf16.msra.mxu0 %v7266_v30  ;;  %1763 = vmatpush1.bf16.msra.mxu1 %v7268_v33  ;;  %v8756_v30 = vld [vmem:[%s8467_s21 + $0x30] sm:$0xff]   ;;  %v502_v33 = vld [vmem:[%s11792_s1 + $0x2d8] sm:$0xff] }
  0x5c   : > { %1571 = vmatprep.subr.bf16.mxu0 %v7275_v34  ;;  %1764 = vmatprep.subr.bf16.mxu1 %v7277_v37  ;;  %v506_v34 = vld [vmem:[%s11792_s1 + $0x2f8] sm:$0xff]  ;;  %v509_v37 = vld [vmem:[%s11792_s1 + $0x310] sm:$0xff] }
  0x5d   : > { %v7341_v44 = vcombine.high %v502_v33, %v506_v34 }
  0x5f   : > { %1572 = vmatpush1.bf16.msra.mxu0 %v7274_v38  ;;  %1765 = vmatpush1.bf16.msra.mxu1 %v7276_v42  ;;  %v513_v38 = vld [vmem:[%s11792_s1 + $0x330] sm:$0xff]  ;;  %v510_v42 = vld [vmem:[%s11792_s1 + $0x318] sm:$0xff] }
  0x60   : > { %1573 = vmatprep.subr.bf16.mxu0 %v7283_v43  ;;  %1766 = vmatprep.subr.bf16.mxu1 %v7285_v46  ;;  %v514_v43 = vld [vmem:[%s11792_s1 + $0x338] sm:$0xff]  ;;  %v517_v46 = vld [vmem:[%s11792_s1 + $0x350] sm:$0xff] }
  0x61   : > { %1232 = vmatmul.mubr.bf16.gmra.mrb[8].mxu0 %v8476_v56  ;;  %1425 = vmatmul.mubr.bf16.gmra.mrb[8].mxu1 %v8476_v56  ;;  %v7299_v56 = vcombine.high %v461_v48, %v465_v49  ;;  %v8787_v48 = vld [vmem:[%s8467_s21 + $0x38] sm:$0xff]   ;;  %v7340_v49 = vcombine.low %v502_v33, %v506_v34  ;;  %v7349_v53 = vcombine.high %v510_v42, %v514_v43  ;;  %v2687_v33 = vld [vmem:[%s11794_s3 + $0x60] sm:$0xff]  ;;  %v2684_v34 = vld [vmem:[%s11794_s3 + $0x48] sm:$0xff] }
  0x62   : > { %1241 = vmatprep.mubr.bf16.mxu0 %v8663_v41  ;;  %1434 = vmatprep.mubr.bf16.mxu1 %v8663_v41  ;;  %v7348_v58 = vcombine.low %v510_v42, %v514_v43  ;;  %v2695_v42 = vld [vmem:[%s11794_s3 + $0xa0] sm:$0xff]  ;;  %v2692_v43 = vld [vmem:[%s11794_s3 + $0x88] sm:$0xff] }
  0x63   : > { %1574 = vmatpush1.bf16.msra.mxu0 %v7282_v47  ;;  %1767 = vmatpush1.bf16.msra.mxu1 %v7284_v50  ;;  %v521_v47 = vld [vmem:[%s11792_s1 + $0x370] sm:$0xff]  ;;  %v7347_v50 = vcombine.high %v509_v37, %v513_v38 }
  0x64   : > { %1575 = vmatprep.subr.bf16.mxu0 %v7291_v51  ;;  %1768 = vmatprep.subr.bf16.mxu1 %v7293_v54  ;;  %v518_v51 = vld [vmem:[%s11792_s1 + $0x358] sm:$0xff]  ;;  %v7346_v54 = vcombine.low %v509_v37, %v513_v38 }
  0x65   : > { %v7357_v62 = vcombine.high %v518_v51, %v522_v52 }
  0x67   : > { %1576 = vmatpush1.bf16.msra.mxu0 %v7290_v55  ;;  %1769 = vmatpush1.bf16.msra.mxu1 %v7292_v60  ;;  %v525_v55 = vld [vmem:[%s11792_s1 + $0x390] sm:$0xff]  ;;  %v7355_v60 = vcombine.high %v517_v46, %v521_v47 }
  0x68   : > { %1577 = vmatprep.subr.bf16.mxu0 %v7299_v56  ;;  %1770 = vmatprep.subr.bf16.mxu1 %v7301_v63  ;;  %v526_v56 = vld [vmem:[%s11792_s1 + $0x398] sm:$0xff]  ;;  %v7354_v63 = vcombine.low %v517_v46, %v521_v47 }
  0x69   : > { %1242 = vmatmul.mubr.bf16.gmra.mrb[12].mxu0 %v8607_v12  ;;  %1435 = vmatmul.mubr.bf16.gmra.mrb[12].mxu1 %v8607_v12  ;;  %v7364_v9 = vcombine.low %v526_v56, %v530_v61 }
  0x6a   : > { %1251 = vmatprep.mubr.bf16.mxu0 %v8694_v59  ;;  %1444 = vmatprep.mubr.bf16.mxu1 %v8694_v59 }
  0x6b   : > { %1578 = vmatpush1.bf16.msra.mxu0 %v7298_v0  ;;  %1771 = vmatpush1.bf16.msra.mxu1 %v7300_v3  ;;  %v533_v0 = vld [vmem:[%s11792_s1 + $0x3d0] sm:$0xff]  ;;  %v7356_v3 = vcombine.low %v518_v51, %v522_v52  ;;  %v2703_v51 = vld [vmem:[%s11794_s3 + $0xe0] sm:$0xff]  ;;  %v2704_v52 = vld [vmem:[%s11794_s3 + $0xe8] sm:$0xff] }
  0x6c   : > { %1579 = vmatprep.subr.bf16.mxu0 %v7307_v4  ;;  %1772 = vmatprep.subr.bf16.mxu1 %v7309_v7  ;;  %v7363_v4 = vcombine.high %v525_v55, %v529_v57  ;;  %v7365_v7 = vcombine.high %v526_v56, %v530_v61  ;;  %v7371_v10 = vcombine.high %v533_v0, %v537_v1  ;;  %v2711_v56 = vld [vmem:[%s11794_s3 + $0x120] sm:$0xff]  ;;  %v2708_v61 = vld [vmem:[%s11794_s3 + $0x108] sm:$0xff] }
  0x6f   : > { %1580 = vmatpush1.bf16.msra.mxu0 %v7306_v8  ;;  %1773 = vmatpush1.bf16.msra.mxu1 %v7308_v13  ;;  %v7362_v8 = vcombine.low %v525_v55, %v529_v57  ;;  %v7373_v13 = vcombine.high %v534_v5, %v538_v6  ;;  %v8319_v57 = vld [vmem:[%s8467_s21 + $0x8] sm:$0xff]   ;;  %v2719_v5 = vld [vmem:[%s11794_s3 + $0x160] sm:$0xff] }
  0x70   : > { %1581 = vmatprep.subr.bf16.mxu0 %v7315_v14  ;;  %1774 = vmatprep.subr.bf16.mxu1 %v7317_v17  ;;  %v7370_v14 = vcombine.low %v533_v0, %v537_v1  ;;  %v8838_v17 = vld [vmem:[%s8467_s21 + $0x50] sm:$0xff]   ;;  %v2720_v6 = vld [vmem:[%s11794_s3 + $0x168] sm:$0xff] }
  0x71   : > { %1252 = vmatmul.mubr.bf16.gmra.mrb[16].mxu0 %v8632_v26  ;;  %1445 = vmatmul.mubr.bf16.gmra.mrb[16].mxu1 %v8632_v26 }
  0x72   : > { %1261 = vmatprep.mubr.bf16.mxu0 %v8725_v11  ;;  %1454 = vmatprep.mubr.bf16.mxu1 %v8725_v11 }
  0x73   : > { %1582 = vmatpush1.bf16.msra.mxu0 %v7314_v18  ;;  %1775 = vmatpush1.bf16.msra.mxu1 %v7316_v21  ;;  %v8845_v18 = vld [vmem:[%s8467_s21 + $0x58] sm:$0xff]   ;;  %v2675_v21 = vld [vmem:[%s11794_s3] sm:$0xff] }
  0x74   : > { %1583 = vmatprep.subr.bf16.mxu0 %v7323_v22  ;;  %1776 = vmatprep.subr.bf16.mxu1 %v7325_v25  ;;  %v2679_v22 = vld [vmem:[%s11794_s3 + $0x20] sm:$0xff]  ;;  %v2680_v25 = vld [vmem:[%s11794_s3 + $0x28] sm:$0xff] }
  0x75   : > { %v7375_v24 = vcombine.high %v2675_v21, %v2679_v22  ;;  %v7376_v37 = vcombine.low %v2676_v23, %v2680_v25 }
  0x77   : > { %1584 = vmatpush1.bf16.msra.mxu0 %v7322_v27  ;;  %1777 = vmatpush1.bf16.msra.mxu1 %v7324_v31  ;;  %v7377_v27 = vcombine.high %v2676_v23, %v2680_v25  ;;  %v8894_v31 = vld [vmem:[%s8467_s21] sm:$0xff]  }
  0x78   : > { %1585 = vmatprep.subr.bf16.mxu0 %v7331_v32  ;;  %1778 = vmatprep.subr.bf16.mxu1 %v7333_v35  ;;  %v2683_v32 = vld [vmem:[%s11794_s3 + $0x40] sm:$0xff]  ;;  %v2688_v35 = vld [vmem:[%s11794_s3 + $0x68] sm:$0xff] }
  0x79   : > { %1262 = vmatmul.mubr.bf16.gmra.mrb[20].mxu0 %v8663_v41  ;;  %1455 = vmatmul.mubr.bf16.gmra.mrb[20].mxu1 %v8663_v41  ;;  %v7383_v38 = vcombine.high %v2683_v32, %v2687_v33  ;;  %v7384_v46 = vcombine.low %v2684_v34, %v2688_v35 }
  0x7a   : > { %1271 = vmatprep.mubr.bf16.mxu0 %v8756_v30  ;;  %1464 = vmatprep.mubr.bf16.mxu1 %v8756_v30 }
  0x7b   : > { %1586 = vmatpush1.bf16.msra.mxu0 %v7330_v36  ;;  %1779 = vmatpush1.bf16.msra.mxu1 %v7332_v39  ;;  %v7374_v36 = vcombine.low %v2675_v21, %v2679_v22  ;;  %v7385_v39 = vcombine.high %v2684_v34, %v2688_v35  ;;  %v2728_v21 = vld [vmem:[%s11794_s3 + $0x1a8] sm:$0xff] }
  0x7c   : > { %1587 = vmatprep.subr.bf16.mxu0 %v7339_v40  ;;  %1780 = vmatprep.subr.bf16.mxu1 %v7341_v44  ;;  %v2691_v40 = vld [vmem:[%s11794_s3 + $0x80] sm:$0xff]  ;;  %v2696_v44 = vld [vmem:[%s11794_s3 + $0xa8] sm:$0xff] }
  0x7d   : > { %v7391_v47 = vcombine.high %v2691_v40, %v2695_v42  ;;  %v2732_v34 = vld [vmem:[%s11794_s3 + $0x1c8] sm:$0xff] }
  0x7f   : > { %1588 = vmatpush1.bf16.msra.mxu0 %v7338_v45  ;;  %1781 = vmatpush1.bf16.msra.mxu1 %v7340_v49  ;;  %v7382_v45 = vcombine.low %v2683_v32, %v2687_v33  ;;  %v7393_v49 = vcombine.high %v2692_v43, %v2696_v44  ;;  %v2731_v32 = vld [vmem:[%s11794_s3 + $0x1c0] sm:$0xff] }
  0x80   : > { %1589 = vmatprep.subr.bf16.mxu0 %v7347_v50  ;;  %1782 = vmatprep.subr.bf16.mxu1 %v7349_v53  ;;  %v2699_v50 = vld [vmem:[%s11794_s3 + $0xc0] sm:$0xff]  ;;  %v7390_v53 = vcombine.low %v2691_v40, %v2695_v42  ;;  %v8320_v40 = vld [vmem:[%s8467_s21 + $0x10] sm:$0xff]   ;;  %s7229_s21 = sshll.u32 %s12341_s12, 3 }
  0x81   : > { %1272 = vmatmul.mubr.bf16.gmra.mrb[24].mxu0 %v8694_v59  ;;  %1465 = vmatmul.mubr.bf16.gmra.mrb[24].mxu1 %v8694_v59  ;;  %v7399_v55 = vcombine.high %v2699_v50, %v2703_v51  ;;  %v2735_v33 = vld [vmem:[%s11794_s3 + $0x1e0] sm:$0xff]  ;;  %s280_s25 = scalar_lea.vmem %s11798_s7, %s7229_s21 }
  0x82   : > { %1281 = vmatprep.mubr.bf16.mxu0 %v8787_v48  ;;  %1474 = vmatprep.mubr.bf16.mxu1 %v8787_v48  ;;  %v7431_v35 = vcombine.high %v2731_v32, %v2735_v33  ;;  %v2739_v42 = vld [vmem:[%s11794_s3 + $0x200] sm:$0xff] }
  0x83   : > { %1590 = vmatpush1.bf16.msra.mxu0 %v7346_v54  ;;  %1783 = vmatpush1.bf16.msra.mxu1 %v7348_v58  ;;  %v7392_v54 = vcombine.low %v2692_v43, %v2696_v44  ;;  %v2743_v43 = vld [vmem:[%s11794_s3 + $0x220] sm:$0xff]  ;;  %v2740_v44 = vld [vmem:[%s11794_s3 + $0x208] sm:$0xff] }
  0x84   : > { %1591 = vmatprep.subr.bf16.mxu0 %v7355_v60  ;;  %1784 = vmatprep.subr.bf16.mxu1 %v7357_v62  ;;  %v2707_v60 = vld [vmem:[%s11794_s3 + $0x100] sm:$0xff]  ;;  %v2712_v62 = vld [vmem:[%s11794_s3 + $0x128] sm:$0xff] }
  0x85   : > { %v7407_v1 = vcombine.high %v2707_v60, %v2711_v56 }
  0x87   : > { %1592 = vmatpush1.bf16.msra.mxu0 %v7354_v63  ;;  %1785 = vmatpush1.bf16.msra.mxu1 %v7356_v3  ;;  %v7398_v63 = vcombine.low %v2699_v50, %v2703_v51  ;;  %v7409_v3 = vcombine.high %v2708_v61, %v2712_v62  ;;  %v2747_v51 = vld [vmem:[%s11794_s3 + $0x240] sm:$0xff] }
  0x88   : > { %1593 = vmatprep.subr.bf16.mxu0 %v7363_v4  ;;  %1786 = vmatprep.subr.bf16.mxu1 %v7365_v7  ;;  %v2715_v4 = vld [vmem:[%s11794_s3 + $0x140] sm:$0xff]  ;;  %v7406_v7 = vcombine.low %v2707_v60, %v2711_v56  ;;  %v2756_v56 = vld [vmem:[%s11794_s3 + $0x288] sm:$0xff] }
  0x89   : > { %1282 = vmatmul.mubr.bf16.gmra.mrb[28].mxu0 %v8725_v11  ;;  %1475 = vmatmul.mubr.bf16.gmra.mrb[28].mxu1 %v8725_v11  ;;  %v7414_v22 = vcombine.low %v2715_v4, %v2719_v5  ;;  %v2759_v60 = vld [vmem:[%s11794_s3 + $0x2a0] sm:$0xff] }
  0x8a   : > { %1291 = vmatprep.mubr.bf16.mxu0 %v8818_v2  ;;  %1484 = vmatprep.mubr.bf16.mxu1 %v8818_v2 }
  0x8b   : > { %1594 = vmatpush1.bf16.msra.mxu0 %v7362_v8  ;;  %1787 = vmatpush1.bf16.msra.mxu1 %v7364_v9  ;;  %v7408_v8 = vcombine.low %v2708_v61, %v2712_v62  ;;  %v7415_v9 = vcombine.high %v2715_v4, %v2719_v5  ;;  %v2764_v4 = vld [vmem:[%s11794_s3 + $0x2c8] sm:$0xff] }
  0x8c   : > { %1595 = vmatprep.subr.bf16.mxu0 %v7371_v10  ;;  %1788 = vmatprep.subr.bf16.mxu1 %v7373_v13  ;;  %v2723_v13 = vld [vmem:[%s11794_s3 + $0x180] sm:$0xff] }
  0x8f   : > { %1596 = vmatpush1.bf16.msra.mxu0 %v7370_v14  ;;  %1789 = vmatpush1.bf16.msra.mxu1 %v7372_v16  ;;  %v2727_v14 = vld [vmem:[%s11794_s3 + $0x1a0] sm:$0xff]  ;;  %v2724_v16 = vld [vmem:[%s11794_s3 + $0x188] sm:$0xff] }
  0x90   : > { %4211 = vmatprep.subr.bf16.mxu0 %v7375_v24  ;;  %4557 = vmatprep.subr.bf16.mxu1 %v7377_v27  ;;  %v7423_v24 = vcombine.high %v2723_v13, %v2727_v14  ;;  %v7425_v25 = vcombine.high %v2724_v16, %v2728_v21  ;;  %v7422_v27 = vcombine.low %v2723_v13, %v2727_v14 }
  0x91   : > { %1292 = vmatmul.mubr.bf16.gmra.mrb[32].mxu0 %v8756_v30  ;;  %1485 = vmatmul.mubr.bf16.gmra.mrb[32].mxu1 %v8756_v30 }
  0x92   : > { %1301 = vmatprep.mubr.bf16.mxu0 %v8831_v15  ;;  %1494 = vmatprep.mubr.bf16.mxu1 %v8831_v15 }
  0x99   : > { %1302 = vmatmul.mubr.bf16.gmra.mrb[36].mxu0 %v8787_v48  ;;  %1495 = vmatmul.mubr.bf16.gmra.mrb[36].mxu1 %v8787_v48 }
  0x9a   : > { %1311 = vmatprep.mubr.bf16.mxu0 %v8838_v17  ;;  %1504 = vmatprep.mubr.bf16.mxu1 %v8838_v17 }
  0xa1   : > { %1312 = vmatmul.mubr.bf16.gmra.mrb[40].mxu0 %v8818_v2  ;;  %1505 = vmatmul.mubr.bf16.gmra.mrb[40].mxu1 %v8818_v2 }
  0xa2   : > { %1321 = vmatprep.mubr.bf16.mxu0 %v8845_v18  ;;  %1514 = vmatprep.mubr.bf16.mxu1 %v8845_v18 }
  0xa9   : > { %1322 = vmatmul.mubr.bf16.gmra.mrb[44].mxu0 %v8831_v15  ;;  %1515 = vmatmul.mubr.bf16.gmra.mrb[44].mxu1 %v8831_v15 }
  0xaa   : > { %1331 = vmatprep.mubr.bf16.mxu0 %v8852_v19  ;;  %1524 = vmatprep.mubr.bf16.mxu1 %v8852_v19 }
  0xb1   : > { %1332 = vmatmul.mubr.bf16.gmra.mrb[48].mxu0 %v8838_v17  ;;  %1525 = vmatmul.mubr.bf16.gmra.mrb[48].mxu1 %v8838_v17 }
  0xb2   : > { %1341 = vmatprep.mubr.bf16.mxu0 %v8859_v20  ;;  %1534 = vmatprep.mubr.bf16.mxu1 %v8859_v20 }
  0xb9   : > { %1342 = vmatmul.mubr.bf16.gmra.mrb[52].mxu0 %v8845_v18  ;;  %1535 = vmatmul.mubr.bf16.gmra.mrb[52].mxu1 %v8845_v18 }
  0xba   : > { %1351 = vmatprep.mubr.bf16.mxu0 %v8878_v28  ;;  %1544 = vmatprep.mubr.bf16.mxu1 %v8878_v28 }
  0xc1   : > { %1352 = vmatmul.mubr.bf16.gmra.mrb[56].mxu0 %v8852_v19  ;;  %1545 = vmatmul.mubr.bf16.gmra.mrb[56].mxu1 %v8852_v19 }
  0xc2   : > { %1361 = vmatprep.mubr.bf16.mxu0 %v8885_v29  ;;  %1554 = vmatprep.mubr.bf16.mxu1 %v8885_v29 }
  0xc9   : > { %1362 = vmatmul.mubr.bf16.gmra.mrb[60].mxu0 %v8859_v20  ;;  %1555 = vmatmul.mubr.bf16.gmra.mrb[60].mxu1 %v8859_v20 }
  0xca   : > { %1597 = vmatprep.mubr.bf16.mxu0 %v8894_v31  ;;  %1790 = vmatprep.mubr.bf16.mxu1 %v8894_v31 }
  0xd1   : > { %1598 = vmatmul.mubr.bf16.vlgmr.msra.gmra.mrb[64].mxu0 %v8894_v31  ;;  %1791 = vmatmul.mubr.bf16.vlgmr.msra.gmra.mrb[64].mxu1 %v8894_v31 }
  0xd2   : > { %1607 = vmatprep.mubr.bf16.mxu0 %v8607_v12  ;;  %1800 = vmatprep.mubr.bf16.mxu1 %v8607_v12  ;;  %v2700_v12 = vld [vmem:[%s11794_s3 + $0xc8] sm:$0xff] }
  0xd3   : > { %4212 = vmatpush1.bf16.msra.mxu0 %v7374_v36  ;;  %4558 = vmatpush1.bf16.msra.mxu1 %v7376_v37  ;;  %v7401_v58 = vcombine.high %v2700_v12, %v2704_v52  ;;  %v7400_v0 = vcombine.low %v2700_v12, %v2704_v52  ;;  %v2736_v36 = vld [vmem:[%s11794_s3 + $0x1e8] sm:$0xff]  ;;  %v7430_v37 = vcombine.low %v2731_v32, %v2735_v33  ;;  %v2751_v12 = vld [vmem:[%s11794_s3 + $0x260] sm:$0xff] }
  0xd4   : > { %4213 = vmatprep.subr.bf16.mxu0 %v7383_v38  ;;  %4559 = vmatprep.subr.bf16.mxu1 %v7385_v39  ;;  %v7433_v38 = vcombine.high %v2732_v34, %v2736_v36  ;;  %v7432_v39 = vcombine.low %v2732_v34, %v2736_v36  ;;  %v2748_v52 = vld [vmem:[%s11794_s3 + $0x248] sm:$0xff]  ;;  %v2787_v34 = vld [vmem:[%s11794_s3 + $0x380] sm:$0xff] }
  0xd7   : > { %4214 = vmatpush1.bf16.msra.mxu0 %v7382_v45  ;;  %4560 = vmatpush1.bf16.msra.mxu1 %v7384_v46  ;;  %v7438_v45 = vcombine.low %v2739_v42, %v2743_v43  ;;  %v7439_v46 = vcombine.high %v2739_v42, %v2743_v43 }
  0xd8   : > { %4215 = vmatprep.subr.bf16.mxu0 %v7391_v47  ;;  %4561 = vmatprep.subr.bf16.mxu1 %v7393_v49  ;;  %v2744_v47 = vld [vmem:[%s11794_s3 + $0x228] sm:$0xff] }
  0xd9   : > { %1608 = vmatmul.mubr.bf16.gmra.mrb[68].mxu0 %v8319_v57  ;;  %1801 = vmatmul.mubr.bf16.gmra.mrb[68].mxu1 %v8319_v57  ;;  %v7440_v49 = vcombine.low %v2740_v44, %v2744_v47  ;;  %v7441_v50 = vcombine.high %v2740_v44, %v2744_v47 }
  0xda   : > { %1617 = vmatprep.mubr.bf16.mxu0 %v8632_v26  ;;  %1810 = vmatprep.mubr.bf16.mxu1 %v8632_v26  ;;  %v2716_v26 = vld [vmem:[%s11794_s3 + $0x148] sm:$0xff] }
  0xdb   : > { %4216 = vmatpush1.bf16.msra.mxu0 %v7390_v53  ;;  %4562 = vmatpush1.bf16.msra.mxu1 %v7392_v54  ;;  %v7417_v10 = vcombine.high %v2716_v26, %v2720_v6  ;;  %v7416_v23 = vcombine.low %v2716_v26, %v2720_v6  ;;  %v7446_v53 = vcombine.low %v2747_v51, %v2751_v12  ;;  %v2768_v6 = vld [vmem:[%s11794_s3 + $0x2e8] sm:$0xff] }
  0xdc   : > { %4217 = vmatprep.subr.bf16.mxu0 %v7399_v55  ;;  %4563 = vmatprep.subr.bf16.mxu1 %v7401_v58  ;;  %v7447_v54 = vcombine.high %v2747_v51, %v2751_v12  ;;  %v2752_v55 = vld [vmem:[%s11794_s3 + $0x268] sm:$0xff] }
  0xdd   : > { %v7449_v58 = vcombine.high %v2748_v52, %v2752_v55 }
  0xdf   : > { %4218 = vmatpush1.bf16.msra.mxu0 %v7398_v63  ;;  %4564 = vmatpush1.bf16.msra.mxu1 %v7400_v0  ;;  %v2760_v63 = vld [vmem:[%s11794_s3 + $0x2a8] sm:$0xff] }
  0xe0   : > { %4219 = vmatprep.subr.bf16.mxu0 %v7407_v1  ;;  %4565 = vmatprep.subr.bf16.mxu1 %v7409_v3  ;;  %v7456_v0 = vcombine.low %v2756_v56, %v2760_v63  ;;  %v7457_v1 = vcombine.high %v2756_v56, %v2760_v63  ;;  %v2767_v3 = vld [vmem:[%s11794_s3 + $0x2e0] sm:$0xff] }
  0xe1   : > { %1618 = vmatmul.mubr.bf16.gmra.mrb[72].mxu0 %v8894_v31  ;;  %1811 = vmatmul.mubr.bf16.gmra.mrb[72].mxu1 %v8894_v31  ;;  %v7424_v31 = vcombine.low %v2724_v16, %v2728_v21  ;;  %v2776_v16 = vld [vmem:[%s11794_s3 + $0x328] sm:$0xff] }
  0xe2   : > { %1627 = vmatprep.mubr.bf16.mxu0 %v8663_v41  ;;  %1820 = vmatprep.mubr.bf16.mxu1 %v8663_v41 }
  0xe3   : > { %4220 = vmatpush1.bf16.msra.mxu0 %v7406_v7  ;;  %4566 = vmatpush1.bf16.msra.mxu1 %v7408_v8  ;;  %v7464_v7 = vcombine.low %v2764_v4, %v2768_v6  ;;  %v7465_v8 = vcombine.high %v2764_v4, %v2768_v6 }
  0xe4   : > { %4221 = vmatprep.subr.bf16.mxu0 %v7415_v9  ;;  %4567 = vmatprep.subr.bf16.mxu1 %v7417_v10  ;;  %v2775_v9 = vld [vmem:[%s11794_s3 + $0x320] sm:$0xff]  ;;  %v2772_v10 = vld [vmem:[%s11794_s3 + $0x308] sm:$0xff] }
  0xe5   : > { %v7472_v21 = vcombine.low %v2772_v10, %v2776_v16 }
  0xe7   : > { %4222 = vmatpush1.bf16.msra.mxu0 %v7414_v22  ;;  %4568 = vmatpush1.bf16.msra.mxu1 %v7416_v23  ;;  %v7473_v22 = vcombine.high %v2772_v10, %v2776_v16  ;;  %v2783_v23 = vld [vmem:[%s11794_s3 + $0x360] sm:$0xff] }
  0xe8   : > { %4223 = vmatprep.subr.bf16.mxu0 %v7423_v24  ;;  %4569 = vmatprep.subr.bf16.mxu1 %v7425_v25  ;;  %v2780_v24 = vld [vmem:[%s11794_s3 + $0x348] sm:$0xff]  ;;  %v9178_v16 = vld [vmem:[%s11794_s3 + $0x400] sm:$0xff] }
  0xe9   : > { %1628 = vmatmul.mubr.bf16.gmra.mrb[76].mxu0 %v8319_v57  ;;  %1821 = vmatmul.mubr.bf16.gmra.mrb[76].mxu1 %v8319_v57  ;;  %v7448_v57 = vcombine.low %v2748_v52, %v2752_v55  ;;  %v2799_v55 = vld [vmem:[%s11794_s3 + $0x3e0] sm:$0xff] }
  0xea   : > { %1637 = vmatprep.mubr.bf16.mxu0 %v8694_v59  ;;  %1830 = vmatprep.mubr.bf16.mxu1 %v8694_v59 }
  0xeb   : > { %4224 = vmatpush1.bf16.msra.mxu0 %v7422_v27  ;;  %4570 = vmatpush1.bf16.msra.mxu1 %v7424_v31  ;;  %v2784_v31 = vld [vmem:[%s11794_s3 + $0x368] sm:$0xff] }
  0xec   : > { %4225 = vmatprep.subr.bf16.mxu0 %v7431_v35  ;;  %4571 = vmatprep.subr.bf16.mxu1 %v7433_v38  ;;  %v7480_v32 = vcombine.low %v2780_v24, %v2784_v31  ;;  %v7481_v33 = vcombine.high %v2780_v24, %v2784_v31  ;;  %v2791_v35 = vld [vmem:[%s11794_s3 + $0x3a0] sm:$0xff]  ;;  %v2792_v38 = vld [vmem:[%s11794_s3 + $0x3a8] sm:$0xff] }
  0xed   : > { %v7486_v36 = vcombine.low %v2787_v34, %v2791_v35  ;;  %v9199_v24 = vld [vmem:[%s11794_s3 + $0x428] sm:$0xff] }
  0xef   : > { %4226 = vmatpush1.bf16.msra.mxu0 %v7430_v37  ;;  %4572 = vmatpush1.bf16.msra.mxu1 %v7432_v39  ;;  %v7487_v37 = vcombine.high %v2787_v34, %v2791_v35 }
  0xf0   : > { %4227 = vmatprep.subr.bf16.mxu0 %v7439_v46  ;;  %4573 = vmatprep.subr.bf16.mxu1 %v7441_v50 }
  0xf1   : > { %1638 = vmatmul.mubr.bf16.gmra.mrb[80].mxu0 %v8320_v40  ;;  %1831 = vmatmul.mubr.bf16.gmra.mrb[80].mxu1 %v8320_v40 }
  0xf2   : > { %1647 = vmatprep.mubr.bf16.mxu0 %v8725_v11  ;;  %1840 = vmatprep.mubr.bf16.mxu1 %v8725_v11 }
  0xf3   : > { %4228 = vmatpush1.bf16.msra.mxu0 %v7438_v45  ;;  %4574 = vmatpush1.bf16.msra.mxu1 %v7440_v49 }
  0xf4   : > { %4229 = vmatprep.subr.bf16.mxu0 %v7447_v54  ;;  %4575 = vmatprep.subr.bf16.mxu1 %v7449_v58  ;;  %v2795_v54 = vld [vmem:[%s11794_s3 + $0x3c0] sm:$0xff] }
  0xf5   : > { %v7494_v63 = vcombine.low %v2795_v54, %v2799_v55 }
  0xf7   : > { %4230 = vmatpush1.bf16.msra.mxu0 %v7446_v53  ;;  %4576 = vmatpush1.bf16.msra.mxu1 %v7448_v57 }
  0xf8   : > { %4577 = vmatprep.subr.bf16.mxu1 %v7457_v1 }
  0xf9   : > { %1648 = vmatmul.mubr.bf16.gmra.mrb[84].mxu0 %v8663_v41  ;;  %1841 = vmatmul.mubr.bf16.gmra.mrb[84].mxu1 %v8663_v41  ;;  %v2755_v41 = vld [vmem:[%s11794_s3 + $0x280] sm:$0xff] }
  0xfa   : > { %1657 = vmatprep.mubr.bf16.mxu0 %v8756_v30  ;;  %1850 = vmatprep.mubr.bf16.mxu1 %v8756_v30  ;;  %v7454_v61 = vcombine.low %v2755_v41, %v2759_v60  ;;  %v7455_v62 = vcombine.high %v2755_v41, %v2759_v60  ;;  %v7495_v41 = vcombine.high %v2795_v54, %v2799_v55  ;;  %v2800_v60 = vld [vmem:[%s11794_s3 + $0x3e8] sm:$0xff] }
  0xfb   : > { %4578 = vmatpush1.bf16.msra.mxu1 %v7456_v0 }
  0xfc   : > { %4231 = vmatprep.subr.bf16.mxu0 %v7455_v62  ;;  %4579 = vmatprep.subr.bf16.mxu1 %v7465_v8 }
  0xfd   : > { %4232 = vmatpush1.bf16.msra.mxu0 %v7454_v61 }
  0xff   : > { %4580 = vmatpush1.bf16.msra.mxu1 %v7464_v7 }
 0x100   : > { %4581 = vmatprep.subr.bf16.mxu1 %v7473_v22  ;;  %v9188_v22 = vld [vmem:[%s11794_s3 + $0x408] sm:$0xff] }
 0x101   : > { %1658 = vmatmul.mubr.bf16.gmra.mrb[88].mxu0 %v8694_v59  ;;  %1851 = vmatmul.mubr.bf16.gmra.mrb[88].mxu1 %v8694_v59  ;;  %v2763_v59 = vld [vmem:[%s11794_s3 + $0x2c0] sm:$0xff] }
 0x102   : > { %1667 = vmatprep.mubr.bf16.mxu0 %v8787_v48  ;;  %1860 = vmatprep.mubr.bf16.mxu1 %v8787_v48  ;;  %v7462_v5 = vcombine.low %v2763_v59, %v2767_v3  ;;  %v7463_v26 = vcombine.high %v2763_v59, %v2767_v3 }
 0x103   : > { %4582 = vmatpush1.bf16.msra.mxu1 %v7472_v21  ;;  %v9183_v21 = vld [vmem:[%s11794_s3 + $0x420] sm:$0xff] }
 0x104   : > { %4233 = vmatprep.subr.bf16.mxu0 %v7463_v26  ;;  %4583 = vmatprep.subr.bf16.mxu1 %v7481_v33 }
 0x105   : > { %4234 = vmatpush1.bf16.msra.mxu0 %v7462_v5 }
 0x107   : > { %4584 = vmatpush1.bf16.msra.mxu1 %v7480_v32 }
 0x109   : > { %1668 = vmatmul.mubr.bf16.gmra.mrb[92].mxu0 %v8725_v11  ;;  %1861 = vmatmul.mubr.bf16.gmra.mrb[92].mxu1 %v8725_v11  ;;  %v2771_v11 = vld [vmem:[%s11794_s3 + $0x300] sm:$0xff] }
 0x10a   : > { %1677 = vmatprep.mubr.bf16.mxu0 %v8818_v2  ;;  %1870 = vmatprep.mubr.bf16.mxu1 %v8818_v2  ;;  %v7470_v13 = vcombine.low %v2771_v11, %v2775_v9  ;;  %v7471_v14 = vcombine.high %v2771_v11, %v2775_v9 }
 0x10c   : > { %4235 = vmatprep.subr.bf16.mxu0 %v7471_v14 }
 0x10d   : > { %4236 = vmatpush1.bf16.msra.mxu0 %v7470_v13 }
 0x111   : > { %1678 = vmatmul.mubr.bf16.gmra.mrb[96].mxu0 %v8756_v30  ;;  %1871 = vmatmul.mubr.bf16.gmra.mrb[96].mxu1 %v8756_v30  ;;  %v2779_v30 = vld [vmem:[%s11794_s3 + $0x340] sm:$0xff] }
 0x112   : > { %1687 = vmatprep.mubr.bf16.mxu0 %v8831_v15  ;;  %1880 = vmatprep.mubr.bf16.mxu1 %v8831_v15  ;;  %v7478_v25 = vcombine.low %v2779_v30, %v2783_v23  ;;  %v7479_v27 = vcombine.high %v2779_v30, %v2783_v23  ;;  %v7503_v23 = vcombine.high %v9178_v16, %v9183_v21 }
 0x114   : > { %4237 = vmatprep.subr.bf16.mxu0 %v7479_v27 }
 0x115   : > { %4238 = vmatpush1.bf16.msra.mxu0 %v7478_v25 }
 0x116   : > { %4239 = vmatprep.subr.bf16.mxu0 %v7487_v37 }
 0x119   : > { %1688 = vmatmul.mubr.bf16.gmra.mrb[100].mxu0 %v8787_v48  ;;  %1881 = vmatmul.mubr.bf16.gmra.mrb[100].mxu1 %v8787_v48  ;;  %v2788_v48 = vld [vmem:[%s11794_s3 + $0x388] sm:$0xff] }
 0x11a   : > { %1697 = vmatprep.mubr.bf16.mxu0 %v8838_v17  ;;  %1890 = vmatprep.mubr.bf16.mxu1 %v8838_v17  ;;  %v7488_v39 = vcombine.low %v2788_v48, %v2792_v38  ;;  %v7489_v40 = vcombine.high %v2788_v48, %v2792_v38 }
 0x11b   : > { %4240 = vmatpush1.bf16.msra.mxu0 %v7486_v36 }
 0x11c   : > { %4585 = vmatprep.subr.bf16.mxu1 %v7489_v40  ;;  %4241 = vmatprep.subr.bf16.mxu0 %v7495_v41 }
 0x11d   : > { %4586 = vmatpush1.bf16.msra.mxu1 %v7488_v39 }
 0x11f   : > { %4242 = vmatpush1.bf16.msra.mxu0 %v7494_v63 }
 0x120   : > { %4384 = vmatprep.subr.bf16.mxu0 %v7503_v23 }
 0x121   : > { %1698 = vmatmul.mubr.bf16.gmra.mrb[104].mxu0 %v8818_v2  ;;  %1891 = vmatmul.mubr.bf16.gmra.mrb[104].mxu1 %v8818_v2 }
 0x122   : > { %1707 = vmatprep.mubr.bf16.mxu0 %v8845_v18  ;;  %1900 = vmatprep.mubr.bf16.mxu1 %v8845_v18 }
 0x124   : > { %v1213_v42 = vpop.f32.mrb[0].mxu0  ;;  %v1406_v43 = vpop.f32.mrb[0].mxu1 }
 0x125   : > { %v9106_v44 = vpop.f32.mrb[1].mxu0  ;;  %v9108_v45 = vpop.f32.mrb[1].mxu1 }
 0x126   : > { %v1217_v46 = vpop.f32.mrb[2].mxu0  ;;  %v1410_v47 = vpop.f32.mrb[2].mxu1 }
 0x127   : > { %v9112_v49 = vpop.f32.mrb[3].mxu0  ;;  %v9114_v50 = vpop.f32.mrb[3].mxu1 }
 0x129   : > { %1708 = vmatmul.mubr.bf16.gmra.mrb[108].mxu0 %v8831_v15  ;;  %1901 = vmatmul.mubr.bf16.gmra.mrb[108].mxu1 %v8831_v15  ;;  %v2796_v15 = vld [vmem:[%s11794_s3 + $0x3c8] sm:$0xff] }
 0x12a   : > { %1717 = vmatprep.mubr.bf16.mxu0 %v8852_v19  ;;  %1910 = vmatprep.mubr.bf16.mxu1 %v8852_v19  ;;  %v7497_v0 = vcombine.high %v2796_v15, %v2800_v60  ;;  %v7496_v59 = vcombine.low %v2796_v15, %v2800_v60 }
 0x12c   : > { %v1223_v12 = vpop.f32.mrb[4].mxu0  ;;  %v1416_v52 = vpop.f32.mrb[4].mxu1  ;;  %4587 = vmatprep.subr.bf16.mxu1 %v7497_v0 }
 0x12d   : > { %v9122_v53 = vpop.f32.mrb[5].mxu0  ;;  %v9133_v57 = vpop.f32.mrb[5].mxu1  ;;  %4588 = vmatpush1.bf16.msra.mxu1 %v7496_v59 }
 0x12e   : > { %v1227_v58 = vpop.f32.mrb[6].mxu0  ;;  %v1420_v61 = vpop.f32.mrb[6].mxu1 }
 0x12f   : > { %v9140_v62 = vpop.f32.mrb[7].mxu0  ;;  %v9142_v1 = vpop.f32.mrb[7].mxu1 }
 0x131   : > { %1718 = vmatmul.mubr.bf16.gmra.mrb[112].mxu0 %v8838_v17  ;;  %1911 = vmatmul.mubr.bf16.gmra.mrb[112].mxu1 %v8838_v17 }
 0x132   : > { %1727 = vmatprep.mubr.bf16.mxu0 %v8859_v20  ;;  %1920 = vmatprep.mubr.bf16.mxu1 %v8859_v20 }
 0x134   : > { %v9150_v4 = vpop.f32.mrb[8].mxu0  ;;  %v9152_v5 = vpop.f32.mrb[8].mxu1 }
 0x135   : > { %v9154_v26 = vpop.f32.mrb[9].mxu0  ;;  %v9158_v7 = vpop.f32.mrb[9].mxu1 }
 0x136   : > { %v9160_v8 = vpop.f32.mrb[10].mxu0  ;;  %v9164_v11 = vpop.f32.mrb[10].mxu1 }
 0x137   : > { %v9166_v9 = vpop.f32.mrb[11].mxu0  ;;  %v9170_v13 = vpop.f32.mrb[11].mxu1 }
 0x139   : > { %1728 = vmatmul.mubr.bf16.gmra.mrb[116].mxu0 %v8845_v18  ;;  %1921 = vmatmul.mubr.bf16.gmra.mrb[116].mxu1 %v8845_v18  ;;  %v7505_v18 = vcombine.high %v9188_v22, %v9199_v24 }
 0x13a   : > { %1737 = vmatprep.mubr.bf16.mxu0 %v8878_v28  ;;  %1930 = vmatprep.mubr.bf16.mxu1 %v8878_v28 }
 0x13b   : > { %4730 = vmatprep.subr.bf16.mxu1 %v7505_v18 }
 0x13c   : > { %v9206_v27 = vpop.f32.mrb[12].mxu0  ;;  %v9208_v31 = vpop.f32.mrb[12].mxu1 }
 0x13d   : > { %v9210_v32 = vpop.f32.mrb[13].mxu0  ;;  %v9214_v34 = vpop.f32.mrb[13].mxu1 }
 0x13e   : > { %v9216_v28 = vpop.f32.mrb[14].mxu0  ;;  %v9220_v48 = vpop.f32.mrb[14].mxu1 }
 0x13f   : > { %v9222_v36 = vpop.f32.mrb[15].mxu0  ;;  %v9226_v38 = vpop.f32.mrb[15].mxu1 }
 0x141   : > { %1738 = vmatmul.mubr.bf16.gmra.mrb[120].mxu0 %v8852_v19  ;;  %1931 = vmatmul.mubr.bf16.gmra.mrb[120].mxu1 %v8852_v19 }
 0x142   : > { %1747 = vmatprep.mubr.bf16.mxu0 %v8885_v29  ;;  %1940 = vmatprep.mubr.bf16.mxu1 %v8885_v29 }
 0x144   : > { %v9234_v40 = vpop.f32.mrb[16].mxu0  ;;  %v9236_v42 = vpop.f32.mrb[16].mxu1 }
 0x145   : > { %v9238_v43 = vpop.f32.mrb[17].mxu0  ;;  %v9242_v47 = vpop.f32.mrb[17].mxu1 }
 0x146   : > { %v9244_v12 = vpop.f32.mrb[18].mxu0  ;;  %v9248_v52 = vpop.f32.mrb[18].mxu1 }
 0x147   : > { %v9250_v54 = vpop.f32.mrb[19].mxu0  ;;  %v9254_v55 = vpop.f32.mrb[19].mxu1 }
 0x149   : > { %1748 = vmatmul.mubr.bf16.gmra.mrb[124].mxu0 %v8859_v20  ;;  %1941 = vmatmul.mubr.bf16.gmra.mrb[124].mxu1 %v8859_v20 }
 0x14c   : > { %v9260_v58 = vpop.f32.mrb[20].mxu0  ;;  %v9262_v41 = vpop.f32.mrb[20].mxu1 }
 0x14d   : > { %v9264_v60 = vpop.f32.mrb[21].mxu0  ;;  %v9268_v63 = vpop.f32.mrb[21].mxu1 }
 0x14e   : > { %v9270_v0 = vpop.f32.mrb[22].mxu0  ;;  %v9274_v23 = vpop.f32.mrb[22].mxu1 }
 0x14f   : > { %v9276_v18 = vpop.f32.mrb[23].mxu0  ;;  %v9280_v15 = vpop.f32.mrb[23].mxu1 }
 0x154   : > { %v9284_v61 = vpop.f32.mrb[24].mxu0  ;;  %v9286_v19 = vpop.f32.mrb[24].mxu1 }
 0x155   : > { %11943 = vst [vmem:[#allocation2_spill] sm:$0xff] %v9286_v19  ;;  %v9288_v46 = vpop.f32.mrb[25].mxu0  ;;  %v9292_v39 = vpop.f32.mrb[25].mxu1  ;;  %v2811_v19 = vld [vmem:[%s11794_s3 + $0x440] sm:$0xff] }
 0x156   : > { %11944 = vst [vmem:[#allocation3_spill] sm:$0xff] %v9288_v46  ;;  %11945 = vst [vmem:[#allocation4_spill] sm:$0xff] %v9292_v39  ;;  %v9294_v37 = vpop.f32.mrb[26].mxu0  ;;  %v9298_v35 = vpop.f32.mrb[26].mxu1 }
 0x157   : > { %11946 = vst [vmem:[#allocation5_spill] sm:$0xff] %v9294_v37  ;;  %11947 = vst [vmem:[#allocation6_spill] sm:$0xff] %v9298_v35  ;;  %v9300_v33 = vpop.f32.mrb[27].mxu0  ;;  %v9304_v14 = vpop.f32.mrb[27].mxu1 }
 0x158   : > { %11948 = vst [vmem:[#allocation7_spill] sm:$0xff] %v9300_v33  ;;  %11949 = vst [vmem:[#allocation8_spill] sm:$0xff] %v9304_v14 }
 0x15c   : > { %v9308_v59 = vpop.f32.mrb[28].mxu0  ;;  %v9310_v17 = vpop.f32.mrb[28].mxu1 }
 0x15d   : > { %11950 = vst [vmem:[#allocation9_spill] sm:$0xff] %v9308_v59  ;;  %11951 = vst [vmem:[#allocation10_spill] sm:$0xff] %v9310_v17  ;;  %v9312_v6 = vpop.f32.mrb[29].mxu0  ;;  %v9316_v25 = vpop.f32.mrb[29].mxu1 }
 0x15e   : > { %11952 = vst [vmem:[#allocation11_spill] sm:$0xff] %v9312_v6  ;;  %11953 = vst [vmem:[#allocation12_spill] sm:$0xff] %v9316_v25  ;;  %v9318_v30 = vpop.f32.mrb[30].mxu0  ;;  %v9322_v3 = vpop.f32.mrb[30].mxu1 }
 0x15f   : > { %11954 = vst [vmem:[#allocation13_spill] sm:$0xff] %v9318_v30  ;;  %11955 = vst [vmem:[#allocation14_spill] sm:$0xff] %v9322_v3  ;;  %v9324_v56 = vpop.f32.mrb[31].mxu0  ;;  %v9328_v51 = vpop.f32.mrb[31].mxu1 }
 0x160   : > { %11956 = vst [vmem:[#allocation15_spill] sm:$0xff] %v9324_v56  ;;  %11957 = vst [vmem:[#allocation16_spill] sm:$0xff] %v9328_v51 }
 0x164   : > { %v9332_v20 = vpop.f32.mrb[32].mxu0  ;;  %v9334_v17 = vpop.f32.mrb[32].mxu1 }
 0x165   : > { %11958 = vst [vmem:[#allocation17_spill] sm:$0xff] %v9332_v20  ;;  %11959 = vst [vmem:[#allocation18_spill] sm:$0xff] %v9334_v17  ;;  %v9336_v59 = vpop.f32.mrb[33].mxu0  ;;  %v9340_v25 = vpop.f32.mrb[33].mxu1 }
 0x166   : > { %11960 = vst [vmem:[#allocation19_spill] sm:$0xff] %v9336_v59  ;;  %11961 = vst [vmem:[#allocation20_spill] sm:$0xff] %v9340_v25  ;;  %v9342_v6 = vpop.f32.mrb[34].mxu0  ;;  %v9346_v3 = vpop.f32.mrb[34].mxu1 }
 0x167   : > { %11962 = vst [vmem:[#allocation21_spill] sm:$0xff] %v9342_v6  ;;  %11963 = vst [vmem:[#allocation22_spill] sm:$0xff] %v9346_v3  ;;  %v9348_v30 = vpop.f32.mrb[35].mxu0  ;;  %v9352_v51 = vpop.f32.mrb[35].mxu1 }
 0x168   : > { %11964 = vst [vmem:[#allocation23_spill] sm:$0xff] %v9348_v30  ;;  %11965 = vst [vmem:[#allocation24_spill] sm:$0xff] %v9352_v51 }
 0x16c   : > { %v9356_v29 = vpop.f32.mrb[36].mxu0  ;;  %v9358_v17 = vpop.f32.mrb[36].mxu1 }
 0x16d   : > { %11966 = vst [vmem:[#allocation25_spill] sm:$0xff] %v9356_v29  ;;  %11967 = vst [vmem:[#allocation26_spill] sm:$0xff] %v9358_v17  ;;  %v9360_v20 = vpop.f32.mrb[37].mxu0  ;;  %v9364_v25 = vpop.f32.mrb[37].mxu1 }
 0x16e   : > { %11968 = vst [vmem:[#allocation27_spill] sm:$0xff] %v9360_v20  ;;  %11969 = vst [vmem:[#allocation28_spill] sm:$0xff] %v9364_v25  ;;  %v9366_v59 = vpop.f32.mrb[38].mxu0  ;;  %v9370_v3 = vpop.f32.mrb[38].mxu1 }
 0x16f   : > { %11970 = vst [vmem:[#allocation29_spill] sm:$0xff] %v9366_v59  ;;  %11971 = vst [vmem:[#allocation30_spill] sm:$0xff] %v9370_v3  ;;  %v9372_v6 = vpop.f32.mrb[39].mxu0  ;;  %v9376_v51 = vpop.f32.mrb[39].mxu1 }
 0x170   : > { %11972 = vst [vmem:[#allocation31_spill] sm:$0xff] %v9372_v6  ;;  %11973 = vst [vmem:[#allocation32_spill] sm:$0xff] %v9376_v51 }
 0x174   : > { %v9380_v10 = vpop.f32.mrb[40].mxu0  ;;  %v9382_v17 = vpop.f32.mrb[40].mxu1 }
 0x175   : > { %11974 = vst [vmem:[#allocation33_spill] sm:$0xff] %v9380_v10  ;;  %11975 = vst [vmem:[#allocation34_spill] sm:$0xff] %v9382_v17  ;;  %v9384_v29 = vpop.f32.mrb[41].mxu0  ;;  %v9388_v25 = vpop.f32.mrb[41].mxu1 }
 0x176   : > { %11976 = vst [vmem:[#allocation35_spill] sm:$0xff] %v9384_v29  ;;  %11977 = vst [vmem:[#allocation36_spill] sm:$0xff] %v9388_v25  ;;  %v9390_v20 = vpop.f32.mrb[42].mxu0  ;;  %v9394_v3 = vpop.f32.mrb[42].mxu1 }
 0x177   : > { %11978 = vst [vmem:[#allocation37_spill] sm:$0xff] %v9390_v20  ;;  %11979 = vst [vmem:[#allocation38_spill] sm:$0xff] %v9394_v3  ;;  %v9396_v59 = vpop.f32.mrb[43].mxu0  ;;  %v9400_v51 = vpop.f32.mrb[43].mxu1 }
 0x178   : > { %11980 = vst [vmem:[#allocation39_spill] sm:$0xff] %v9396_v59  ;;  %11981 = vst [vmem:[#allocation40_spill] sm:$0xff] %v9400_v51 }
 0x17c   : > { %v9404_v2 = vpop.f32.mrb[44].mxu0  ;;  %v9406_v17 = vpop.f32.mrb[44].mxu1 }
 0x17d   : > { %11982 = vst [vmem:[#allocation41_spill] sm:$0xff] %v9404_v2  ;;  %11983 = vst [vmem:[#allocation42_spill] sm:$0xff] %v9406_v17  ;;  %v9408_v10 = vpop.f32.mrb[45].mxu0  ;;  %v9412_v25 = vpop.f32.mrb[45].mxu1 }
 0x17e   : > { %11984 = vst [vmem:[#allocation43_spill] sm:$0xff] %v9408_v10  ;;  %11985 = vst [vmem:[#allocation44_spill] sm:$0xff] %v9412_v25  ;;  %v9414_v29 = vpop.f32.mrb[46].mxu0  ;;  %v9418_v3 = vpop.f32.mrb[46].mxu1 }
 0x17f   : > { %11986 = vst [vmem:[#allocation45_spill] sm:$0xff] %v9414_v29  ;;  %11987 = vst [vmem:[#allocation46_spill] sm:$0xff] %v9418_v3  ;;  %v9420_v20 = vpop.f32.mrb[47].mxu0  ;;  %v9424_v51 = vpop.f32.mrb[47].mxu1 }
 0x180   : > { %11988 = vst [vmem:[#allocation47_spill] sm:$0xff] %v9420_v20  ;;  %11989 = vst [vmem:[#allocation48_spill] sm:$0xff] %v9424_v51 }
 0x184   : > { %v9428_v56 = vpop.f32.mrb[48].mxu0  ;;  %v9430_v17 = vpop.f32.mrb[48].mxu1 }
 0x185   : > { %11990 = vst [vmem:[#allocation49_spill] sm:$0xff] %v9428_v56  ;;  %11991 = vst [vmem:[#allocation50_spill] sm:$0xff] %v9430_v17  ;;  %v9432_v2 = vpop.f32.mrb[49].mxu0  ;;  %v9436_v25 = vpop.f32.mrb[49].mxu1 }
 0x186   : > { %11992 = vst [vmem:[#allocation51_spill] sm:$0xff] %v9432_v2  ;;  %11993 = vst [vmem:[#allocation52_spill] sm:$0xff] %v9436_v25  ;;  %v9438_v10 = vpop.f32.mrb[50].mxu0  ;;  %v9442_v3 = vpop.f32.mrb[50].mxu1 }
 0x187   : > { %11994 = vst [vmem:[#allocation53_spill] sm:$0xff] %v9438_v10  ;;  %11995 = vst [vmem:[#allocation54_spill] sm:$0xff] %v9442_v3  ;;  %v9444_v29 = vpop.f32.mrb[51].mxu0  ;;  %v9448_v51 = vpop.f32.mrb[51].mxu1 }
 0x188   : > { %11996 = vst [vmem:[#allocation55_spill] sm:$0xff] %v9444_v29  ;;  %11997 = vst [vmem:[#allocation56_spill] sm:$0xff] %v9448_v51 }
 0x18c   : > { %v9452_v30 = vpop.f32.mrb[52].mxu0  ;;  %v9454_v17 = vpop.f32.mrb[52].mxu1 }
 0x18d   : > { %11998 = vst [vmem:[#allocation57_spill] sm:$0xff] %v9452_v30  ;;  %11999 = vst [vmem:[#allocation58_spill] sm:$0xff] %v9454_v17  ;;  %v9456_v56 = vpop.f32.mrb[53].mxu0  ;;  %v9460_v25 = vpop.f32.mrb[53].mxu1 }
 0x18e   : > { %12000 = vst [vmem:[#allocation59_spill] sm:$0xff] %v9456_v56  ;;  %12001 = vst [vmem:[#allocation60_spill] sm:$0xff] %v9460_v25  ;;  %v9462_v2 = vpop.f32.mrb[54].mxu0  ;;  %v9466_v3 = vpop.f32.mrb[54].mxu1 }
 0x18f   : > { %12002 = vst [vmem:[#allocation61_spill] sm:$0xff] %v9462_v2  ;;  %12003 = vst [vmem:[#allocation62_spill] sm:$0xff] %v9466_v3  ;;  %v9468_v10 = vpop.f32.mrb[55].mxu0  ;;  %v9472_v51 = vpop.f32.mrb[55].mxu1  ;;  %v2145_v2 = vlaneseq }
 0x190   : > { %12004 = vst [vmem:[#allocation63_spill] sm:$0xff] %v9468_v10  ;;  %12005 = vst [vmem:[#allocation64_spill] sm:$0xff] %v9472_v51 }
 0x194   : > { %v9476_v6 = vpop.f32.mrb[56].mxu0  ;;  %v9478_v17 = vpop.f32.mrb[56].mxu1 }
 0x195   : > { %12006 = vst [vmem:[#allocation65_spill] sm:$0xff] %v9476_v6  ;;  %12007 = vst [vmem:[#allocation66_spill] sm:$0xff] %v9478_v17  ;;  %v1355_v30 = vpop.f32.mrb[57].mxu0  ;;  %v1548_v25 = vpop.f32.mrb[57].mxu1 }
 0x196   : > { %v9482_v56 = vpop.f32.mrb[58].mxu0  ;;  %v9484_v14 = vpop.f32.mrb[58].mxu1 }
 0x197   : > { %12008 = vst [vmem:[#allocation67_spill] sm:$0xff] %v9482_v56  ;;  %12009 = vst [vmem:[#allocation68_spill] sm:$0xff] %v9484_v14  ;;  %v1359_v33 = vpop.f32.mrb[59].mxu0  ;;  %v1552_v3 = vpop.f32.mrb[59].mxu1 }
 0x198   : > { %v9498_v33 = vshrl.u32 %v2145_v2, 7 }
 0x19a   : > { %12014 = vst [vmem:[#allocation73_spill] sm:$0xff] %v9498_v33  ;;  %v11868_v14 = vsub.s32 1, %v9498_v33 }
 0x19c   : > { %v9488_v29 = vpop.f32.mrb[60].mxu0  ;;  %v9490_v51 = vpop.f32.mrb[60].mxu1 }
 0x19d   : > { %12010 = vst [vmem:[#allocation69_spill] sm:$0xff] %v9488_v29  ;;  %12011 = vst [vmem:[#allocation70_spill] sm:$0xff] %v9490_v51  ;;  %v1365_v10 = vpop.f32.mrb[61].mxu0  ;;  %v1558_v59 = vpop.f32.mrb[61].mxu1 }
 0x19e   : > { %v9494_v25 = vpop.f32.mrb[62].mxu0  ;;  %v9496_v17 = vpop.f32.mrb[62].mxu1  ;;  %v2143_v10 = vld [vmem:[%s11793_s2] sm:$0x3] }
 0x19f   : > { %12012 = vst [vmem:[#allocation71_spill] sm:$0xff] %v9494_v25  ;;  %12013 = vst [vmem:[#allocation72_spill] sm:$0xff] %v9496_v17  ;;  %v1369_v6 = vpop.f32.mrb[63].mxu0  ;;  %v1562_v20 = vpop.f32.mrb[63].mxu1  ;;  %v9508_v2 = vrot.slane %v2143_v10, %v11868_v14 }
 0x1a0   : > { %v12015_v20 = vmax.f32 %v9106_v44, %v9108_v45  ;;  %v2815_v44 = vld [vmem:[%s11794_s3 + $0x460] sm:$0xff] }
 0x1a4   : > { %v1599_v56 = vpop.f32.mrb[64].mxu0  ;;  %v1792_v30 = vpop.f32.mrb[64].mxu1 }
 0x1a5   : > { %v1601_v59 = vpop.f32.mrb[65].mxu0  ;;  %v1794_v51 = vpop.f32.mrb[65].mxu1  ;;  %v12016_v30 = vmax.f32 %v9112_v49, %v9114_v50 }
 0x1a6   : > { %v1603_v29 = vpop.f32.mrb[66].mxu0  ;;  %v2016_v35 = vmax.f32 %v1601_v59, %v1794_v51  ;;  %v1796_v6 = vpop.f32.mrb[66].mxu1 }
 0x1a7   : > { %v1605_v37 = vpop.f32.mrb[67].mxu0  ;;  %v1798_v3 = vpop.f32.mrb[67].mxu1 }
 0x1a8   : > { %v2080_v56 = vmax.f32 %v12015_v20, %v2016_v35  ;;  %v2018_v17 = vmax.f32 %v1605_v37, %v1798_v3  ;;  %v11873_v20 = vsub.s32 0, %v9498_v33 }
 0x1aa   : > { %v2156_v25 = vadd.f32 %v9508_v2, %v2080_v56  ;;  %v2082_v39 = vmax.f32 %v12016_v30, %v2018_v17  ;;  %v2812_v17 = vld [vmem:[%s11794_s3 + $0x448] sm:$0xff] }
 0x1ac   : > { %v1609_v29 = vpop.f32.mrb[68].mxu0  ;;  %v2158_v51 = vadd.f32 %v9508_v2, %v2082_v39  ;;  %v1802_v59 = vpop.f32.mrb[68].mxu1  ;;  %v2220_v45 = vmax.f32 %v2156_v25, 0.0  ;;  %v2816_v39 = vld [vmem:[%s11794_s3 + $0x468] sm:$0xff]  ;;  %v12017_v25 = vmax.f32 %v9122_v53, %v9133_v57  ;;  %v9550_v53 = vld [vmem:[%s11794_s3 + $0x4a0] sm:$0xff] }
 0x1ad   : > { %v1611_v14 = vpop.f32.mrb[69].mxu0  ;;  %v1804_v46 = vpop.f32.mrb[69].mxu1  ;;  %v7513_v29 = vcombine.high %v2812_v17, %v2816_v39  ;;  %v9555_v57 = vld [vmem:[%s11794_s3 + $0x488] sm:$0xff] }
 0x1ae   : > { %v1613_v6 = vpop.f32.mrb[70].mxu0  ;;  %v2222_v35 = vmax.f32 %v2158_v51, 0.0  ;;  %v2020_v37 = vmax.f32 %v1611_v14, %v1804_v46  ;;  %v1806_v49 = vpop.f32.mrb[70].mxu1  ;;  %v7511_v46 = vcombine.high %v2811_v19, %v2815_v44  ;;  %v9539_v51 = vld [vmem:[%s11794_s3 + $0x480] sm:$0xff] }
 0x1af   : > { %v1615_v50 = vpop.f32.mrb[71].mxu0  ;;  %v1808_v3 = vpop.f32.mrb[71].mxu1  ;;  %v12018_v6 = vmax.f32 %v9140_v62, %v9142_v1  ;;  %v11871_v62 = vmov 0.0|0.0  }
 0x1b0   : > { %v9531_v56 = vpack.c.bf16 %v2222_v35, %v2220_v45  ;;  %v2084_v30 = vmax.f32 %v12017_v25, %v2020_v37  ;;  %v2022_v14 = vmax.f32 %v1615_v50, %v1808_v3  ;;  %v9560_v45 = vld [vmem:[%s11794_s3 + $0x4a8] sm:$0xff]  ;;  %v9566_v35 = vrot.slane %v2143_v10, %v11873_v20  ;;  %v9583_v10 = vld [vmem:[%s11794_s3 + $0x4e0] sm:$0xff] }
 0x1b1   : > { %v12019_v3 = vcombine.low %v9178_v16, %v9183_v21  ;;  %v12020_v25 = vcombine.low %v9188_v22, %v9199_v24  ;;  %v7519_v22 = vcombine.high %v9539_v51, %v9550_v53  ;;  %v7521_v24 = vcombine.high %v9555_v57, %v9560_v45 }
 0x1b2   : > { %v2160_v59 = vadd.f32 %v9508_v2, %v2084_v30  ;;  %v2086_v49 = vmax.f32 %v12018_v6, %v2022_v14  ;;  %4243 = vmatprep.mubr.bf16.mxu0 %v9531_v56  ;;  %4589 = vmatprep.mubr.bf16.mxu1 %v9531_v56  ;;  %v7510_v14 = vcombine.low %v2811_v19, %v2815_v44 }
 0x1b3   : > { %4244 = vmatmul.mubr.bf16.vlgmr.msra.gmra.mrb[128].mxu0 %v11871_v62  ;;  %4590 = vmatmul.mubr.bf16.vlgmr.msra.gmra.mrb[128].mxu1 %v11871_v62  ;;  %v7512_v6 = vcombine.low %v2812_v17, %v2816_v39  ;;  %v9578_v62 = vld [vmem:[%s11794_s3 + $0x4c0] sm:$0xff] }
 0x1b4   : > { %v1619_v1 = vpop.f32.mrb[72].mxu0  ;;  %v2162_v37 = vadd.f32 %v9508_v2, %v2086_v49  ;;  %v1812_v50 = vpop.f32.mrb[72].mxu1  ;;  %4385 = vmatpush1.bf16.msra.mxu0 %v12019_v3  ;;  %4731 = vmatpush1.bf16.msra.mxu1 %v12020_v25  ;;  %v2224_v19 = vmax.f32 %v2160_v59, 0.0  ;;  %v7518_v25 = vcombine.low %v9539_v51, %v9550_v53  ;;  %v7527_v51 = vcombine.high %v9578_v62, %v9583_v10 }
 0x1b5   : > { %v1621_v30 = vpop.f32.mrb[73].mxu0  ;;  %v2023_v49 = vmax.f32 %v1619_v1, %v1812_v50  ;;  %v1814_v16 = vpop.f32.mrb[73].mxu1  ;;  %4386 = vmatprep.subr.bf16.mxu0 %v7511_v46  ;;  %4732 = vmatprep.subr.bf16.mxu1 %v7513_v29  ;;  %v9594_v1 = vld [vmem:[%s11794_s3 + $0x4c8] sm:$0xff]  ;;  %v12021_v29 = vmax.f32 %v9150_v4, %v9152_v5  ;;  %v12023_v5 = vmax.f32 %v9160_v8, %v9164_v11 }
 0x1b6   : > { %v1623_v21 = vpop.f32.mrb[74].mxu0  ;;  %v2226_v44 = vmax.f32 %v2162_v37, 0.0  ;;  %v2024_v17 = vmax.f32 %v1621_v30, %v1814_v16  ;;  %v1816_v39 = vpop.f32.mrb[74].mxu1  ;;  %v9599_v46 = vld [vmem:[%s11794_s3 + $0x4e8] sm:$0xff]  ;;  %v7520_v30 = vcombine.low %v9555_v57, %v9560_v45  ;;  %v12022_v16 = vmax.f32 %v9154_v26, %v9158_v7  ;;  %v9622_v45 = vld [vmem:[%s11794_s3 + $0x500] sm:$0xff] }
 0x1b7   : > { %v1625_v3 = vpop.f32.mrb[75].mxu0  ;;  %v2087_v59 = vmax.f32 %v12021_v29, %v2023_v49  ;;  %v2025_v37 = vmax.f32 %v1623_v21, %v1816_v39  ;;  %v1818_v50 = vpop.f32.mrb[75].mxu1  ;;  %v7529_v57 = vcombine.high %v9594_v1, %v9599_v46  ;;  %v9627_v26 = vld [vmem:[%s11794_s3 + $0x520] sm:$0xff]  ;;  %v12024_v8 = vmax.f32 %v9166_v9, %v9170_v13 }
 0x1b8   : > { %v9608_v53 = vpack.c.bf16 %v2226_v44, %v2224_v19  ;;  %v2088_v20 = vmax.f32 %v12022_v16, %v2024_v17  ;;  %v2026_v33 = vmax.f32 %v1625_v3, %v1818_v50  ;;  %4387 = vmatpush1.bf16.msra.mxu0 %v7510_v14  ;;  %4733 = vmatpush1.bf16.msra.mxu1 %v7512_v6  ;;  %v9638_v14 = vld [vmem:[%s11794_s3 + $0x508] sm:$0xff]  ;;  %v12025_v21 = vmov 0.0|0.0   ;;  %v9660_v39 = vld [vmem:[%s11794_s3 + $0x540] sm:$0xff] }
 0x1b9   : > { %v2163_v4 = vadd.f32 %v9566_v35, %v2087_v59  ;;  %v2089_v49 = vmax.f32 %v12023_v5, %v2025_v37  ;;  %4388 = vmatprep.subr.bf16.mxu0 %v7519_v22  ;;  %4734 = vmatprep.subr.bf16.mxu1 %v7521_v24  ;;  %v9643_v6 = vld [vmem:[%s11794_s3 + $0x528] sm:$0xff]  ;;  %v7526_v13 = vcombine.low %v9578_v62, %v9583_v10  ;;  %v9665_v62 = vld [vmem:[%s11794_s3 + $0x560] sm:$0xff] }
 0x1ba   : > { %v2164_v7 = vadd.f32 %v9508_v2, %v2088_v20  ;;  %v2090_v11 = vmax.f32 %v12024_v8, %v2026_v33  ;;  %4253 = vmatprep.mubr.bf16.mxu0 %v9608_v53  ;;  %4599 = vmatprep.mubr.bf16.mxu1 %v9608_v53  ;;  %v7528_v33 = vcombine.low %v9594_v1, %v9599_v46 }
 0x1bb   : > { %v2165_v20 = vadd.f32 %v9566_v35, %v2089_v49  ;;  %4254 = vmatmul.mubr.bf16.gmra.mrb[132].mxu0 %v12025_v21  ;;  %4600 = vmatmul.mubr.bf16.gmra.mrb[132].mxu1 %v12025_v21  ;;  %v7534_v44 = vcombine.low %v9622_v45, %v9627_v26  ;;  %v7535_v17 = vcombine.high %v9622_v45, %v9627_v26  ;;  %v2227_v10 = vmax.f32 %v2163_v4, 0.0  ;;  %v9674_v4 = vld [vmem:[%s11794_s3 + $0x548] sm:$0xff] }
 0x1bc   : > { %v1629_v9 = vpop.f32.mrb[76].mxu0  ;;  %v2166_v22 = vadd.f32 %v9508_v2, %v2090_v11  ;;  %v1822_v24 = vpop.f32.mrb[76].mxu1  ;;  %4389 = vmatpush1.bf16.msra.mxu0 %v7518_v25  ;;  %4735 = vmatpush1.bf16.msra.mxu1 %v7520_v30  ;;  %v7537_v29 = vcombine.high %v9638_v14, %v9643_v6  ;;  %v2228_v59 = vmax.f32 %v2164_v7, 0.0  ;;  %v7536_v5 = vcombine.low %v9638_v14, %v9643_v6 }
 0x1bd   : > { %v1631_v19 = vpop.f32.mrb[77].mxu0  ;;  %v2229_v3 = vmax.f32 %v2165_v20, 0.0  ;;  %v2027_v25 = vmax.f32 %v1629_v9, %v1822_v24  ;;  %v1824_v1 = vpop.f32.mrb[77].mxu1  ;;  %4390 = vmatprep.subr.bf16.mxu0 %v7527_v51  ;;  %4736 = vmatprep.subr.bf16.mxu1 %v7529_v57  ;;  %v9679_v51 = vld [vmem:[%s11794_s3 + $0x568] sm:$0xff]  ;;  %v12026_v57 = vmax.f32 %v9206_v27, %v9208_v31  ;;  %v7543_v8 = vcombine.high %v9660_v39, %v9665_v62  ;;  %v9702_v24 = vld [vmem:[%s11794_s3 + $0x580] sm:$0xff] }
 0x1be   : > { %v1633_v46 = vpop.f32.mrb[78].mxu0  ;;  %v2230_v37 = vmax.f32 %v2166_v22, 0.0  ;;  %v2028_v50 = vmax.f32 %v1631_v19, %v1824_v1  ;;  %v1826_v30 = vpop.f32.mrb[78].mxu1  ;;  %v12027_v14 = vmax.f32 %v9210_v32, %v9214_v34  ;;  %v12028_v27 = vmax.f32 %v9216_v28, %v9220_v48  ;;  %v9707_v32 = vld [vmem:[%s11794_s3 + $0x5a0] sm:$0xff] }
 0x1bf   : > { %v1635_v16 = vpop.f32.mrb[79].mxu0  ;;  %v9681_v49 = vpack.c.bf16 %v2229_v3, %v2227_v10  ;;  %v2091_v45 = vmax.f32 %v12026_v57, %v2027_v25  ;;  %v2029_v26 = vmax.f32 %v1633_v46, %v1826_v30  ;;  %v1828_v7 = vpop.f32.mrb[79].mxu1  ;;  %v7545_v22 = vcombine.high %v9674_v4, %v9679_v51 }
 0x1c0   : > { %v9688_v11 = vpack.c.bf16 %v2230_v37, %v2228_v59  ;;  %v2092_v6 = vmax.f32 %v12027_v14, %v2028_v50  ;;  %v2030_v20 = vmax.f32 %v1635_v16, %v1828_v7  ;;  %4391 = vmatpush1.bf16.msra.mxu0 %v7526_v13  ;;  %4737 = vmatpush1.bf16.msra.mxu1 %v7528_v33  ;;  %v9718_v13 = vld [vmem:[%s11794_s3 + $0x588] sm:$0xff] }
 0x1c1   : > { %v2167_v9 = vadd.f32 %v9566_v35, %v2091_v45  ;;  %v2093_v31 = vmax.f32 %v12028_v27, %v2029_v26  ;;  %4392 = vmatprep.subr.bf16.mxu0 %v7535_v17  ;;  %4738 = vmatprep.subr.bf16.mxu1 %v7537_v29  ;;  %v12029_v28 = vmax.f32 %v9222_v36, %v9226_v38  ;;  %v9723_v33 = vld [vmem:[%s11794_s3 + $0x5a8] sm:$0xff]  ;;  %v9740_v29 = vld [vmem:[%s11794_s3 + $0x5c0] sm:$0xff] }
 0x1c2   : > { %v2168_v34 = vadd.f32 %v9508_v2, %v2092_v6  ;;  %4263 = vmatprep.mubr.bf16.mxu0 %v9688_v11  ;;  %4609 = vmatprep.mubr.bf16.mxu1 %v9688_v11  ;;  %v7542_v38 = vcombine.low %v9660_v39, %v9665_v62  ;;  %v7544_v17 = vcombine.low %v9674_v4, %v9679_v51  ;;  %v9745_v39 = vld [vmem:[%s11794_s3 + $0x5e0] sm:$0xff]  ;;  %v9754_v26 = vld [vmem:[%s11794_s3 + $0x5c8] sm:$0xff] }
 0x1c3   : > { %v2094_v48 = vmax.f32 %v12029_v28, %v2030_v20  ;;  %v2169_v19 = vadd.f32 %v9566_v35, %v2093_v31  ;;  %4264 = vmatmul.mubr.bf16.gmra.mrb[136].mxu0 %v9681_v49  ;;  %4610 = vmatmul.mubr.bf16.gmra.mrb[136].mxu1 %v9681_v49  ;;  %v7550_v1 = vcombine.low %v9702_v24, %v9707_v32  ;;  %v2231_v62 = vmax.f32 %v2167_v9, 0.0  ;;  %v9759_v7 = vld [vmem:[%s11794_s3 + $0x5e8] sm:$0xff] }
 0x1c4   : > { %v1639_v36 = vpop.f32.mrb[80].mxu0  ;;  %v1832_v3 = vpop.f32.mrb[80].mxu1  ;;  %4393 = vmatpush1.bf16.msra.mxu0 %v7534_v44  ;;  %4739 = vmatpush1.bf16.msra.mxu1 %v7536_v5  ;;  %v7551_v46 = vcombine.high %v9702_v24, %v9707_v32  ;;  %v7553_v30 = vcombine.high %v9718_v13, %v9723_v33  ;;  %v2232_v16 = vmax.f32 %v2168_v34, 0.0  ;;  %v7552_v45 = vcombine.low %v9718_v13, %v9723_v33  ;;  %v9798_v13 = vld [vmem:[%s11794_s3 + $0x608] sm:$0xff] }
 0x1c5   : > { %v2170_v10 = vadd.f32 %v9508_v2, %v2094_v48  ;;  %v1641_v25 = vpop.f32.mrb[81].mxu0  ;;  %v2233_v59 = vmax.f32 %v2169_v19, 0.0  ;;  %v2031_v44 = vmax.f32 %v1639_v36, %v1832_v3  ;;  %v1834_v37 = vpop.f32.mrb[81].mxu1  ;;  %4394 = vmatprep.subr.bf16.mxu0 %v7543_v8  ;;  %4740 = vmatprep.subr.bf16.mxu1 %v7545_v22  ;;  %v12030_v14 = vmax.f32 %v9234_v40, %v9236_v42  ;;  %v9782_v48 = vld [vmem:[%s11794_s3 + $0x600] sm:$0xff]  ;;  %v9803_v33 = vld [vmem:[%s11794_s3 + $0x628] sm:$0xff] }
 0x1c6   : > { %v1643_v50 = vpop.f32.mrb[82].mxu0  ;;  %v2032_v4 = vmax.f32 %v1641_v25, %v1834_v37  ;;  %v1836_v51 = vpop.f32.mrb[82].mxu1  ;;  %v7559_v27 = vcombine.high %v9740_v29, %v9745_v39  ;;  %v12031_v22 = vmax.f32 %v9238_v43, %v9242_v47  ;;  %v12032_v40 = vmax.f32 %v9244_v12, %v9248_v52  ;;  %v9787_v43 = vld [vmem:[%s11794_s3 + $0x620] sm:$0xff] }
 0x1c7   : > { %v2234_v5 = vmax.f32 %v2170_v10, 0.0  ;;  %v1645_v57 = vpop.f32.mrb[83].mxu0  ;;  %v9761_v8 = vpack.c.bf16 %v2233_v59, %v2231_v62  ;;  %v2095_v6 = vmax.f32 %v12030_v14, %v2031_v44  ;;  %v2033_v20 = vmax.f32 %v1643_v50, %v1836_v51  ;;  %v1838_v9 = vpop.f32.mrb[83].mxu1 }
 0x1c8   : > { %v2096_v24 = vmax.f32 %v12031_v22, %v2032_v4  ;;  %v2034_v32 = vmax.f32 %v1645_v57, %v1838_v9  ;;  %4395 = vmatpush1.bf16.msra.mxu0 %v7542_v38  ;;  %4741 = vmatpush1.bf16.msra.mxu1 %v7544_v17  ;;  %v7561_v28 = vcombine.high %v9754_v26, %v9759_v7  ;;  %v9834_v57 = vld [vmem:[%s11794_s3 + $0x648] sm:$0xff] }
 0x1c9   : > { %v9768_v31 = vpack.c.bf16 %v2234_v5, %v2232_v16  ;;  %v2171_v34 = vadd.f32 %v9566_v35, %v2095_v6  ;;  %v2097_v42 = vmax.f32 %v12032_v40, %v2033_v20  ;;  %4396 = vmatprep.subr.bf16.mxu0 %v7551_v46  ;;  %4742 = vmatprep.subr.bf16.mxu1 %v7553_v30  ;;  %v9820_v46 = vld [vmem:[%s11794_s3 + $0x640] sm:$0xff] }
 0x1ca   : > { %v2172_v47 = vadd.f32 %v9508_v2, %v2096_v24  ;;  %v12033_v12 = vmax.f32 %v9250_v54, %v9254_v55  ;;  %v7558_v55 = vcombine.low %v9740_v29, %v9745_v39  ;;  %v7560_v36 = vcombine.low %v9754_v26, %v9759_v7  ;;  %v9825_v29 = vld [vmem:[%s11794_s3 + $0x660] sm:$0xff] }
 0x1cb   : > { %4273 = vmatprep.mubr.bf16.mxu0 %v9768_v31  ;;  %4619 = vmatprep.mubr.bf16.mxu1 %v9768_v31  ;;  %v2173_v19 = vadd.f32 %v9566_v35, %v2097_v42  ;;  %v7566_v3 = vcombine.low %v9782_v48, %v9787_v43  ;;  %v7567_v25 = vcombine.high %v9782_v48, %v9787_v43  ;;  %v2235_v39 = vmax.f32 %v2171_v34, 0.0  ;;  %v9862_v42 = vld [vmem:[%s11794_s3 + $0x680] sm:$0xff]  ;;  %v9883_v48 = vld [vmem:[%s11794_s3 + $0x6a8] sm:$0xff] }
 0x1cc   : > { %v2098_v52 = vmax.f32 %v12033_v12, %v2034_v32  ;;  %4274 = vmatmul.mubr.bf16.gmra.mrb[140].mxu0 %v9761_v8  ;;  %4620 = vmatmul.mubr.bf16.gmra.mrb[140].mxu1 %v9761_v8  ;;  %v1649_v54 = vpop.f32.mrb[84].mxu0  ;;  %v1842_v17 = vpop.f32.mrb[84].mxu1  ;;  %v7569_v37 = vcombine.high %v9798_v13, %v9803_v33  ;;  %v2236_v50 = vmax.f32 %v2172_v47, 0.0  ;;  %v7568_v51 = vcombine.low %v9798_v13, %v9803_v33 }
 0x1cd   : > { %v1651_v10 = vpop.f32.mrb[85].mxu0  ;;  %4397 = vmatpush1.bf16.msra.mxu0 %v7550_v1  ;;  %4743 = vmatpush1.bf16.msra.mxu1 %v7552_v45  ;;  %v2237_v62 = vmax.f32 %v2173_v19, 0.0  ;;  %v2035_v1 = vmax.f32 %v1649_v54, %v1842_v17  ;;  %v1844_v59 = vpop.f32.mrb[85].mxu1  ;;  %v9839_v45 = vld [vmem:[%s11794_s3 + $0x668] sm:$0xff]  ;;  %v12034_v7 = vmax.f32 %v9260_v58, %v9262_v41  ;;  %v7575_v9 = vcombine.high %v9820_v46, %v9825_v29  ;;  %v9900_v54 = vld [vmem:[%s11794_s3 + $0x6c0] sm:$0xff] }
 0x1ce   : > { %v2174_v38 = vadd.f32 %v9508_v2, %v2098_v52  ;;  %v1653_v44 = vpop.f32.mrb[86].mxu0  ;;  %4398 = vmatprep.subr.bf16.mxu0 %v7559_v27  ;;  %4744 = vmatprep.subr.bf16.mxu1 %v7561_v28  ;;  %v2036_v16 = vmax.f32 %v1651_v10, %v1844_v59  ;;  %v1846_v5 = vpop.f32.mrb[86].mxu1  ;;  %v12035_v22 = vmax.f32 %v9264_v60, %v9268_v63  ;;  %v9867_v60 = vld [vmem:[%s11794_s3 + $0x6a0] sm:$0xff]  ;;  %v9878_v28 = vld [vmem:[%s11794_s3 + $0x688] sm:$0xff] }
 0x1cf   : > { %v1655_v4 = vpop.f32.mrb[87].mxu0  ;;  %v9841_v26 = vpack.c.bf16 %v2237_v62, %v2235_v39  ;;  %v2099_v14 = vmax.f32 %v12034_v7, %v2035_v1  ;;  %v2037_v6 = vmax.f32 %v1653_v44, %v1846_v5  ;;  %v1848_v20 = vpop.f32.mrb[87].mxu1  ;;  %v12036_v58 = vmax.f32 %v9270_v0, %v9274_v23  ;;  %v9914_v44 = vld [vmem:[%s11794_s3 + $0x6c8] sm:$0xff] }
 0x1d0   : > { %v2238_v30 = vmax.f32 %v2174_v38, 0.0  ;;  %v2100_v24 = vmax.f32 %v12035_v22, %v2036_v16  ;;  %v2038_v32 = vmax.f32 %v1655_v4, %v1848_v20  ;;  %v7577_v40 = vcombine.high %v9834_v57, %v9839_v45  ;;  %v12040_v7 = vld [vmem:[#allocation3_spill] sm:$0xff] }
 0x1d1   : > { %4399 = vmatpush1.bf16.msra.mxu0 %v7558_v55  ;;  %4745 = vmatpush1.bf16.msra.mxu1 %v7560_v36  ;;  %v2175_v34 = vadd.f32 %v9566_v35, %v2099_v14  ;;  %v2101_v41 = vmax.f32 %v12036_v58, %v2037_v6  ;;  %v12037_v0 = vmax.f32 %v9276_v18, %v9280_v15  ;;  %v9905_v55 = vld [vmem:[%s11794_s3 + $0x6e0] sm:$0xff]  ;;  %v12041_v14 = vld [vmem:[#allocation4_spill] sm:$0xff] }
 0x1d2   : > { %v9848_v27 = vpack.c.bf16 %v2238_v30, %v2236_v50  ;;  %4400 = vmatprep.subr.bf16.mxu0 %v7567_v25  ;;  %4746 = vmatprep.subr.bf16.mxu1 %v7569_v37  ;;  %v2176_v63 = vadd.f32 %v9508_v2, %v2100_v24  ;;  %v7574_v18 = vcombine.low %v9820_v46, %v9825_v29  ;;  %v9919_v37 = vld [vmem:[%s11794_s3 + $0x6e8] sm:$0xff]  ;;  %v12038_v30 = vld [vmem:[#allocation2_spill] sm:$0xff]  ;;  %v12043_v24 = vld [vmem:[#allocation5_spill] sm:$0xff] }
 0x1d3   : > { %v2102_v23 = vmax.f32 %v12037_v0, %v2038_v32  ;;  %v2177_v43 = vadd.f32 %v9566_v35, %v2101_v41  ;;  %v7576_v47 = vcombine.low %v9834_v57, %v9839_v45  ;;  %v7582_v33 = vcombine.low %v9862_v42, %v9867_v60  ;;  %v12044_v32 = vld [vmem:[#allocation6_spill] sm:$0xff] }
 0x1d4   : > { %4283 = vmatprep.mubr.bf16.mxu0 %v9848_v27  ;;  %4629 = vmatprep.mubr.bf16.mxu1 %v9848_v27  ;;  %v1659_v15 = vpop.f32.mrb[88].mxu0  ;;  %v1852_v52 = vpop.f32.mrb[88].mxu1  ;;  %v7583_v19 = vcombine.high %v9862_v42, %v9867_v60  ;;  %v2239_v36 = vmax.f32 %v2175_v34, 0.0  ;;  %v7585_v25 = vcombine.high %v9878_v28, %v9883_v48  ;;  %v2240_v46 = vmax.f32 %v2176_v63, 0.0  ;;  %v9942_v41 = vld [vmem:[%s11794_s3 + $0x700] sm:$0xff]  ;;  %v12046_v60 = vld [vmem:[#allocation7_spill] sm:$0xff] }
 0x1d5   : > { %4284 = vmatmul.mubr.bf16.gmra.mrb[144].mxu0 %v9841_v26  ;;  %4630 = vmatmul.mubr.bf16.gmra.mrb[144].mxu1 %v9841_v26  ;;  %v2178_v12 = vadd.f32 %v9508_v2, %v2102_v23  ;;  %v1661_v13 = vpop.f32.mrb[89].mxu0  ;;  %v2241_v38 = vmax.f32 %v2177_v43, 0.0  ;;  %v2039_v17 = vmax.f32 %v1659_v15, %v1852_v52  ;;  %v1854_v10 = vpop.f32.mrb[89].mxu1  ;;  %v7584_v59 = vcombine.low %v9878_v28, %v9883_v48  ;;  %v12047_v63 = vld [vmem:[#allocation8_spill] sm:$0xff]  ;;  %v9958_v28 = vld [vmem:[%s11794_s3 + $0x708] sm:$0xff] }
 0x1d6   : > { %4401 = vmatpush1.bf16.msra.mxu0 %v7566_v3  ;;  %4747 = vmatpush1.bf16.msra.mxu1 %v7568_v51  ;;  %v1663_v3 = vpop.f32.mrb[90].mxu0  ;;  %v2040_v39 = vmax.f32 %v1661_v13, %v1854_v10  ;;  %v1856_v62 = vpop.f32.mrb[90].mxu1  ;;  %v12039_v16 = vmax.f32 %v9284_v61, %v12038_v30  ;;  %v7591_v57 = vcombine.high %v9900_v54, %v9905_v55  ;;  %v9963_v48 = vld [vmem:[%s11794_s3 + $0x728] sm:$0xff] }
 0x1d7   : > { %4402 = vmatprep.subr.bf16.mxu0 %v7575_v9  ;;  %4748 = vmatprep.subr.bf16.mxu1 %v7577_v40  ;;  %v2242_v29 = vmax.f32 %v2178_v12, 0.0  ;;  %v1665_v1 = vpop.f32.mrb[91].mxu0  ;;  %v9921_v50 = vpack.c.bf16 %v2241_v38, %v2239_v36  ;;  %v2041_v4 = vmax.f32 %v1663_v3, %v1856_v62  ;;  %v1858_v51 = vpop.f32.mrb[91].mxu1  ;;  %v12042_v6 = vmax.f32 %v12040_v7, %v12041_v14  ;;  %v9947_v40 = vld [vmem:[%s11794_s3 + $0x720] sm:$0xff] }
 0x1d8   : > { %v2103_v5 = vmax.f32 %v12039_v16, %v2039_v17  ;;  %v2042_v9 = vmax.f32 %v1665_v1, %v1858_v51  ;;  %v12045_v61 = vmax.f32 %v12043_v24, %v12044_v32  ;;  %v7593_v58 = vcombine.high %v9914_v44, %v9919_v37  ;;  %v9980_v38 = vld [vmem:[%s11794_s3 + $0x740] sm:$0xff]  ;;  %v12049_v16 = vld [vmem:[#allocation9_spill] sm:$0xff] }
 0x1d9   : > { %v9928_v45 = vpack.c.bf16 %v2242_v29, %v2240_v46  ;;  %v2104_v20 = vmax.f32 %v12042_v6, %v2040_v39  ;;  %v12048_v0 = vmax.f32 %v12046_v60, %v12047_v63  ;;  %v7599_v36 = vcombine.high %v9942_v41, %v9947_v40  ;;  %v10022_v60 = vld [vmem:[%s11794_s3 + $0x780] sm:$0xff] }
 0x1da   : > { %4403 = vmatpush1.bf16.msra.mxu0 %v7574_v18  ;;  %4749 = vmatpush1.bf16.msra.mxu1 %v7576_v47  ;;  %v2179_v22 = vadd.f32 %v9566_v35, %v2103_v5  ;;  %v2105_v34 = vmax.f32 %v12045_v61, %v2041_v4  ;;  %v7590_v18 = vcombine.low %v9900_v54, %v9905_v55  ;;  %v9985_v54 = vld [vmem:[%s11794_s3 + $0x760] sm:$0xff] }
 0x1db   : > { %4404 = vmatprep.subr.bf16.mxu0 %v7583_v19  ;;  %4750 = vmatprep.subr.bf16.mxu1 %v7585_v25  ;;  %v2180_v42 = vadd.f32 %v9508_v2, %v2104_v20  ;;  %v2106_v23 = vmax.f32 %v12048_v0, %v2042_v9  ;;  %v7592_v47 = vcombine.low %v9914_v44, %v9919_v37  ;;  %v9994_v44 = vld [vmem:[%s11794_s3 + $0x748] sm:$0xff]  ;;  %v12050_v5 = vld [vmem:[#allocation10_spill] sm:$0xff]  ;;  %v12053_v9 = vld [vmem:[#allocation12_spill] sm:$0xff] }
 0x1dc   : > { %4293 = vmatprep.mubr.bf16.mxu0 %v9928_v45  ;;  %4639 = vmatprep.mubr.bf16.mxu1 %v9928_v45  ;;  %v2181_v43 = vadd.f32 %v9566_v35, %v2105_v34  ;;  %v1669_v15 = vpop.f32.mrb[92].mxu0  ;;  %v1862_v52 = vpop.f32.mrb[92].mxu1  ;;  %v7598_v19 = vcombine.low %v9942_v41, %v9947_v40  ;;  %v2243_v55 = vmax.f32 %v2179_v22, 0.0  ;;  %v7601_v25 = vcombine.high %v9958_v28, %v9963_v48  ;;  %v9999_v37 = vld [vmem:[%s11794_s3 + $0x768] sm:$0xff]  ;;  %v12055_v34 = vld [vmem:[#allocation13_spill] sm:$0xff]  ;;  %v10027_v63 = vld [vmem:[%s11794_s3 + $0x7a0] sm:$0xff] }
 0x1dd   : > { %4294 = vmatmul.mubr.bf16.gmra.mrb[148].mxu0 %v9921_v50  ;;  %4640 = vmatmul.mubr.bf16.gmra.mrb[148].mxu1 %v9921_v50  ;;  %v2182_v12 = vadd.f32 %v9508_v2, %v2106_v23  ;;  %v1671_v13 = vpop.f32.mrb[93].mxu0  ;;  %v1864_v10 = vpop.f32.mrb[93].mxu1  ;;  %v2244_v46 = vmax.f32 %v2180_v42, 0.0  ;;  %v12051_v4 = vmax.f32 %v12049_v16, %v12050_v5  ;;  %v7607_v14 = vcombine.high %v9980_v38, %v9985_v54  ;;  %v12052_v20 = vld [vmem:[#allocation11_spill] sm:$0xff] }
 0x1de   : > { %4405 = vmatpush1.bf16.msra.mxu0 %v7582_v33  ;;  %4751 = vmatpush1.bf16.msra.mxu1 %v7584_v59  ;;  %v2245_v17 = vmax.f32 %v2181_v43, 0.0  ;;  %v2043_v33 = vmax.f32 %v1669_v15, %v1862_v52  ;;  %v1673_v3 = vpop.f32.mrb[94].mxu0  ;;  %v2044_v39 = vmax.f32 %v1671_v13, %v1864_v10  ;;  %v1866_v62 = vpop.f32.mrb[94].mxu1  ;;  %v7600_v59 = vcombine.low %v9958_v28, %v9963_v48  ;;  %v12058_v23 = vld [vmem:[#allocation15_spill] sm:$0xff]  ;;  %v12059_v28 = vld [vmem:[#allocation16_spill] sm:$0xff] }
 0x1df   : > { %4406 = vmatprep.subr.bf16.mxu0 %v7591_v57  ;;  %4752 = vmatprep.subr.bf16.mxu1 %v7593_v58  ;;  %v2246_v29 = vmax.f32 %v2182_v12, 0.0  ;;  %v1675_v1 = vpop.f32.mrb[95].mxu0  ;;  %v2045_v57 = vmax.f32 %v1673_v3, %v1866_v62  ;;  %v1868_v7 = vpop.f32.mrb[95].mxu1  ;;  %v12054_v22 = vmax.f32 %v12052_v20, %v12053_v9  ;;  %v12056_v58 = vld [vmem:[#allocation14_spill] sm:$0xff]  ;;  %v7609_v42 = vcombine.high %v9994_v44, %v9999_v37  ;;  %v10038_v15 = vld [vmem:[%s11794_s3 + $0x788] sm:$0xff] }
 0x1e0   : > { %v10001_v30 = vpack.c.bf16 %v2245_v17, %v2243_v55  ;;  %v2107_v51 = vmax.f32 %v12051_v4, %v2043_v33  ;;  %v2046_v32 = vmax.f32 %v1675_v1, %v1868_v7  ;;  %v12057_v41 = vmax.f32 %v12055_v34, %v12056_v58  ;;  %v10060_v3 = vld [vmem:[%s11794_s3 + $0x7c0] sm:$0xff]  ;;  %v2924_v5 = vld [vmem:[%s11794_s3 + $0x7c8] sm:$0xff]  ;;  %v12065_v34 = vld [vmem:[#allocation20_spill] sm:$0xff] }
 0x1e1   : > { %v10008_v6 = vpack.c.bf16 %v2246_v29, %v2244_v46  ;;  %v2108_v24 = vmax.f32 %v12054_v22, %v2044_v39  ;;  %v12060_v48 = vmax.f32 %v12058_v23, %v12059_v28  ;;  %v7606_v52 = vcombine.low %v9980_v38, %v9985_v54  ;;  %v10065_v38 = vld [vmem:[%s11794_s3 + $0x7e0] sm:$0xff]  ;;  %v2928_v4 = vld [vmem:[%s11794_s3 + $0x7e8] sm:$0xff] }
 0x1e2   : > { %4407 = vmatpush1.bf16.msra.mxu0 %v7590_v18  ;;  %4753 = vmatpush1.bf16.msra.mxu1 %v7592_v47  ;;  %v2183_v61 = vadd.f32 %v9566_v35, %v2107_v51  ;;  %v2109_v40 = vmax.f32 %v12057_v41, %v2045_v57  ;;  %v10043_v18 = vld [vmem:[%s11794_s3 + $0x7a8] sm:$0xff]  ;;  %v7608_v13 = vcombine.low %v9994_v44, %v9999_v37  ;;  %v12061_v57 = vld [vmem:[#allocation17_spill] sm:$0xff]  ;;  %v12062_v7 = vld [vmem:[#allocation18_spill] sm:$0xff] }
 0x1e3   : > { %4408 = vmatprep.subr.bf16.mxu0 %v7599_v36  ;;  %4754 = vmatprep.subr.bf16.mxu1 %v7601_v25  ;;  %v2184_v0 = vadd.f32 %v9508_v2, %v2108_v24  ;;  %v2110_v43 = vmax.f32 %v12060_v48, %v2046_v32  ;;  %v7614_v33 = vcombine.low %v10022_v60, %v10027_v63  ;;  %v10096_v48 = vld [vmem:[%s11794_s3 + $0x10] sm:$0xff] }
 0x1e4   : > { %4303 = vmatprep.mubr.bf16.mxu0 %v10008_v6  ;;  %4649 = vmatprep.mubr.bf16.mxu1 %v10008_v6  ;;  %v2185_v47 = vadd.f32 %v9566_v35, %v2109_v40  ;;  %v1679_v12 = vpop.f32.mrb[96].mxu0  ;;  %v1872_v55 = vpop.f32.mrb[96].mxu1  ;;  %v7615_v10 = vcombine.high %v10022_v60, %v10027_v63  ;;  %v2247_v54 = vmax.f32 %v2183_v61, 0.0  ;;  %v7617_v39 = vcombine.high %v10038_v15, %v10043_v18  ;;  %v12064_v61 = vld [vmem:[#allocation19_spill] sm:$0xff]  ;;  %v12067_v60 = vld [vmem:[#allocation21_spill] sm:$0xff]  ;;  %v12068_v63 = vld [vmem:[#allocation22_spill] sm:$0xff] }
 0x1e5   : > { %4304 = vmatmul.mubr.bf16.gmra.mrb[152].mxu0 %v10001_v30  ;;  %4650 = vmatmul.mubr.bf16.gmra.mrb[152].mxu1 %v10001_v30  ;;  %v2186_v36 = vadd.f32 %v9508_v2, %v2110_v43  ;;  %v1681_v17 = vpop.f32.mrb[97].mxu0  ;;  %v1874_v46 = vpop.f32.mrb[97].mxu1  ;;  %v2248_v62 = vmax.f32 %v2184_v0, 0.0  ;;  %v7616_v16 = vcombine.low %v10038_v15, %v10043_v18  ;;  %v7623_v24 = vcombine.high %v10060_v3, %v10065_v38  ;;  %v10101_v43 = vld [vmem:[%s11794_s3 + $0x30] sm:$0xff]  ;;  %v12070_v18 = vld [vmem:[#allocation23_spill] sm:$0xff] }
 0x1e6   : > { %4409 = vmatpush1.bf16.msra.mxu0 %v7598_v19  ;;  %4755 = vmatpush1.bf16.msra.mxu1 %v7600_v59  ;;  %v2249_v25 = vmax.f32 %v2185_v47, 0.0  ;;  %v2047_v19 = vmax.f32 %v1679_v12, %v1872_v55  ;;  %v1683_v29 = vpop.f32.mrb[98].mxu0  ;;  %v2048_v59 = vmax.f32 %v1681_v17, %v1874_v46  ;;  %v1876_v44 = vpop.f32.mrb[98].mxu1  ;;  %v12066_v58 = vmax.f32 %v12064_v61, %v12065_v34  ;;  %v12071_v47 = vld [vmem:[#allocation24_spill] sm:$0xff] }
 0x1e7   : > { %4410 = vmatprep.subr.bf16.mxu0 %v7607_v14  ;;  %4756 = vmatprep.subr.bf16.mxu1 %v7609_v42  ;;  %v2250_v1 = vmax.f32 %v2186_v36, 0.0  ;;  %v1685_v37 = vpop.f32.mrb[99].mxu0  ;;  %v12063_v14 = vmax.f32 %v12061_v57, %v12062_v7  ;;  %v2049_v9 = vmax.f32 %v1683_v29, %v1876_v44  ;;  %v1878_v22 = vpop.f32.mrb[99].mxu1  ;;  %v12069_v0 = vmax.f32 %v12067_v60, %v12068_v63  ;;  %v10117_v36 = vld [vmem:[%s11794_s3 + $0x38] sm:$0xff]  ;;  %v12077_v34 = vld [vmem:[#allocation28_spill] sm:$0xff]  ;;  %v12080_v63 = vld [vmem:[#allocation30_spill] sm:$0xff] }
 0x1e8   : > { %v10077_v51 = vpack.c.bf16 %v2249_v25, %v2247_v54  ;;  %v2112_v41 = vmax.f32 %v12066_v58, %v2048_v59  ;;  %v2050_v40 = vmax.f32 %v1685_v37, %v1878_v22  ;;  %v7625_v28 = vcombine.high %v2924_v5, %v2928_v4  ;;  %v12079_v60 = vld [vmem:[#allocation29_spill] sm:$0xff] }
 0x1e9   : > { %v2111_v20 = vmax.f32 %v12063_v14, %v2047_v19  ;;  %v10084_v32 = vpack.c.bf16 %v2250_v1, %v2248_v62  ;;  %v2113_v23 = vmax.f32 %v12069_v0, %v2049_v9  ;;  %v12072_v12 = vmax.f32 %v12070_v18, %v12071_v47  ;;  %v12083_v18 = vld [vmem:[#allocation32_spill] sm:$0xff] }
 0x1ea   : > { %4411 = vmatpush1.bf16.msra.mxu0 %v7606_v52  ;;  %4757 = vmatpush1.bf16.msra.mxu1 %v7608_v13  ;;  %v2188_v15 = vadd.f32 %v9508_v2, %v2112_v41  ;;  %v10112_v13 = vld [vmem:[%s11794_s3 + $0x18] sm:$0xff]  ;;  %v7624_v46 = vcombine.low %v2924_v5, %v2928_v4  ;;  %v7379_v29 = vcombine.high %v10096_v48, %v10101_v43  ;;  %v12074_v4 = vld [vmem:[#allocation26_spill] sm:$0xff] }
 0x1eb   : > { %v2187_v42 = vadd.f32 %v9566_v35, %v2111_v20  ;;  %4412 = vmatprep.subr.bf16.mxu0 %v7615_v10  ;;  %4758 = vmatprep.subr.bf16.mxu1 %v7617_v39  ;;  %v2114_v52 = vmax.f32 %v12072_v12, %v2050_v40  ;;  %v2189_v55 = vadd.f32 %v9566_v35, %v2113_v23  ;;  %v12073_v5 = vld [vmem:[#allocation25_spill] sm:$0xff] }
 0x1ec   : > { %4313 = vmatprep.mubr.bf16.mxu0 %v10084_v32  ;;  %4659 = vmatprep.mubr.bf16.mxu1 %v10084_v32  ;;  %v1689_v17 = vpop.f32.mrb[100].mxu0  ;;  %v7622_v10 = vcombine.low %v10060_v3, %v10065_v38  ;;  %v1882_v25 = vpop.f32.mrb[100].mxu1  ;;  %v7381_v3 = vcombine.high %v10112_v13, %v10117_v36  ;;  %v2252_v38 = vmax.f32 %v2188_v15, 0.0  ;;  %v12075_v14 = vmax.f32 %v12073_v5, %v12074_v4  ;;  %v12082_v15 = vld [vmem:[#allocation31_spill] sm:$0xff] }
 0x1ed   : > { %4314 = vmatmul.mubr.bf16.gmra.mrb[156].mxu0 %v10077_v51  ;;  %4660 = vmatmul.mubr.bf16.gmra.mrb[156].mxu1 %v10077_v51  ;;  %v2190_v54 = vadd.f32 %v9508_v2, %v2114_v52  ;;  %v1691_v19 = vpop.f32.mrb[101].mxu0  ;;  %v2251_v39 = vmax.f32 %v2187_v42, 0.0  ;;  %v2253_v62 = vmax.f32 %v2189_v55, 0.0  ;;  %v2051_v1 = vmax.f32 %v1689_v17, %v1882_v25  ;;  %v1884_v59 = vpop.f32.mrb[101].mxu1 }
 0x1ee   : > { %4413 = vmatpush1.bf16.msra.mxu0 %v7614_v33  ;;  %4759 = vmatpush1.bf16.msra.mxu1 %v7616_v16  ;;  %v1693_v44 = vpop.f32.mrb[102].mxu0  ;;  %v2052_v57 = vmax.f32 %v1691_v19, %v1884_v59  ;;  %v1886_v7 = vpop.f32.mrb[102].mxu1  ;;  %v12081_v0 = vmax.f32 %v12079_v60, %v12080_v63  ;;  %v12084_v47 = vmax.f32 %v12082_v15, %v12083_v18 }
 0x1ef   : > { %4414 = vmatprep.subr.bf16.mxu0 %v7623_v24  ;;  %4760 = vmatprep.subr.bf16.mxu1 %v7625_v28  ;;  %v2254_v37 = vmax.f32 %v2190_v54, 0.0  ;;  %v1695_v33 = vpop.f32.mrb[103].mxu0  ;;  %v10129_v16 = vpack.c.bf16 %v2253_v62, %v2251_v39  ;;  %v2115_v20 = vmax.f32 %v12075_v14, %v2051_v1  ;;  %v2053_v9 = vmax.f32 %v1693_v44, %v1886_v7  ;;  %v1888_v22 = vpop.f32.mrb[103].mxu1  ;;  %v12076_v24 = vld [vmem:[#allocation27_spill] sm:$0xff] }
 0x1f0   : > { %v12078_v58 = vmax.f32 %v12076_v24, %v12077_v34  ;;  %v2054_v40 = vmax.f32 %v1695_v33, %v1888_v22 }
 0x1f1   : > { %v10134_v61 = vpack.c.bf16 %v2254_v37, %v2252_v38  ;;  %v2191_v42 = vadd.f32 %v9566_v35, %v2115_v20  ;;  %v2117_v23 = vmax.f32 %v12081_v0, %v2053_v9  ;;  %v12085_v37 = vld [vmem:[#allocation33_spill] sm:$0xff]  ;;  %v12088_v20 = vld [vmem:[#allocation35_spill] sm:$0xff]  ;;  %v12089_v9 = vld [vmem:[#allocation36_spill] sm:$0xff] }
 0x1f2   : > { %v2116_v41 = vmax.f32 %v12078_v58, %v2052_v57  ;;  %4415 = vmatpush1.bf16.msra.mxu0 %v7622_v10  ;;  %4761 = vmatpush1.bf16.msra.mxu1 %v7624_v46  ;;  %v2118_v12 = vmax.f32 %v12084_v47, %v2054_v40  ;;  %v12086_v57 = vld [vmem:[#allocation34_spill] sm:$0xff]  ;;  %v12090_v22 = vmax.f32 %v12088_v20, %v12089_v9  ;;  %v12094_v0 = vld [vmem:[#allocation39_spill] sm:$0xff]  ;;  %v12101_v20 = vld [vmem:[#allocation44_spill] sm:$0xff] }
 0x1f3   : > { %4903 = vmatprep.subr.bf16.mxu0 %v7379_v29  ;;  %5249 = vmatprep.subr.bf16.mxu1 %v7381_v3  ;;  %v2193_v52 = vadd.f32 %v9566_v35, %v2117_v23  ;;  %v2255_v25 = vmax.f32 %v2191_v42, 0.0  ;;  %v12087_v7 = vmax.f32 %v12085_v37, %v12086_v57  ;;  %v12092_v40 = vld [vmem:[#allocation38_spill] sm:$0xff]  ;;  %v12095_v23 = vld [vmem:[#allocation40_spill] sm:$0xff] }
 0x1f4   : > { %v2192_v28 = vadd.f32 %v9508_v2, %v2116_v41  ;;  %4323 = vmatprep.mubr.bf16.mxu0 %v10134_v61  ;;  %4669 = vmatprep.mubr.bf16.mxu1 %v10134_v61  ;;  %v1699_v55 = vpop.f32.mrb[104].mxu0  ;;  %v2194_v17 = vadd.f32 %v9508_v2, %v2118_v12  ;;  %v1892_v10 = vpop.f32.mrb[104].mxu1  ;;  %v12091_v41 = vld [vmem:[#allocation37_spill] sm:$0xff] }
 0x1f5   : > { %4324 = vmatmul.mubr.bf16.gmra.mrb[160].mxu0 %v10129_v16  ;;  %4670 = vmatmul.mubr.bf16.gmra.mrb[160].mxu1 %v10129_v16  ;;  %v1701_v54 = vpop.f32.mrb[105].mxu0  ;;  %v2257_v19 = vmax.f32 %v2193_v52, 0.0  ;;  %v2055_v46 = vmax.f32 %v1699_v55, %v1892_v10  ;;  %v1894_v29 = vpop.f32.mrb[105].mxu1  ;;  %v12093_v42 = vmax.f32 %v12091_v41, %v12092_v40  ;;  %v12104_v41 = vld [vmem:[#allocation46_spill] sm:$0xff] }
 0x1f6   : > { %v1703_v39 = vpop.f32.mrb[106].mxu0  ;;  %v2256_v62 = vmax.f32 %v2192_v28, 0.0  ;;  %v2258_v1 = vmax.f32 %v2194_v17, 0.0  ;;  %v2056_v59 = vmax.f32 %v1701_v54, %v1894_v29  ;;  %v1896_v44 = vpop.f32.mrb[106].mxu1  ;;  %v12096_v28 = vmax.f32 %v12094_v0, %v12095_v23  ;;  %v12107_v0 = vld [vmem:[#allocation48_spill] sm:$0xff] }
 0x1f7   : > { %v1705_v3 = vpop.f32.mrb[107].mxu0  ;;  %v10153_v38 = vpack.c.bf16 %v2257_v19, %v2255_v25  ;;  %v2119_v33 = vmax.f32 %v12087_v7, %v2055_v46  ;;  %v2057_v5 = vmax.f32 %v1703_v39, %v1896_v44  ;;  %v1898_v4 = vpop.f32.mrb[107].mxu1  ;;  %v12097_v44 = vld [vmem:[#allocation41_spill] sm:$0xff] }
 0x1f8   : > { %v10158_v14 = vpack.c.bf16 %v2258_v1, %v2256_v62  ;;  %v2120_v24 = vmax.f32 %v12090_v22, %v2056_v59  ;;  %v2058_v34 = vmax.f32 %v1705_v3, %v1898_v4  ;;  %v12098_v3 = vld [vmem:[#allocation42_spill] sm:$0xff]  ;;  %v12100_v4 = vld [vmem:[#allocation43_spill] sm:$0xff] }
 0x1f9   : > { %v2195_v58 = vadd.f32 %v9566_v35, %v2119_v33  ;;  %v2121_v60 = vmax.f32 %v12093_v42, %v2057_v5  ;;  %v12099_v37 = vmax.f32 %v12097_v44, %v12098_v3  ;;  %v12102_v9 = vmax.f32 %v12100_v4, %v12101_v20  ;;  %v12109_v44 = vld [vmem:[#allocation49_spill] sm:$0xff]  ;;  %v12110_v3 = vld [vmem:[#allocation50_spill] sm:$0xff]  ;;  %v12112_v20 = vld [vmem:[#allocation51_spill] sm:$0xff] }
 0x1fa   : > { %v2196_v63 = vadd.f32 %v9508_v2, %v2120_v24  ;;  %v2122_v15 = vmax.f32 %v12096_v28, %v2058_v34  ;;  %4333 = vmatprep.mubr.bf16.mxu0 %v10158_v14  ;;  %4679 = vmatprep.mubr.bf16.mxu1 %v10158_v14 }
 0x1fb   : > { %v2197_v18 = vadd.f32 %v9566_v35, %v2121_v60  ;;  %v2259_v17 = vmax.f32 %v2195_v58, 0.0  ;;  %v12103_v58 = vld [vmem:[#allocation45_spill] sm:$0xff] }
 0x1fc   : > { %v1709_v47 = vpop.f32.mrb[108].mxu0  ;;  %v2198_v12 = vadd.f32 %v9508_v2, %v2122_v15  ;;  %v1902_v52 = vpop.f32.mrb[108].mxu1  ;;  %v2260_v46 = vmax.f32 %v2196_v63, 0.0  ;;  %v12105_v40 = vmax.f32 %v12103_v58, %v12104_v41  ;;  %v12106_v63 = vld [vmem:[#allocation47_spill] sm:$0xff]  ;;  %v12115_v41 = vld [vmem:[#allocation53_spill] sm:$0xff] }
 0x1fd   : > { %4334 = vmatmul.mubr.bf16.gmra.mrb[164].mxu0 %v10153_v38  ;;  %4680 = vmatmul.mubr.bf16.gmra.mrb[164].mxu1 %v10153_v38  ;;  %v1711_v55 = vpop.f32.mrb[109].mxu0  ;;  %v2261_v10 = vmax.f32 %v2197_v18, 0.0  ;;  %v2059_v54 = vmax.f32 %v1709_v47, %v1902_v52  ;;  %v1904_v25 = vpop.f32.mrb[109].mxu1  ;;  %v12108_v23 = vmax.f32 %v12106_v63, %v12107_v0  ;;  %v12118_v0 = vld [vmem:[#allocation55_spill] sm:$0xff] }
 0x1fe   : > { %v1713_v19 = vpop.f32.mrb[110].mxu0  ;;  %v2262_v29 = vmax.f32 %v2198_v12, 0.0  ;;  %v2060_v39 = vmax.f32 %v1711_v55, %v1904_v25  ;;  %v1906_v62 = vpop.f32.mrb[110].mxu1 }
 0x1ff   : > { %v1715_v1 = vpop.f32.mrb[111].mxu0  ;;  %v10177_v59 = vpack.c.bf16 %v2261_v10, %v2259_v17  ;;  %v2123_v57 = vmax.f32 %v12099_v37, %v2059_v54  ;;  %v2061_v7 = vmax.f32 %v1713_v19, %v1906_v62  ;;  %v1908_v33 = vpop.f32.mrb[111].mxu1  ;;  %v12111_v37 = vmax.f32 %v12109_v44, %v12110_v3 }
 0x200   : > { %v10182_v5 = vpack.c.bf16 %v2262_v29, %v2260_v46  ;;  %v2124_v22 = vmax.f32 %v12102_v9, %v2060_v39  ;;  %v2062_v24 = vmax.f32 %v1715_v1, %v1908_v33  ;;  %v12113_v9 = vld [vmem:[#allocation52_spill] sm:$0xff] }
 0x201   : > { %v2199_v34 = vadd.f32 %v9566_v35, %v2123_v57  ;;  %v2125_v42 = vmax.f32 %v12105_v40, %v2061_v7  ;;  %v12116_v40 = vld [vmem:[#allocation54_spill] sm:$0xff] }
 0x202   : > { %v2200_v60 = vadd.f32 %v9508_v2, %v2124_v22  ;;  %v2126_v28 = vmax.f32 %v12108_v23, %v2062_v24  ;;  %4343 = vmatprep.mubr.bf16.mxu0 %v10182_v5  ;;  %4689 = vmatprep.mubr.bf16.mxu1 %v10182_v5  ;;  %v12114_v22 = vmax.f32 %v12112_v20, %v12113_v9  ;;  %v12119_v23 = vld [vmem:[#allocation56_spill] sm:$0xff] }
 0x203   : > { %v2201_v15 = vadd.f32 %v9566_v35, %v2125_v42  ;;  %v2263_v55 = vmax.f32 %v2199_v34, 0.0  ;;  %v12117_v42 = vmax.f32 %v12115_v41, %v12116_v40 }
 0x204   : > { %v1719_v18 = vpop.f32.mrb[112].mxu0  ;;  %v2202_v47 = vadd.f32 %v9508_v2, %v2126_v28  ;;  %v1912_v12 = vpop.f32.mrb[112].mxu1  ;;  %v2264_v19 = vmax.f32 %v2200_v60, 0.0  ;;  %v12120_v28 = vmax.f32 %v12118_v0, %v12119_v23 }
 0x205   : > { %4344 = vmatmul.mubr.bf16.gmra.mrb[168].mxu0 %v10177_v59  ;;  %4690 = vmatmul.mubr.bf16.gmra.mrb[168].mxu1 %v10177_v59  ;;  %v1721_v52 = vpop.f32.mrb[113].mxu0  ;;  %v2265_v17 = vmax.f32 %v2201_v15, 0.0  ;;  %v2063_v10 = vmax.f32 %v1719_v18, %v1912_v12  ;;  %v1914_v54 = vpop.f32.mrb[113].mxu1 }
 0x206   : > { %v1723_v25 = vpop.f32.mrb[114].mxu0  ;;  %v2266_v46 = vmax.f32 %v2202_v47, 0.0  ;;  %v2064_v29 = vmax.f32 %v1721_v52, %v1914_v54  ;;  %v1916_v39 = vpop.f32.mrb[114].mxu1 }
 0x207   : > { %v1725_v62 = vpop.f32.mrb[115].mxu0  ;;  %v10201_v1 = vpack.c.bf16 %v2265_v17, %v2263_v55  ;;  %v2127_v57 = vmax.f32 %v12111_v37, %v2063_v10  ;;  %v2065_v7 = vmax.f32 %v1723_v25, %v1916_v39  ;;  %v1918_v33 = vpop.f32.mrb[115].mxu1  ;;  %v12121_v37 = vld [vmem:[#allocation57_spill] sm:$0xff] }
 0x208   : > { %v10206_v4 = vpack.c.bf16 %v2266_v46, %v2264_v19  ;;  %v2128_v24 = vmax.f32 %v12114_v22, %v2064_v29  ;;  %v2066_v34 = vmax.f32 %v1725_v62, %v1918_v33 }
 0x209   : > { %v2203_v58 = vadd.f32 %v9566_v35, %v2127_v57  ;;  %v2129_v60 = vmax.f32 %v12117_v42, %v2065_v7  ;;  %v12122_v57 = vld [vmem:[#allocation58_spill] sm:$0xff] }
 0x20a   : > { %v2204_v63 = vadd.f32 %v9508_v2, %v2128_v24  ;;  %v2130_v15 = vmax.f32 %v12120_v28, %v2066_v34  ;;  %4353 = vmatprep.mubr.bf16.mxu0 %v10206_v4  ;;  %4699 = vmatprep.mubr.bf16.mxu1 %v10206_v4  ;;  %v12123_v7 = vmax.f32 %v12121_v37, %v12122_v57  ;;  %v12124_v24 = vld [vmem:[#allocation59_spill] sm:$0xff]  ;;  %v12125_v34 = vld [vmem:[#allocation60_spill] sm:$0xff] }
 0x20b   : > { %v2205_v18 = vadd.f32 %v9566_v35, %v2129_v60  ;;  %v2267_v17 = vmax.f32 %v2203_v58, 0.0  ;;  %v12126_v58 = vmax.f32 %v12124_v24, %v12125_v34  ;;  %v12127_v60 = vld [vmem:[#allocation61_spill] sm:$0xff] }
 0x20c   : > { %v1729_v47 = vpop.f32.mrb[116].mxu0  ;;  %v2206_v12 = vadd.f32 %v9508_v2, %v2130_v15  ;;  %v1922_v52 = vpop.f32.mrb[116].mxu1  ;;  %v2268_v46 = vmax.f32 %v2204_v63, 0.0  ;;  %v12128_v63 = vld [vmem:[#allocation62_spill] sm:$0xff]  ;;  %v12130_v15 = vld [vmem:[#allocation63_spill] sm:$0xff] }
 0x20d   : > { %4354 = vmatmul.mubr.bf16.gmra.mrb[172].mxu0 %v10201_v1  ;;  %4700 = vmatmul.mubr.bf16.gmra.mrb[172].mxu1 %v10201_v1  ;;  %v1731_v55 = vpop.f32.mrb[117].mxu0  ;;  %v2269_v10 = vmax.f32 %v2205_v18, 0.0  ;;  %v2067_v54 = vmax.f32 %v1729_v47, %v1922_v52  ;;  %v1924_v25 = vpop.f32.mrb[117].mxu1  ;;  %v12129_v0 = vmax.f32 %v12127_v60, %v12128_v63  ;;  %v12131_v18 = vld [vmem:[#allocation64_spill] sm:$0xff] }
 0x20e   : > { %v1733_v19 = vpop.f32.mrb[118].mxu0  ;;  %v2270_v29 = vmax.f32 %v2206_v12, 0.0  ;;  %v2068_v39 = vmax.f32 %v1731_v55, %v1924_v25  ;;  %v1926_v62 = vpop.f32.mrb[118].mxu1  ;;  %v12132_v47 = vmax.f32 %v12130_v15, %v12131_v18 }
 0x20f   : > { %v1735_v44 = vpop.f32.mrb[119].mxu0  ;;  %v10225_v3 = vpack.c.bf16 %v2269_v10, %v2267_v17  ;;  %v2131_v33 = vmax.f32 %v12123_v7, %v2067_v54  ;;  %v2069_v20 = vmax.f32 %v1733_v19, %v1926_v62  ;;  %v1928_v9 = vpop.f32.mrb[119].mxu1 }
 0x210   : > { %v10230_v22 = vpack.c.bf16 %v2270_v29, %v2268_v46  ;;  %v2132_v41 = vmax.f32 %v12126_v58, %v2068_v39  ;;  %v2070_v40 = vmax.f32 %v1735_v44, %v1928_v9 }
 0x211   : > { %v2207_v42 = vadd.f32 %v9566_v35, %v2131_v33  ;;  %v2133_v23 = vmax.f32 %v12129_v0, %v2069_v20  ;;  %v12133_v33 = vld [vmem:[#allocation65_spill] sm:$0xff]  ;;  %v12134_v20 = vld [vmem:[#allocation66_spill] sm:$0xff] }
 0x212   : > { %v2208_v28 = vadd.f32 %v9508_v2, %v2132_v41  ;;  %v2134_v12 = vmax.f32 %v12132_v47, %v2070_v40  ;;  %4363 = vmatprep.mubr.bf16.mxu0 %v10230_v22  ;;  %4709 = vmatprep.mubr.bf16.mxu1 %v10230_v22  ;;  %v12135_v9 = vmax.f32 %v12133_v33, %v12134_v20  ;;  %v12136_v40 = vld [vmem:[#allocation67_spill] sm:$0xff] }
 0x213   : > { %v2209_v52 = vadd.f32 %v9566_v35, %v2133_v23  ;;  %v2271_v25 = vmax.f32 %v2207_v42, 0.0  ;;  %v12137_v42 = vld [vmem:[#allocation68_spill] sm:$0xff] }
 0x214   : > { %v1739_v55 = vpop.f32.mrb[120].mxu0  ;;  %v2210_v17 = vadd.f32 %v9508_v2, %v2134_v12  ;;  %v1932_v10 = vpop.f32.mrb[120].mxu1  ;;  %v2272_v62 = vmax.f32 %v2208_v28, 0.0  ;;  %v12138_v60 = vmax.f32 %v12136_v40, %v12137_v42  ;;  %v7380_v40 = vcombine.low %v10112_v13, %v10117_v36 }
 0x215   : > { %4364 = vmatmul.mubr.bf16.gmra.mrb[176].mxu0 %v10225_v3  ;;  %4710 = vmatmul.mubr.bf16.gmra.mrb[176].mxu1 %v10225_v3  ;;  %v1741_v54 = vpop.f32.mrb[121].mxu0  ;;  %v2273_v19 = vmax.f32 %v2209_v52, 0.0  ;;  %v2071_v46 = vmax.f32 %v1739_v55, %v1932_v10  ;;  %v1934_v29 = vpop.f32.mrb[121].mxu1  ;;  %v2685_v10 = vld [vmem:[%s11794_s3 + $0x50] sm:$0xff] }
 0x216   : > { %v1743_v39 = vpop.f32.mrb[122].mxu0  ;;  %v2274_v44 = vmax.f32 %v2210_v17, 0.0  ;;  %v1936_v37 = vpop.f32.mrb[122].mxu1 }
 0x217   : > { %v1745_v57 = vpop.f32.mrb[123].mxu0  ;;  %v10249_v7 = vpack.c.bf16 %v2273_v19, %v2271_v25  ;;  %v2135_v24 = vmax.f32 %v12135_v9, %v2071_v46  ;;  %v2073_v34 = vmax.f32 %v1743_v39, %v1936_v37  ;;  %v1938_v58 = vpop.f32.mrb[123].mxu1  ;;  %v12139_v19 = vld [vmem:[#allocation69_spill] sm:$0xff]  ;;  %v12140_v46 = vld [vmem:[#allocation70_spill] sm:$0xff]  ;;  %v12142_v9 = vld [vmem:[#allocation71_spill] sm:$0xff] }
 0x218   : > { %v10254_v2 = vpack.c.bf16 %v2274_v44, %v2272_v62  ;;  %v12141_v29 = vmax.f32 %v12139_v19, %v12140_v46  ;;  %v2689_v44 = vld [vmem:[%s11794_s3 + $0x70] sm:$0xff]  ;;  %v2686_v37 = vld [vmem:[%s11794_s3 + $0x58] sm:$0xff] }
 0x219   : > { %v2211_v41 = vadd.f32 %v9566_v35, %v2135_v24  ;;  %v2137_v63 = vmax.f32 %v12138_v60, %v2073_v34  ;;  %v2690_v57 = vld [vmem:[%s11794_s3 + $0x78] sm:$0xff]  ;;  %v12143_v24 = vld [vmem:[#allocation72_spill] sm:$0xff]  ;;  %v7387_v42 = vcombine.high %v2685_v10, %v2689_v44  ;;  %v7386_v36 = vcombine.low %v2685_v10, %v2689_v44 }
 0x21a   : > { %4373 = vmatprep.mubr.bf16.mxu0 %v10254_v2  ;;  %4719 = vmatprep.mubr.bf16.mxu1 %v10254_v2  ;;  %v12144_v34 = vmax.f32 %v12142_v9, %v12143_v24  ;;  %v7389_v60 = vcombine.high %v2686_v37, %v2690_v57  ;;  %v2714_v44 = vld [vmem:[%s11794_s3 + $0x138] sm:$0xff]  ;;  %v2717_v9 = vld [vmem:[%s11794_s3 + $0x150] sm:$0xff] }
 0x21b   : > { %v2213_v0 = vadd.f32 %v9566_v35, %v2137_v63  ;;  %v2275_v18 = vmax.f32 %v2211_v41, 0.0  ;;  %v7378_v41 = vcombine.low %v10096_v48, %v10101_v43  ;;  %v2693_v63 = vld [vmem:[%s11794_s3 + $0x90] sm:$0xff]  ;;  %v2694_v48 = vld [vmem:[%s11794_s3 + $0x98] sm:$0xff] }
 0x21c   : > { %v1749_v23 = vpop.f32.mrb[124].mxu0  ;;  %v1942_v28 = vpop.f32.mrb[124].mxu1  ;;  %v2698_v43 = vld [vmem:[%s11794_s3 + $0xb8] sm:$0xff]  ;;  %v2721_v24 = vld [vmem:[%s11794_s3 + $0x170] sm:$0xff] }
 0x21d   : > { %4374 = vmatmul.mubr.bf16.gmra.mrb[180].mxu0 %v10249_v7  ;;  %4720 = vmatmul.mubr.bf16.gmra.mrb[180].mxu1 %v10249_v7  ;;  %v1751_v15 = vpop.f32.mrb[125].mxu0  ;;  %v2277_v47 = vmax.f32 %v2213_v0, 0.0  ;;  %v2075_v12 = vmax.f32 %v1749_v23, %v1942_v28  ;;  %v1944_v52 = vpop.f32.mrb[125].mxu1  ;;  %v2697_v23 = vld [vmem:[%s11794_s3 + $0xb0] sm:$0xff]  ;;  %v7388_v28 = vcombine.low %v2686_v37, %v2690_v57 }
 0x21e   : > { %4416 = vmatprep.mubr.bf16.mxu0 %v9688_v11  ;;  %4762 = vmatprep.mubr.bf16.mxu1 %v9688_v11  ;;  %v1753_v55 = vpop.f32.mrb[126].mxu0  ;;  %v1946_v17 = vpop.f32.mrb[126].mxu1  ;;  %v7395_v15 = vcombine.high %v2693_v63, %v2697_v23  ;;  %v2705_v52 = vld [vmem:[%s11794_s3 + $0xf0] sm:$0xff]  ;;  %v7394_v10 = vcombine.low %v2693_v63, %v2697_v23  ;;  %v2726_v23 = vld [vmem:[%s11794_s3 + $0x198] sm:$0xff] }
 0x21f   : > { %v1755_v54 = vpop.f32.mrb[127].mxu0  ;;  %v10270_v25 = vpack.c.bf16 %v2277_v47, %v2275_v18  ;;  %v2139_v39 = vmax.f32 %v12141_v29, %v2075_v12  ;;  %v2077_v62 = vmax.f32 %v1753_v55, %v1946_v17  ;;  %v1948_v33 = vpop.f32.mrb[127].mxu1  ;;  %v7397_v18 = vcombine.high %v2694_v48, %v2698_v43  ;;  %v2701_v47 = vld [vmem:[%s11794_s3 + $0xd0] sm:$0xff]  ;;  %v2702_v55 = vld [vmem:[%s11794_s3 + $0xd8] sm:$0xff] }
 0x220   : > { %v2706_v17 = vld [vmem:[%s11794_s3 + $0xf8] sm:$0xff]  ;;  %v7396_v54 = vcombine.low %v2694_v48, %v2698_v43  ;;  %v7403_v19 = vcombine.high %v2701_v47, %v2705_v52  ;;  %v2709_v29 = vld [vmem:[%s11794_s3 + $0x110] sm:$0xff]  ;;  %v7402_v37 = vcombine.low %v2701_v47, %v2705_v52  ;;  %v7418_v43 = vcombine.low %v2717_v9, %v2721_v24 }
 0x221   : > { %v2215_v20 = vadd.f32 %v9566_v35, %v2139_v39  ;;  %v2141_v58 = vmax.f32 %v12144_v34, %v2077_v62  ;;  %v7405_v46 = vcombine.high %v2702_v55, %v2706_v17  ;;  %v2713_v39 = vld [vmem:[%s11794_s3 + $0x130] sm:$0xff]  ;;  %v2710_v62 = vld [vmem:[%s11794_s3 + $0x118] sm:$0xff]  ;;  %v7404_v57 = vcombine.low %v2702_v55, %v2706_v17 }
 0x222   : > { %v7411_v33 = vcombine.high %v2709_v29, %v2713_v39  ;;  %v2718_v34 = vld [vmem:[%s11794_s3 + $0x158] sm:$0xff]  ;;  %v2725_v63 = vld [vmem:[%s11794_s3 + $0x190] sm:$0xff] }
 0x223   : > { %v2217_v0 = vadd.f32 %v9566_v35, %v2141_v58  ;;  %v2279_v35 = vmax.f32 %v2215_v20, 0.0  ;;  %v7413_v20 = vcombine.high %v2710_v62, %v2714_v44  ;;  %v2722_v58 = vld [vmem:[%s11794_s3 + $0x178] sm:$0xff] }
 0x224   : > { %v2730_v48 = vld [vmem:[%s11794_s3 + $0x1b8] sm:$0xff] }
 0x225   : > { %4417 = vmatmul.mubr.bf16.vlgmr.msra.gmra.mrb[128].mxu0 %v9681_v49  ;;  %4763 = vmatmul.mubr.bf16.vlgmr.msra.gmra.mrb[128].mxu1 %v9681_v49  ;;  %v2281_v13 = vmax.f32 %v2217_v0, 0.0  ;;  %v2729_v0 = vld [vmem:[%s11794_s3 + $0x1b0] sm:$0xff]  ;;  %v2738_v47 = vld [vmem:[%s11794_s3 + $0x1f8] sm:$0xff]  ;;  %v7428_v55 = vcombine.low %v2726_v23, %v2730_v48 }
 0x226   : > { %4426 = vmatprep.mubr.bf16.mxu0 %v9768_v31  ;;  %4772 = vmatprep.mubr.bf16.mxu1 %v9768_v31  ;;  %v7426_v52 = vcombine.low %v2725_v63, %v2729_v0 }
 0x227   : > { %4904 = vmatpush1.bf16.msra.mxu0 %v7378_v41  ;;  %5250 = vmatpush1.bf16.msra.mxu1 %v7380_v40  ;;  %v10312_v12 = vpack.c.bf16 %v2281_v13, %v2279_v35  ;;  %v7410_v41 = vcombine.low %v2709_v29, %v2713_v39  ;;  %v7412_v40 = vcombine.low %v2710_v62, %v2714_v44  ;;  %v2746_v29 = vld [vmem:[%s11794_s3 + $0x238] sm:$0xff] }
 0x228   : > { %4905 = vmatprep.subr.bf16.mxu0 %v7387_v42  ;;  %5251 = vmatprep.subr.bf16.mxu1 %v7389_v60  ;;  %v7419_v42 = vcombine.high %v2717_v9, %v2721_v24  ;;  %v7421_v60 = vcombine.high %v2718_v34, %v2722_v58  ;;  %v7420_v35 = vcombine.low %v2718_v34, %v2722_v58  ;;  %v2754_v9 = vld [vmem:[%s11794_s3 + $0x278] sm:$0xff] }
 0x229   : > { %v7427_v13 = vcombine.high %v2725_v63, %v2729_v0  ;;  %v2762_v63 = vld [vmem:[%s11794_s3 + $0x2b8] sm:$0xff] }
 0x22b   : > { %4906 = vmatpush1.bf16.msra.mxu0 %v7386_v36  ;;  %5252 = vmatpush1.bf16.msra.mxu1 %v7388_v28  ;;  %v7429_v36 = vcombine.high %v2726_v23, %v2730_v48  ;;  %v2733_v28 = vld [vmem:[%s11794_s3 + $0x1d0] sm:$0xff] }
 0x22c   : > { %4907 = vmatprep.subr.bf16.mxu0 %v7395_v15  ;;  %5253 = vmatprep.subr.bf16.mxu1 %v7397_v18  ;;  %v2737_v15 = vld [vmem:[%s11794_s3 + $0x1f0] sm:$0xff]  ;;  %v2734_v18 = vld [vmem:[%s11794_s3 + $0x1d8] sm:$0xff] }
 0x22d   : > { %4427 = vmatmul.mubr.bf16.gmra.mrb[132].mxu0 %v9761_v8  ;;  %4773 = vmatmul.mubr.bf16.gmra.mrb[132].mxu1 %v9761_v8  ;;  %v7435_v17 = vcombine.high %v2733_v28, %v2737_v15  ;;  %v7434_v39 = vcombine.low %v2733_v28, %v2737_v15  ;;  %v7436_v62 = vcombine.low %v2734_v18, %v2738_v47  ;;  %v2770_v28 = vld [vmem:[%s11794_s3 + $0x2f8] sm:$0xff] }
 0x22e   : > { %4436 = vmatprep.mubr.bf16.mxu0 %v9848_v27  ;;  %4782 = vmatprep.mubr.bf16.mxu1 %v9848_v27 }
 0x22f   : > { %4908 = vmatpush1.bf16.msra.mxu0 %v7394_v10  ;;  %5254 = vmatpush1.bf16.msra.mxu1 %v7396_v54  ;;  %v7437_v10 = vcombine.high %v2734_v18, %v2738_v47  ;;  %v2741_v54 = vld [vmem:[%s11794_s3 + $0x210] sm:$0xff] }
 0x230   : > { %4909 = vmatprep.subr.bf16.mxu0 %v7403_v19  ;;  %5255 = vmatprep.subr.bf16.mxu1 %v7405_v46  ;;  %v2745_v19 = vld [vmem:[%s11794_s3 + $0x230] sm:$0xff]  ;;  %v2742_v46 = vld [vmem:[%s11794_s3 + $0x218] sm:$0xff] }
 0x231   : > { %v7443_v44 = vcombine.high %v2741_v54, %v2745_v19  ;;  %v7442_v24 = vcombine.low %v2741_v54, %v2745_v19  ;;  %v7444_v34 = vcombine.low %v2742_v46, %v2746_v29  ;;  %v2778_v54 = vld [vmem:[%s11794_s3 + $0x338] sm:$0xff] }
 0x233   : > { %4910 = vmatpush1.bf16.msra.mxu0 %v7402_v37  ;;  %5256 = vmatpush1.bf16.msra.mxu1 %v7404_v57  ;;  %v7445_v37 = vcombine.high %v2742_v46, %v2746_v29  ;;  %v2749_v57 = vld [vmem:[%s11794_s3 + $0x250] sm:$0xff] }
 0x234   : > { %4911 = vmatprep.subr.bf16.mxu0 %v7411_v33  ;;  %5257 = vmatprep.subr.bf16.mxu1 %v7413_v20  ;;  %v2753_v33 = vld [vmem:[%s11794_s3 + $0x270] sm:$0xff]  ;;  %v2750_v20 = vld [vmem:[%s11794_s3 + $0x258] sm:$0xff] }
 0x235   : > { %4437 = vmatmul.mubr.bf16.gmra.mrb[136].mxu0 %v9841_v26  ;;  %4783 = vmatmul.mubr.bf16.gmra.mrb[136].mxu1 %v9841_v26  ;;  %v7451_v58 = vcombine.high %v2749_v57, %v2753_v33  ;;  %v7450_v0 = vcombine.low %v2749_v57, %v2753_v33  ;;  %v7452_v23 = vcombine.low %v2750_v20, %v2754_v9  ;;  %v2786_v57 = vld [vmem:[%s11794_s3 + $0x378] sm:$0xff] }
 0x236   : > { %4446 = vmatprep.mubr.bf16.mxu0 %v9928_v45  ;;  %4792 = vmatprep.mubr.bf16.mxu1 %v9928_v45 }
 0x237   : > { %4912 = vmatpush1.bf16.msra.mxu0 %v7410_v41  ;;  %5258 = vmatpush1.bf16.msra.mxu1 %v7412_v40  ;;  %v7453_v41 = vcombine.high %v2750_v20, %v2754_v9  ;;  %v2757_v40 = vld [vmem:[%s11794_s3 + $0x290] sm:$0xff] }
 0x238   : > { %4913 = vmatprep.subr.bf16.mxu0 %v7419_v42  ;;  %5259 = vmatprep.subr.bf16.mxu1 %v7421_v60  ;;  %v2761_v42 = vld [vmem:[%s11794_s3 + $0x2b0] sm:$0xff]  ;;  %v2758_v60 = vld [vmem:[%s11794_s3 + $0x298] sm:$0xff] }
 0x239   : > { %v7459_v48 = vcombine.high %v2757_v40, %v2761_v42  ;;  %v7458_v15 = vcombine.low %v2757_v40, %v2761_v42  ;;  %v7460_v18 = vcombine.low %v2758_v60, %v2762_v63  ;;  %v2794_v40 = vld [vmem:[%s11794_s3 + $0x3b8] sm:$0xff] }
 0x23b   : > { %4914 = vmatpush1.bf16.msra.mxu0 %v7418_v43  ;;  %5260 = vmatpush1.bf16.msra.mxu1 %v7420_v35  ;;  %v7461_v43 = vcombine.high %v2758_v60, %v2762_v63  ;;  %v2765_v35 = vld [vmem:[%s11794_s3 + $0x2d0] sm:$0xff] }
 0x23c   : > { %4915 = vmatprep.subr.bf16.mxu0 %v7427_v13  ;;  %5261 = vmatprep.subr.bf16.mxu1 %v7429_v36  ;;  %v2769_v13 = vld [vmem:[%s11794_s3 + $0x2f0] sm:$0xff]  ;;  %v2766_v36 = vld [vmem:[%s11794_s3 + $0x2d8] sm:$0xff] }
 0x23d   : > { %4447 = vmatmul.mubr.bf16.gmra.mrb[140].mxu0 %v9921_v50  ;;  %4793 = vmatmul.mubr.bf16.gmra.mrb[140].mxu1 %v9921_v50  ;;  %v7467_v47 = vcombine.high %v2765_v35, %v2769_v13  ;;  %v7466_v19 = vcombine.low %v2765_v35, %v2769_v13  ;;  %v7468_v46 = vcombine.low %v2766_v36, %v2770_v28  ;;  %v2802_v35 = vld [vmem:[%s11794_s3 + $0x3f8] sm:$0xff] }
 0x23e   : > { %4456 = vmatprep.mubr.bf16.mxu0 %v10008_v6  ;;  %4802 = vmatprep.mubr.bf16.mxu1 %v10008_v6 }
 0x23f   : > { %4916 = vmatpush1.bf16.msra.mxu0 %v7426_v52  ;;  %5262 = vmatpush1.bf16.msra.mxu1 %v7428_v55  ;;  %v7469_v52 = vcombine.high %v2766_v36, %v2770_v28  ;;  %v2773_v55 = vld [vmem:[%s11794_s3 + $0x310] sm:$0xff] }
 0x240   : > { %4917 = vmatprep.subr.bf16.mxu0 %v7435_v17  ;;  %5263 = vmatprep.subr.bf16.mxu1 %v7437_v10  ;;  %v2777_v17 = vld [vmem:[%s11794_s3 + $0x330] sm:$0xff]  ;;  %v2774_v10 = vld [vmem:[%s11794_s3 + $0x318] sm:$0xff] }
 0x241   : > { %v7475_v29 = vcombine.high %v2773_v55, %v2777_v17  ;;  %v7474_v33 = vcombine.low %v2773_v55, %v2777_v17  ;;  %v7476_v20 = vcombine.low %v2774_v10, %v2778_v54  ;;  %v2810_v55 = vld [vmem:[%s11794_s3 + $0x438] sm:$0xff] }
 0x243   : > { %4918 = vmatpush1.bf16.msra.mxu0 %v7434_v39  ;;  %5264 = vmatpush1.bf16.msra.mxu1 %v7436_v62  ;;  %v7477_v39 = vcombine.high %v2774_v10, %v2778_v54  ;;  %v2781_v62 = vld [vmem:[%s11794_s3 + $0x350] sm:$0xff] }
 0x244   : > { %4919 = vmatprep.subr.bf16.mxu0 %v7443_v44  ;;  %5265 = vmatprep.subr.bf16.mxu1 %v7445_v37  ;;  %v2785_v44 = vld [vmem:[%s11794_s3 + $0x370] sm:$0xff]  ;;  %v2782_v37 = vld [vmem:[%s11794_s3 + $0x358] sm:$0xff] }
 0x245   : > { %4457 = vmatmul.mubr.bf16.gmra.mrb[144].mxu0 %v10001_v30  ;;  %4803 = vmatmul.mubr.bf16.gmra.mrb[144].mxu1 %v10001_v30  ;;  %v7483_v9 = vcombine.high %v2781_v62, %v2785_v44  ;;  %v7482_v42 = vcombine.low %v2781_v62, %v2785_v44  ;;  %v7484_v60 = vcombine.low %v2782_v37, %v2786_v57  ;;  %v2818_v62 = vld [vmem:[%s11794_s3 + $0x478] sm:$0xff] }
 0x246   : > { %4466 = vmatprep.mubr.bf16.mxu0 %v10084_v32  ;;  %4812 = vmatprep.mubr.bf16.mxu1 %v10084_v32 }
 0x247   : > { %4920 = vmatpush1.bf16.msra.mxu0 %v7442_v24  ;;  %5266 = vmatpush1.bf16.msra.mxu1 %v7444_v34  ;;  %v7485_v24 = vcombine.high %v2782_v37, %v2786_v57  ;;  %v2789_v34 = vld [vmem:[%s11794_s3 + $0x390] sm:$0xff] }
 0x248   : > { %4921 = vmatprep.subr.bf16.mxu0 %v7451_v58  ;;  %5267 = vmatprep.subr.bf16.mxu1 %v7453_v41  ;;  %v2793_v58 = vld [vmem:[%s11794_s3 + $0x3b0] sm:$0xff]  ;;  %v2790_v41 = vld [vmem:[%s11794_s3 + $0x398] sm:$0xff] }
 0x249   : > { %v7491_v63 = vcombine.high %v2789_v34, %v2793_v58  ;;  %v7490_v13 = vcombine.low %v2789_v34, %v2793_v58  ;;  %v7492_v36 = vcombine.low %v2790_v41, %v2794_v40 }
 0x24b   : > { %4922 = vmatpush1.bf16.msra.mxu0 %v7450_v0  ;;  %5268 = vmatpush1.bf16.msra.mxu1 %v7452_v23  ;;  %v7493_v0 = vcombine.high %v2790_v41, %v2794_v40  ;;  %v2797_v23 = vld [vmem:[%s11794_s3 + $0x3d0] sm:$0xff] }
 0x24c   : > { %4923 = vmatprep.subr.bf16.mxu0 %v7459_v48  ;;  %5269 = vmatprep.subr.bf16.mxu1 %v7461_v43  ;;  %v2801_v48 = vld [vmem:[%s11794_s3 + $0x3f0] sm:$0xff]  ;;  %v2798_v43 = vld [vmem:[%s11794_s3 + $0x3d8] sm:$0xff] }
 0x24d   : > { %4467 = vmatmul.mubr.bf16.gmra.mrb[148].mxu0 %v10077_v51  ;;  %4813 = vmatmul.mubr.bf16.gmra.mrb[148].mxu1 %v10077_v51  ;;  %v7499_v28 = vcombine.high %v2797_v23, %v2801_v48  ;;  %v7498_v17 = vcombine.low %v2797_v23, %v2801_v48  ;;  %v7500_v10 = vcombine.low %v2798_v43, %v2802_v35 }
 0x24e   : > { %4476 = vmatprep.mubr.bf16.mxu0 %v10134_v61  ;;  %4822 = vmatprep.mubr.bf16.mxu1 %v10134_v61 }
 0x24f   : > { %4924 = vmatpush1.bf16.msra.mxu0 %v7458_v15  ;;  %5270 = vmatpush1.bf16.msra.mxu1 %v7460_v18  ;;  %v7501_v15 = vcombine.high %v2798_v43, %v2802_v35  ;;  %v2805_v18 = vld [vmem:[%s11794_s3 + $0x410] sm:$0xff] }
 0x250   : > { %4925 = vmatprep.subr.bf16.mxu0 %v7467_v47  ;;  %5271 = vmatprep.subr.bf16.mxu1 %v7469_v52  ;;  %v2809_v47 = vld [vmem:[%s11794_s3 + $0x430] sm:$0xff]  ;;  %v2806_v52 = vld [vmem:[%s11794_s3 + $0x418] sm:$0xff] }
 0x251   : > { %v7507_v54 = vcombine.high %v2805_v18, %v2809_v47  ;;  %v7506_v44 = vcombine.low %v2805_v18, %v2809_v47  ;;  %v7508_v37 = vcombine.low %v2806_v52, %v2810_v55  ;;  %v2837_v35 = vld [vmem:[%s11794_s3 + $0x510] sm:$0xff] }
 0x253   : > { %4926 = vmatpush1.bf16.msra.mxu0 %v7466_v19  ;;  %5272 = vmatpush1.bf16.msra.mxu1 %v7468_v46  ;;  %v7509_v19 = vcombine.high %v2806_v52, %v2810_v55  ;;  %v2813_v46 = vld [vmem:[%s11794_s3 + $0x450] sm:$0xff] }
 0x254   : > { %4927 = vmatprep.subr.bf16.mxu0 %v7475_v29  ;;  %5273 = vmatprep.subr.bf16.mxu1 %v7477_v39  ;;  %v2817_v29 = vld [vmem:[%s11794_s3 + $0x470] sm:$0xff]  ;;  %v2814_v39 = vld [vmem:[%s11794_s3 + $0x458] sm:$0xff] }
 0x255   : > { %4477 = vmatmul.mubr.bf16.gmra.mrb[152].mxu0 %v10129_v16  ;;  %4823 = vmatmul.mubr.bf16.gmra.mrb[152].mxu1 %v10129_v16  ;;  %v7515_v57 = vcombine.high %v2813_v46, %v2817_v29  ;;  %v7514_v34 = vcombine.low %v2813_v46, %v2817_v29  ;;  %v7516_v58 = vcombine.low %v2814_v39, %v2818_v62  ;;  %v2845_v55 = vld [vmem:[%s11794_s3 + $0x550] sm:$0xff] }
 0x256   : > { %4486 = vmatprep.mubr.bf16.mxu0 %v10158_v14  ;;  %4832 = vmatprep.mubr.bf16.mxu1 %v10158_v14 }
 0x257   : > { %4928 = vmatpush1.bf16.msra.mxu0 %v7474_v33  ;;  %5274 = vmatpush1.bf16.msra.mxu1 %v7476_v20  ;;  %v2821_v33 = vld [vmem:[%s11794_s3 + $0x490] sm:$0xff] }
 0x258   : > { %4929 = vmatprep.subr.bf16.mxu0 %v7483_v9  ;;  %5275 = vmatprep.subr.bf16.mxu1 %v7485_v24  ;;  %v2825_v20 = vld [vmem:[%s11794_s3 + $0x4b0] sm:$0xff]  ;;  %v2822_v9 = vld [vmem:[%s11794_s3 + $0x498] sm:$0xff] }
 0x259   : > { %v2826_v24 = vld [vmem:[%s11794_s3 + $0x4b8] sm:$0xff]  ;;  %v7523_v41 = vcombine.high %v2821_v33, %v2825_v20 }
 0x25a   : > { %v7525_v40 = vcombine.high %v2822_v9, %v2826_v24  ;;  %v7524_v23 = vcombine.low %v2822_v9, %v2826_v24  ;;  %v2861_v24 = vld [vmem:[%s11794_s3 + $0x5d0] sm:$0xff] }
 0x25b   : > { %4930 = vmatpush1.bf16.msra.mxu0 %v7482_v42  ;;  %5276 = vmatpush1.bf16.msra.mxu1 %v7484_v60  ;;  %v2829_v42 = vld [vmem:[%s11794_s3 + $0x4d0] sm:$0xff] }
 0x25c   : > { %4931 = vmatprep.subr.bf16.mxu0 %v7491_v63  ;;  %5277 = vmatprep.subr.bf16.mxu1 %v7493_v0  ;;  %v2833_v60 = vld [vmem:[%s11794_s3 + $0x4f0] sm:$0xff]  ;;  %v2830_v63 = vld [vmem:[%s11794_s3 + $0x4d8] sm:$0xff]  ;;  %v7522_v0 = vcombine.low %v2821_v33, %v2825_v20 }
 0x25d   : > { %4487 = vmatmul.mubr.bf16.gmra.mrb[156].mxu0 %v10153_v38  ;;  %4833 = vmatmul.mubr.bf16.gmra.mrb[156].mxu1 %v10153_v38  ;;  %v7531_v48 = vcombine.high %v2829_v42, %v2833_v60 }
 0x25e   : > { %4496 = vmatprep.mubr.bf16.mxu0 %v10182_v5  ;;  %4842 = vmatprep.mubr.bf16.mxu1 %v10182_v5 }
 0x25f   : > { %4932 = vmatpush1.bf16.msra.mxu0 %v7490_v13  ;;  %5278 = vmatpush1.bf16.msra.mxu1 %v7492_v36  ;;  %v2841_v13 = vld [vmem:[%s11794_s3 + $0x530] sm:$0xff]  ;;  %v2838_v36 = vld [vmem:[%s11794_s3 + $0x518] sm:$0xff] }
 0x260   : > { %4933 = vmatprep.subr.bf16.mxu0 %v7499_v28  ;;  %5279 = vmatprep.subr.bf16.mxu1 %v7501_v15  ;;  %v2842_v28 = vld [vmem:[%s11794_s3 + $0x538] sm:$0xff]  ;;  %v7530_v15 = vcombine.low %v2829_v42, %v2833_v60  ;;  %v7539_v47 = vcombine.high %v2837_v35, %v2841_v13 }
 0x261   : > { %v7541_v52 = vcombine.high %v2838_v36, %v2842_v28  ;;  %v7540_v46 = vcombine.low %v2838_v36, %v2842_v28  ;;  %v2877_v28 = vld [vmem:[%s11794_s3 + $0x650] sm:$0xff] }
 0x263   : > { %4934 = vmatpush1.bf16.msra.mxu0 %v7498_v17  ;;  %5280 = vmatpush1.bf16.msra.mxu1 %v7500_v10  ;;  %v2849_v17 = vld [vmem:[%s11794_s3 + $0x570] sm:$0xff]  ;;  %v2846_v10 = vld [vmem:[%s11794_s3 + $0x558] sm:$0xff] }
 0x264   : > { %5076 = vmatprep.subr.bf16.mxu0 %v7507_v54  ;;  %5422 = vmatprep.subr.bf16.mxu1 %v7509_v19  ;;  %v2850_v54 = vld [vmem:[%s11794_s3 + $0x578] sm:$0xff]  ;;  %v7538_v19 = vcombine.low %v2837_v35, %v2841_v13  ;;  %v7547_v29 = vcombine.high %v2845_v55, %v2849_v17 }
 0x265   : > { %4497 = vmatmul.mubr.bf16.gmra.mrb[160].mxu0 %v10177_v59  ;;  %4843 = vmatmul.mubr.bf16.gmra.mrb[160].mxu1 %v10177_v59  ;;  %v7548_v33 = vcombine.low %v2846_v10, %v2850_v54 }
 0x266   : > { %4506 = vmatprep.mubr.bf16.mxu0 %v10206_v4  ;;  %4852 = vmatprep.mubr.bf16.mxu1 %v10206_v4 }
 0x26d   : > { %4507 = vmatmul.mubr.bf16.gmra.mrb[164].mxu0 %v10201_v1  ;;  %4853 = vmatmul.mubr.bf16.gmra.mrb[164].mxu1 %v10201_v1 }
 0x26e   : > { %4516 = vmatprep.mubr.bf16.mxu0 %v10230_v22  ;;  %4862 = vmatprep.mubr.bf16.mxu1 %v10230_v22 }
 0x275   : > { %4517 = vmatmul.mubr.bf16.gmra.mrb[168].mxu0 %v10225_v3  ;;  %4863 = vmatmul.mubr.bf16.gmra.mrb[168].mxu1 %v10225_v3 }
 0x276   : > { %4526 = vmatprep.mubr.bf16.mxu0 %v10254_v2  ;;  %4872 = vmatprep.mubr.bf16.mxu1 %v10254_v2 }
 0x27d   : > { %4527 = vmatmul.mubr.bf16.gmra.mrb[172].mxu0 %v10249_v7  ;;  %4873 = vmatmul.mubr.bf16.gmra.mrb[172].mxu1 %v10249_v7 }
 0x27e   : > { %4536 = vmatprep.mubr.bf16.mxu0 %v12025_v21  ;;  %4882 = vmatprep.mubr.bf16.mxu1 %v12025_v21 }
 0x285   : > { %4537 = vmatmul.mubr.bf16.gmra.mrb[176].mxu0 %v10270_v25  ;;  %4883 = vmatmul.mubr.bf16.gmra.mrb[176].mxu1 %v10270_v25 }
 0x286   : > { %4546 = vmatprep.mubr.bf16.mxu0 %v12025_v21  ;;  %4892 = vmatprep.mubr.bf16.mxu1 %v12025_v21 }
 0x28d   : > { %4547 = vmatmul.mubr.bf16.gmra.mrb[180].mxu0 %v10312_v12  ;;  %4893 = vmatmul.mubr.bf16.gmra.mrb[180].mxu1 %v10312_v12 }
 0x28e   : > { %4935 = vmatprep.mubr.bf16.mxu0 %v9531_v56  ;;  %5281 = vmatprep.mubr.bf16.mxu1 %v9531_v56  ;;  %v7517_v56 = vcombine.high %v2814_v39, %v2818_v62  ;;  %v7549_v39 = vcombine.high %v2846_v10, %v2850_v54  ;;  %v2853_v62 = vld [vmem:[%s11794_s3 + $0x590] sm:$0xff] }
 0x28f   : > { %v2885_v54 = vld [vmem:[%s11794_s3 + $0x690] sm:$0xff] }
 0x295   : > { %4936 = vmatmul.mubr.bf16.vlgmr.msra.gmra.mrb[184].mxu0 %v12025_v21  ;;  %5282 = vmatmul.mubr.bf16.vlgmr.msra.gmra.mrb[184].mxu1 %v12025_v21 }
 0x296   : > { %4945 = vmatprep.mubr.bf16.mxu0 %v9608_v53  ;;  %5077 = vmatpush1.bf16.msra.mxu0 %v7506_v44  ;;  %v2857_v44 = vld [vmem:[%s11794_s3 + $0x5b0] sm:$0xff] }
 0x297   : > { %5291 = vmatprep.mubr.bf16.mxu1 %v9608_v53  ;;  %5423 = vmatpush1.bf16.msra.mxu1 %v7508_v37  ;;  %v2834_v53 = vld [vmem:[%s11794_s3 + $0x4f8] sm:$0xff]  ;;  %v7555_v20 = vcombine.high %v2853_v62, %v2857_v44 }
 0x298   : > { %5078 = vmatprep.subr.bf16.mxu0 %v7515_v57  ;;  %5424 = vmatprep.subr.bf16.mxu1 %v7517_v56  ;;  %v7533_v43 = vcombine.high %v2830_v63, %v2834_v53  ;;  %v7532_v18 = vcombine.low %v2830_v63, %v2834_v53  ;;  %v2854_v37 = vld [vmem:[%s11794_s3 + $0x598] sm:$0xff]  ;;  %v7546_v56 = vcombine.low %v2845_v55, %v2849_v17  ;;  %v2869_v53 = vld [vmem:[%s11794_s3 + $0x610] sm:$0xff] }
 0x299   : > { %v2858_v57 = vld [vmem:[%s11794_s3 + $0x5b8] sm:$0xff] }
 0x29a   : > { %5079 = vmatpush1.bf16.msra.mxu0 %v7514_v34  ;;  %v7557_v9 = vcombine.high %v2854_v37, %v2858_v57  ;;  %v2865_v34 = vld [vmem:[%s11794_s3 + $0x5f0] sm:$0xff]  ;;  %v7556_v42 = vcombine.low %v2854_v37, %v2858_v57 }
 0x29b   : > { %5425 = vmatpush1.bf16.msra.mxu1 %v7516_v58  ;;  %5080 = vmatprep.subr.bf16.mxu0 %v7523_v41  ;;  %v2862_v58 = vld [vmem:[%s11794_s3 + $0x5d8] sm:$0xff]  ;;  %v7563_v60 = vcombine.high %v2861_v24, %v2865_v34  ;;  %v2893_v57 = vld [vmem:[%s11794_s3 + $0x6d0] sm:$0xff] }
 0x29c   : > { %5426 = vmatprep.subr.bf16.mxu1 %v7525_v40  ;;  %v2866_v41 = vld [vmem:[%s11794_s3 + $0x5f8] sm:$0xff]  ;;  %v7554_v40 = vcombine.low %v2853_v62, %v2857_v44 }
 0x29d   : > { %4946 = vmatmul.mubr.bf16.gmra.mrb[188].mxu0 %v12025_v21  ;;  %5292 = vmatmul.mubr.bf16.gmra.mrb[188].mxu1 %v12025_v21  ;;  %v7565_v63 = vcombine.high %v2862_v58, %v2866_v41  ;;  %v7564_v35 = vcombine.low %v2862_v58, %v2866_v41  ;;  %v2901_v41 = vld [vmem:[%s11794_s3 + $0x710] sm:$0xff] }
 0x29e   : > { %4955 = vmatprep.mubr.bf16.mxu0 %v9688_v11  ;;  %5301 = vmatprep.mubr.bf16.mxu1 %v9688_v11 }
 0x29f   : > { %5081 = vmatpush1.bf16.msra.mxu0 %v7522_v0  ;;  %5427 = vmatpush1.bf16.msra.mxu1 %v7524_v23  ;;  %v2873_v0 = vld [vmem:[%s11794_s3 + $0x630] sm:$0xff]  ;;  %v2870_v23 = vld [vmem:[%s11794_s3 + $0x618] sm:$0xff] }
 0x2a0   : > { %5082 = vmatprep.subr.bf16.mxu0 %v7531_v48  ;;  %5428 = vmatprep.subr.bf16.mxu1 %v7533_v43  ;;  %v2874_v48 = vld [vmem:[%s11794_s3 + $0x638] sm:$0xff]  ;;  %v7562_v43 = vcombine.low %v2861_v24, %v2865_v34  ;;  %v7571_v13 = vcombine.high %v2869_v53, %v2873_v0 }
 0x2a1   : > { %v7573_v36 = vcombine.high %v2870_v23, %v2874_v48  ;;  %v7572_v55 = vcombine.low %v2870_v23, %v2874_v48  ;;  %v2909_v48 = vld [vmem:[%s11794_s3 + $0x750] sm:$0xff] }
 0x2a3   : > { %5083 = vmatpush1.bf16.msra.mxu0 %v7530_v15  ;;  %5429 = vmatpush1.bf16.msra.mxu1 %v7532_v18  ;;  %v2881_v15 = vld [vmem:[%s11794_s3 + $0x670] sm:$0xff]  ;;  %v2878_v18 = vld [vmem:[%s11794_s3 + $0x658] sm:$0xff] }
 0x2a4   : > { %5084 = vmatprep.subr.bf16.mxu0 %v7539_v47  ;;  %5430 = vmatprep.subr.bf16.mxu1 %v7541_v52  ;;  %v2882_v47 = vld [vmem:[%s11794_s3 + $0x678] sm:$0xff]  ;;  %v7570_v52 = vcombine.low %v2869_v53, %v2873_v0  ;;  %v7579_v17 = vcombine.high %v2877_v28, %v2881_v15 }
 0x2a5   : > { %4956 = vmatmul.mubr.bf16.gmra.mrb[192].mxu0 %v9681_v49  ;;  %5302 = vmatmul.mubr.bf16.gmra.mrb[192].mxu1 %v9681_v49  ;;  %v7581_v10 = vcombine.high %v2878_v18, %v2882_v47  ;;  %v7580_v62 = vcombine.low %v2878_v18, %v2882_v47  ;;  %v2917_v47 = vld [vmem:[%s11794_s3 + $0x790] sm:$0xff] }
 0x2a6   : > { %4965 = vmatprep.mubr.bf16.mxu0 %v9768_v31  ;;  %5311 = vmatprep.mubr.bf16.mxu1 %v9768_v31 }
 0x2a7   : > { %5085 = vmatpush1.bf16.msra.mxu0 %v7538_v19  ;;  %5431 = vmatpush1.bf16.msra.mxu1 %v7540_v46  ;;  %v2889_v19 = vld [vmem:[%s11794_s3 + $0x6b0] sm:$0xff]  ;;  %v2886_v46 = vld [vmem:[%s11794_s3 + $0x698] sm:$0xff] }
 0x2a8   : > { %5086 = vmatprep.subr.bf16.mxu0 %v7547_v29  ;;  %5432 = vmatprep.subr.bf16.mxu1 %v7549_v39  ;;  %v2890_v29 = vld [vmem:[%s11794_s3 + $0x6b8] sm:$0xff]  ;;  %v7578_v39 = vcombine.low %v2877_v28, %v2881_v15  ;;  %v7587_v44 = vcombine.high %v2885_v54, %v2889_v19 }
 0x2a9   : > { %v7589_v37 = vcombine.high %v2886_v46, %v2890_v29  ;;  %v7588_v24 = vcombine.low %v2886_v46, %v2890_v29  ;;  %v2925_v29 = vld [vmem:[%s11794_s3 + $0x7d0] sm:$0xff] }
 0x2ab   : > { %5087 = vmatpush1.bf16.msra.mxu0 %v7546_v56  ;;  %5433 = vmatpush1.bf16.msra.mxu1 %v7548_v33  ;;  %v2897_v56 = vld [vmem:[%s11794_s3 + $0x6f0] sm:$0xff]  ;;  %v2894_v33 = vld [vmem:[%s11794_s3 + $0x6d8] sm:$0xff] }
 0x2ac   : > { %5088 = vmatprep.subr.bf16.mxu0 %v7555_v20  ;;  %5434 = vmatprep.subr.bf16.mxu1 %v7557_v9  ;;  %v2898_v20 = vld [vmem:[%s11794_s3 + $0x6f8] sm:$0xff]  ;;  %v7586_v9 = vcombine.low %v2885_v54, %v2889_v19  ;;  %v7595_v34 = vcombine.high %v2893_v57, %v2897_v56 }
 0x2ad   : > { %4966 = vmatmul.mubr.bf16.gmra.mrb[196].mxu0 %v9761_v8  ;;  %5312 = vmatmul.mubr.bf16.gmra.mrb[196].mxu1 %v9761_v8  ;;  %v7597_v58 = vcombine.high %v2894_v33, %v2898_v20  ;;  %v7596_v53 = vcombine.low %v2894_v33, %v2898_v20 }
 0x2ae   : > { %4975 = vmatprep.mubr.bf16.mxu0 %v9848_v27  ;;  %5321 = vmatprep.mubr.bf16.mxu1 %v9848_v27 }
 0x2af   : > { %5089 = vmatpush1.bf16.msra.mxu0 %v7554_v40  ;;  %5435 = vmatpush1.bf16.msra.mxu1 %v7556_v42  ;;  %v2905_v40 = vld [vmem:[%s11794_s3 + $0x730] sm:$0xff]  ;;  %v2902_v42 = vld [vmem:[%s11794_s3 + $0x718] sm:$0xff] }
 0x2b0   : > { %5090 = vmatprep.subr.bf16.mxu0 %v7563_v60  ;;  %5436 = vmatprep.subr.bf16.mxu1 %v7565_v63  ;;  %v2906_v60 = vld [vmem:[%s11794_s3 + $0x738] sm:$0xff]  ;;  %v7594_v63 = vcombine.low %v2893_v57, %v2897_v56  ;;  %v7603_v0 = vcombine.high %v2901_v41, %v2905_v40 }
 0x2b1   : > { %v7605_v23 = vcombine.high %v2902_v42, %v2906_v60  ;;  %v7604_v28 = vcombine.low %v2902_v42, %v2906_v60 }
 0x2b3   : > { %5091 = vmatpush1.bf16.msra.mxu0 %v7562_v43  ;;  %5437 = vmatpush1.bf16.msra.mxu1 %v7564_v35  ;;  %v2913_v43 = vld [vmem:[%s11794_s3 + $0x770] sm:$0xff]  ;;  %v2910_v35 = vld [vmem:[%s11794_s3 + $0x758] sm:$0xff] }
 0x2b4   : > { %5092 = vmatprep.subr.bf16.mxu0 %v7571_v13  ;;  %5438 = vmatprep.subr.bf16.mxu1 %v7573_v36  ;;  %v2914_v13 = vld [vmem:[%s11794_s3 + $0x778] sm:$0xff]  ;;  %v7602_v36 = vcombine.low %v2901_v41, %v2905_v40  ;;  %v7611_v15 = vcombine.high %v2909_v48, %v2913_v43 }
 0x2b5   : > { %4976 = vmatmul.mubr.bf16.gmra.mrb[200].mxu0 %v9841_v26  ;;  %5322 = vmatmul.mubr.bf16.gmra.mrb[200].mxu1 %v9841_v26  ;;  %v7613_v18 = vcombine.high %v2910_v35, %v2914_v13  ;;  %v7612_v54 = vcombine.low %v2910_v35, %v2914_v13 }
 0x2b6   : > { %4985 = vmatprep.mubr.bf16.mxu0 %v9928_v45  ;;  %5331 = vmatprep.mubr.bf16.mxu1 %v9928_v45 }
 0x2b7   : > { %5093 = vmatpush1.bf16.msra.mxu0 %v7570_v52  ;;  %5439 = vmatpush1.bf16.msra.mxu1 %v7572_v55  ;;  %v2921_v52 = vld [vmem:[%s11794_s3 + $0x7b0] sm:$0xff]  ;;  %v2918_v55 = vld [vmem:[%s11794_s3 + $0x798] sm:$0xff] }
 0x2b8   : > { %5094 = vmatprep.subr.bf16.mxu0 %v7579_v17  ;;  %5440 = vmatprep.subr.bf16.mxu1 %v7581_v10  ;;  %v2922_v17 = vld [vmem:[%s11794_s3 + $0x7b8] sm:$0xff]  ;;  %v7610_v10 = vcombine.low %v2909_v48, %v2913_v43  ;;  %v7619_v19 = vcombine.high %v2917_v47, %v2921_v52 }
 0x2b9   : > { %v7621_v46 = vcombine.high %v2918_v55, %v2922_v17  ;;  %v7620_v57 = vcombine.low %v2918_v55, %v2922_v17 }
 0x2bb   : > { %5095 = vmatpush1.bf16.msra.mxu0 %v7578_v39  ;;  %5441 = vmatpush1.bf16.msra.mxu1 %v7580_v62  ;;  %v2929_v39 = vld [vmem:[%s11794_s3 + $0x7f0] sm:$0xff]  ;;  %v2926_v62 = vld [vmem:[%s11794_s3 + $0x7d8] sm:$0xff] }
 0x2bc   : > { %5096 = vmatprep.subr.bf16.mxu0 %v7587_v44  ;;  %5442 = vmatprep.subr.bf16.mxu1 %v7589_v37  ;;  %v2930_v44 = vld [vmem:[%s11794_s3 + $0x7f8] sm:$0xff]  ;;  %v7618_v37 = vcombine.low %v2917_v47, %v2921_v52  ;;  %v7627_v56 = vcombine.high %v2925_v29, %v2929_v39  ;;  %v7626_v20 = vcombine.low %v2925_v29, %v2929_v39  ;;  %v8210_v29 = vld [vmem:[%s11796_s5 + $0x48] sm:$0xff]  }
 0x2bd   : > { %4986 = vmatmul.mubr.bf16.gmra.mrb[204].mxu0 %v9921_v50  ;;  %5332 = vmatmul.mubr.bf16.gmra.mrb[204].mxu1 %v9921_v50  ;;  %v7629_v33 = vcombine.high %v2926_v62, %v2930_v44  ;;  %v8212_v39 = vld [vmem:[%s11796_s5 + $0xc8] sm:$0xff]  }
 0x2be   : > { %4995 = vmatprep.mubr.bf16.mxu0 %v10008_v6  ;;  %5341 = vmatprep.mubr.bf16.mxu1 %v10008_v6  ;;  %v8226_v47 = vld [vmem:[%s11796_s5 + $0x68] sm:$0xff]  }
 0x2bf   : > { %5097 = vmatpush1.bf16.msra.mxu0 %v7586_v9  ;;  %5443 = vmatpush1.bf16.msra.mxu1 %v7588_v24  ;;  %v7628_v9 = vcombine.low %v2926_v62, %v2930_v44  ;;  %v8206_v24 = vld [vmem:[%s11796_s5 + $0x40] sm:$0xff]   ;;  %v8211_v62 = vld [vmem:[%s11796_s5 + $0x8] sm:$0xff]  }
 0x2c0   : > { %5098 = vmatprep.subr.bf16.mxu0 %v7595_v34  ;;  %5444 = vmatprep.subr.bf16.mxu1 %v7597_v58  ;;  %v8208_v34 = vld [vmem:[%s11796_s5 + $0xc0] sm:$0xff]   ;;  %v8213_v44 = vld [vmem:[%s11796_s5 + $0x88] sm:$0xff]  }
 0x2c3   : > { %5099 = vmatpush1.bf16.msra.mxu0 %v7594_v63  ;;  %5445 = vmatpush1.bf16.msra.mxu1 %v7596_v53 }
 0x2c4   : > { %5100 = vmatprep.subr.bf16.mxu0 %v7603_v0  ;;  %5446 = vmatprep.subr.bf16.mxu1 %v7605_v23 }
 0x2c5   : > { %4996 = vmatmul.mubr.bf16.gmra.mrb[208].mxu0 %v10001_v30  ;;  %5342 = vmatmul.mubr.bf16.gmra.mrb[208].mxu1 %v10001_v30 }
 0x2c6   : > { %5005 = vmatprep.mubr.bf16.mxu0 %v10084_v32  ;;  %5351 = vmatprep.mubr.bf16.mxu1 %v10084_v32 }
 0x2c7   : > { %5101 = vmatpush1.bf16.msra.mxu0 %v7602_v36  ;;  %5447 = vmatpush1.bf16.msra.mxu1 %v7604_v28 }
 0x2c8   : > { %5102 = vmatprep.subr.bf16.mxu0 %v7611_v15  ;;  %5448 = vmatprep.subr.bf16.mxu1 %v7613_v18 }
 0x2cb   : > { %5103 = vmatpush1.bf16.msra.mxu0 %v7610_v10  ;;  %5449 = vmatpush1.bf16.msra.mxu1 %v7612_v54  ;;  %v8207_v54 = vld [vmem:[%s11796_s5] sm:$0xff]  }
 0x2cc   : > { %5104 = vmatprep.subr.bf16.mxu0 %v7619_v19  ;;  %5450 = vmatprep.subr.bf16.mxu1 %v7621_v46  ;;  %v8209_v19 = vld [vmem:[%s11796_s5 + $0x80] sm:$0xff]  }
 0x2cd   : > { %5006 = vmatmul.mubr.bf16.gmra.mrb[212].mxu0 %v10077_v51  ;;  %5352 = vmatmul.mubr.bf16.gmra.mrb[212].mxu1 %v10077_v51 }
 0x2ce   : > { %5015 = vmatprep.mubr.bf16.mxu0 %v10134_v61  ;;  %5361 = vmatprep.mubr.bf16.mxu1 %v10134_v61 }
 0x2cf   : > { %5105 = vmatpush1.bf16.msra.mxu0 %v7618_v37  ;;  %5451 = vmatpush1.bf16.msra.mxu1 %v7620_v57 }
 0x2d0   : > { %5106 = vmatprep.subr.bf16.mxu0 %v7627_v56  ;;  %5452 = vmatprep.subr.bf16.mxu1 %v7629_v33 }
 0x2d3   : > { %5107 = vmatpush1.bf16.msra.mxu0 %v7626_v20  ;;  %5453 = vmatpush1.bf16.msra.mxu1 %v7628_v9  ;;  %v8217_v9 = vld [vmem:[%s11796_s5 + $0x90] sm:$0xff]  }
 0x2d4   : > { %7745 = vmatprep.subr.bf16.mxu0 %v8206_v24  ;;  %7773 = vmatprep.subr.bf16.mxu1 %v8208_v34 }
 0x2d5   : > { %5016 = vmatmul.mubr.bf16.gmra.mrb[216].mxu0 %v10129_v16  ;;  %5362 = vmatmul.mubr.bf16.gmra.mrb[216].mxu1 %v10129_v16 }
 0x2d6   : > { %5025 = vmatprep.mubr.bf16.mxu0 %v10158_v14  ;;  %5371 = vmatprep.mubr.bf16.mxu1 %v10158_v14 }
 0x2dd   : > { %5026 = vmatmul.mubr.bf16.gmra.mrb[220].mxu0 %v10153_v38  ;;  %5372 = vmatmul.mubr.bf16.gmra.mrb[220].mxu1 %v10153_v38 }
 0x2de   : > { %5035 = vmatprep.mubr.bf16.mxu0 %v10182_v5  ;;  %5381 = vmatprep.mubr.bf16.mxu1 %v10182_v5 }
 0x2e5   : > { %5036 = vmatmul.mubr.bf16.gmra.mrb[224].mxu0 %v10177_v59  ;;  %5382 = vmatmul.mubr.bf16.gmra.mrb[224].mxu1 %v10177_v59 }
 0x2e6   : > { %5045 = vmatprep.mubr.bf16.mxu0 %v10206_v4  ;;  %5391 = vmatprep.mubr.bf16.mxu1 %v10206_v4 }
 0x2ed   : > { %5046 = vmatmul.mubr.bf16.gmra.mrb[228].mxu0 %v10201_v1  ;;  %5392 = vmatmul.mubr.bf16.gmra.mrb[228].mxu1 %v10201_v1 }
 0x2ee   : > { %5055 = vmatprep.mubr.bf16.mxu0 %v10230_v22  ;;  %5401 = vmatprep.mubr.bf16.mxu1 %v10230_v22 }
 0x2f5   : > { %5056 = vmatmul.mubr.bf16.gmra.mrb[232].mxu0 %v10225_v3  ;;  %5402 = vmatmul.mubr.bf16.gmra.mrb[232].mxu1 %v10225_v3 }
 0x2f6   : > { %5065 = vmatprep.mubr.bf16.mxu0 %v10254_v2  ;;  %5411 = vmatprep.mubr.bf16.mxu1 %v10254_v2 }
 0x2f8   : > { %v10769_v58 = vpop.f32.mrb[128].mxu0  ;;  %v10771_v41 = vpop.f32.mrb[128].mxu1 }
 0x2f9   : > { %v10775_v42 = vpop.f32.mrb[129].mxu0  ;;  %v10777_v60 = vpop.f32.mrb[129].mxu1 }
 0x2fa   : > { %v10781_v53 = vpop.f32.mrb[130].mxu0  ;;  %v10783_v0 = vpop.f32.mrb[130].mxu1 }
 0x2fb   : > { %v10787_v48 = vpop.f32.mrb[131].mxu0  ;;  %v10789_v43 = vpop.f32.mrb[131].mxu1 }
 0x2fd   : > { %5066 = vmatmul.mubr.bf16.gmra.mrb[236].mxu0 %v10249_v7  ;;  %5412 = vmatmul.mubr.bf16.gmra.mrb[236].mxu1 %v10249_v7 }
 0x2fe   : > { %5108 = vmatprep.mubr.bf16.mxu0 %v9688_v11  ;;  %5454 = vmatprep.mubr.bf16.mxu1 %v9688_v11  ;;  %v8225_v11 = vld [vmem:[%s11796_s5 + $0xa0] sm:$0xff]  }
 0x300   : > { %v10797_v13 = vpop.f32.mrb[132].mxu0  ;;  %v10799_v36 = vpop.f32.mrb[132].mxu1 }
 0x301   : > { %v10803_v15 = vpop.f32.mrb[133].mxu0  ;;  %v10805_v18 = vpop.f32.mrb[133].mxu1 }
 0x302   : > { %v10809_v52 = vpop.f32.mrb[134].mxu0  ;;  %v10811_v55 = vpop.f32.mrb[134].mxu1 }
 0x303   : > { %v10815_v17 = vpop.f32.mrb[135].mxu0  ;;  %v10817_v10 = vpop.f32.mrb[135].mxu1 }
 0x305   : > { %5109 = vmatmul.mubr.bf16.vlgmr.msra.gmra.mrb[184].mxu0 %v9681_v49  ;;  %5455 = vmatmul.mubr.bf16.vlgmr.msra.gmra.mrb[184].mxu1 %v9681_v49  ;;  %v8214_v49 = vld [vmem:[%s11796_s5 + $0x50] sm:$0xff]  }
 0x306   : > { %5118 = vmatprep.mubr.bf16.mxu0 %v9768_v31  ;;  %5464 = vmatprep.mubr.bf16.mxu1 %v9768_v31  ;;  %v8216_v31 = vld [vmem:[%s11796_s5 + $0xd0] sm:$0xff]  }
 0x307   : > { %7746 = vmatpush3.bf16.msra.mxu0 %v8207_v54  ;;  %7774 = vmatpush3.bf16.msra.mxu1 %v8209_v19  ;;  %v8218_v54 = vld [vmem:[%s11796_s5 + $0x58] sm:$0xff]  }
 0x308   : > { %v10843_v37 = vpop.f32.mrb[136].mxu0  ;;  %v10845_v57 = vpop.f32.mrb[136].mxu1  ;;  %7747 = vmatprep.subr.bf16.mxu0 %v8210_v29  ;;  %7775 = vmatprep.subr.bf16.mxu1 %v8212_v39  ;;  %v8215_v39 = vld [vmem:[%s11796_s5 + $0x10] sm:$0xff]  }
 0x309   : > { %v10855_v33 = vpop.f32.mrb[137].mxu0  ;;  %v10857_v20 = vpop.f32.mrb[137].mxu1 }
 0x30a   : > { %v10861_v24 = vpop.f32.mrb[138].mxu0  ;;  %v10863_v34 = vpop.f32.mrb[138].mxu1 }
 0x30b   : > { %v10867_v19 = vpop.f32.mrb[139].mxu0  ;;  %v10869_v29 = vpop.f32.mrb[139].mxu1  ;;  %7748 = vmatpush3.bf16.msra.mxu0 %v8211_v62  ;;  %7776 = vmatpush3.bf16.msra.mxu1 %v8213_v44  ;;  %v8220_v62 = vld [vmem:[%s11796_s5 + $0xd8] sm:$0xff]  }
 0x30c   : > { %7749 = vmatprep.subr.bf16.mxu0 %v8214_v49  ;;  %7777 = vmatprep.subr.bf16.mxu1 %v8216_v31  ;;  %v8219_v44 = vld [vmem:[%s11796_s5 + $0x18] sm:$0xff]  }
 0x30d   : > { %5119 = vmatmul.mubr.bf16.gmra.mrb[188].mxu0 %v9761_v8  ;;  %5465 = vmatmul.mubr.bf16.gmra.mrb[188].mxu1 %v9761_v8  ;;  %v8221_v49 = vld [vmem:[%s11796_s5 + $0x98] sm:$0xff]   ;;  %v8222_v8 = vld [vmem:[%s11796_s5 + $0x60] sm:$0xff]  }
 0x30e   : > { %5128 = vmatprep.mubr.bf16.mxu0 %v9848_v27  ;;  %5474 = vmatprep.mubr.bf16.mxu1 %v9848_v27  ;;  %v8224_v27 = vld [vmem:[%s11796_s5 + $0xe0] sm:$0xff]  }
 0x30f   : > { %7750 = vmatpush3.bf16.msra.mxu0 %v8215_v39  ;;  %7778 = vmatpush3.bf16.msra.mxu1 %v8217_v9  ;;  %v8223_v9 = vld [vmem:[%s11796_s5 + $0x20] sm:$0xff]  }
 0x310   : > { %v10895_v31 = vpop.f32.mrb[140].mxu0  ;;  %v10897_v56 = vpop.f32.mrb[140].mxu1  ;;  %7751 = vmatprep.subr.bf16.mxu0 %v8218_v54  ;;  %7779 = vmatprep.subr.bf16.mxu1 %v8220_v62 }
 0x311   : > { %v10907_v39 = vpop.f32.mrb[141].mxu0  ;;  %v10909_v46 = vpop.f32.mrb[141].mxu1 }
 0x312   : > { %v10913_v54 = vpop.f32.mrb[142].mxu0  ;;  %v10915_v62 = vpop.f32.mrb[142].mxu1 }
 0x313   : > { %v10919_v28 = vpop.f32.mrb[143].mxu0  ;;  %v10921_v35 = vpop.f32.mrb[143].mxu1  ;;  %7752 = vmatpush3.bf16.msra.mxu0 %v8219_v44  ;;  %7780 = vmatpush3.bf16.msra.mxu1 %v8221_v49  ;;  %v8228_v44 = vld [vmem:[%s11796_s5 + $0xe8] sm:$0xff]  }
 0x314   : > { %12145 = vst [vmem:[#allocation2_spill] sm:$0xff] %v10919_v28  ;;  %12146 = vst [vmem:[#allocation3_spill] sm:$0xff] %v10921_v35  ;;  %7753 = vmatprep.subr.bf16.mxu0 %v8222_v8  ;;  %7781 = vmatprep.subr.bf16.mxu1 %v8224_v27  ;;  %v8227_v49 = vld [vmem:[%s11796_s5 + $0x28] sm:$0xff]  }
 0x315   : > { %5129 = vmatmul.mubr.bf16.gmra.mrb[192].mxu0 %v9841_v26  ;;  %5475 = vmatmul.mubr.bf16.gmra.mrb[192].mxu1 %v9841_v26  ;;  %v8229_v8 = vld [vmem:[%s11796_s5 + $0xa8] sm:$0xff]  }
 0x316   : > { %5138 = vmatprep.mubr.bf16.mxu0 %v9928_v45  ;;  %5484 = vmatprep.mubr.bf16.mxu1 %v9928_v45 }
 0x317   : > { %7754 = vmatpush3.bf16.msra.mxu0 %v8223_v9  ;;  %7782 = vmatpush3.bf16.msra.mxu1 %v8225_v11 }
 0x318   : > { %v10947_v27 = vpop.f32.mrb[144].mxu0  ;;  %v10949_v23 = vpop.f32.mrb[144].mxu1  ;;  %7755 = vmatprep.subr.bf16.mxu0 %v8226_v47  ;;  %7783 = vmatprep.subr.bf16.mxu1 %v8228_v44 }
 0x319   : > { %v10953_v45 = vpop.f32.mrb[145].mxu0  ;;  %v10955_v11 = vpop.f32.mrb[145].mxu1 }
 0x31a   : > { %v10959_v63 = vpop.f32.mrb[146].mxu0  ;;  %v10961_v40 = vpop.f32.mrb[146].mxu1 }
 0x31b   : > { %12147 = vst [vmem:[#allocation4_spill] sm:$0xff] %v10961_v40  ;;  %v10965_v28 = vpop.f32.mrb[147].mxu0  ;;  %v10967_v47 = vpop.f32.mrb[147].mxu1  ;;  %7756 = vmatpush3.bf16.msra.mxu0 %v8227_v49  ;;  %7784 = vmatpush3.bf16.msra.mxu1 %v8229_v8 }
 0x31c   : > { %12148 = vst [vmem:[#allocation5_spill] sm:$0xff] %v10965_v28  ;;  %12149 = vst [vmem:[#allocation6_spill] sm:$0xff] %v10967_v47 }
 0x31d   : > { %5139 = vmatmul.mubr.bf16.gmra.mrb[196].mxu0 %v9921_v50  ;;  %5485 = vmatmul.mubr.bf16.gmra.mrb[196].mxu1 %v9921_v50 }
 0x31e   : > { %5148 = vmatprep.mubr.bf16.mxu0 %v10008_v6  ;;  %5494 = vmatprep.mubr.bf16.mxu1 %v10008_v6 }
 0x320   : > { %v10975_v9 = vpop.f32.mrb[148].mxu0  ;;  %v10977_v35 = vpop.f32.mrb[148].mxu1 }
 0x321   : > { %v10981_v49 = vpop.f32.mrb[149].mxu0  ;;  %v10983_v8 = vpop.f32.mrb[149].mxu1 }
 0x322   : > { %12150 = vst [vmem:[#allocation7_spill] sm:$0xff] %v10981_v49  ;;  %12151 = vst [vmem:[#allocation8_spill] sm:$0xff] %v10983_v8  ;;  %v10987_v47 = vpop.f32.mrb[150].mxu0  ;;  %v10989_v50 = vpop.f32.mrb[150].mxu1 }
 0x323   : > { %12152 = vst [vmem:[#allocation9_spill] sm:$0xff] %v10987_v47  ;;  %12153 = vst [vmem:[#allocation10_spill] sm:$0xff] %v10989_v50  ;;  %v10993_v28 = vpop.f32.mrb[151].mxu0  ;;  %v10995_v40 = vpop.f32.mrb[151].mxu1 }
 0x324   : > { %12154 = vst [vmem:[#allocation11_spill] sm:$0xff] %v10993_v28  ;;  %12155 = vst [vmem:[#allocation12_spill] sm:$0xff] %v10995_v40 }
 0x325   : > { %5149 = vmatmul.mubr.bf16.gmra.mrb[200].mxu0 %v10001_v30  ;;  %5495 = vmatmul.mubr.bf16.gmra.mrb[200].mxu1 %v10001_v30 }
 0x326   : > { %5158 = vmatprep.mubr.bf16.mxu0 %v10084_v32  ;;  %5504 = vmatprep.mubr.bf16.mxu1 %v10084_v32 }
 0x328   : > { %v11003_v44 = vpop.f32.mrb[152].mxu0  ;;  %v11005_v8 = vpop.f32.mrb[152].mxu1 }
 0x329   : > { %v11009_v50 = vpop.f32.mrb[153].mxu0  ;;  %v11011_v47 = vpop.f32.mrb[153].mxu1 }
 0x32a   : > { %12156 = vst [vmem:[#allocation13_spill] sm:$0xff] %v11009_v50  ;;  %12157 = vst [vmem:[#allocation14_spill] sm:$0xff] %v11011_v47  ;;  %v11015_v40 = vpop.f32.mrb[154].mxu0  ;;  %v11017_v30 = vpop.f32.mrb[154].mxu1 }
 0x32b   : > { %12158 = vst [vmem:[#allocation15_spill] sm:$0xff] %v11015_v40  ;;  %12159 = vst [vmem:[#allocation16_spill] sm:$0xff] %v11017_v30  ;;  %v11021_v28 = vpop.f32.mrb[155].mxu0  ;;  %v11023_v49 = vpop.f32.mrb[155].mxu1 }
 0x32c   : > { %12160 = vst [vmem:[#allocation17_spill] sm:$0xff] %v11021_v28  ;;  %12161 = vst [vmem:[#allocation18_spill] sm:$0xff] %v11023_v49 }
 0x32d   : > { %5159 = vmatmul.mubr.bf16.gmra.mrb[204].mxu0 %v10077_v51  ;;  %5505 = vmatmul.mubr.bf16.gmra.mrb[204].mxu1 %v10077_v51 }
 0x32e   : > { %5168 = vmatprep.mubr.bf16.mxu0 %v10134_v61  ;;  %5514 = vmatprep.mubr.bf16.mxu1 %v10134_v61 }
 0x330   : > { %v11031_v26 = vpop.f32.mrb[156].mxu0  ;;  %v11033_v47 = vpop.f32.mrb[156].mxu1 }
 0x331   : > { %v11037_v30 = vpop.f32.mrb[157].mxu0  ;;  %v11039_v40 = vpop.f32.mrb[157].mxu1 }
 0x332   : > { %12162 = vst [vmem:[#allocation19_spill] sm:$0xff] %v11037_v30  ;;  %12163 = vst [vmem:[#allocation20_spill] sm:$0xff] %v11039_v40  ;;  %v11043_v49 = vpop.f32.mrb[158].mxu0  ;;  %v11045_v51 = vpop.f32.mrb[158].mxu1 }
 0x333   : > { %12164 = vst [vmem:[#allocation21_spill] sm:$0xff] %v11043_v49  ;;  %12165 = vst [vmem:[#allocation22_spill] sm:$0xff] %v11045_v51  ;;  %v11049_v28 = vpop.f32.mrb[159].mxu0  ;;  %v11051_v50 = vpop.f32.mrb[159].mxu1 }
 0x334   : > { %12166 = vst [vmem:[#allocation23_spill] sm:$0xff] %v11049_v28  ;;  %12167 = vst [vmem:[#allocation24_spill] sm:$0xff] %v11051_v50 }
 0x335   : > { %5169 = vmatmul.mubr.bf16.gmra.mrb[208].mxu0 %v10129_v16  ;;  %5515 = vmatmul.mubr.bf16.gmra.mrb[208].mxu1 %v10129_v16 }
 0x336   : > { %5178 = vmatprep.mubr.bf16.mxu0 %v10158_v14  ;;  %5524 = vmatprep.mubr.bf16.mxu1 %v10158_v14 }
 0x338   : > { %v11059_v6 = vpop.f32.mrb[160].mxu0  ;;  %v11061_v40 = vpop.f32.mrb[160].mxu1 }
 0x339   : > { %v11065_v51 = vpop.f32.mrb[161].mxu0  ;;  %v11067_v49 = vpop.f32.mrb[161].mxu1 }
 0x33a   : > { %12168 = vst [vmem:[#allocation25_spill] sm:$0xff] %v11065_v51  ;;  %12169 = vst [vmem:[#allocation26_spill] sm:$0xff] %v11067_v49  ;;  %v11071_v50 = vpop.f32.mrb[162].mxu0  ;;  %v11073_v16 = vpop.f32.mrb[162].mxu1 }
 0x33b   : > { %12170 = vst [vmem:[#allocation27_spill] sm:$0xff] %v11071_v50  ;;  %12171 = vst [vmem:[#allocation28_spill] sm:$0xff] %v11073_v16  ;;  %v11077_v28 = vpop.f32.mrb[163].mxu0  ;;  %v11079_v30 = vpop.f32.mrb[163].mxu1 }
 0x33c   : > { %12172 = vst [vmem:[#allocation29_spill] sm:$0xff] %v11077_v28  ;;  %12173 = vst [vmem:[#allocation30_spill] sm:$0xff] %v11079_v30 }
 0x33d   : > { %5179 = vmatmul.mubr.bf16.gmra.mrb[212].mxu0 %v10153_v38  ;;  %5525 = vmatmul.mubr.bf16.gmra.mrb[212].mxu1 %v10153_v38 }
 0x33e   : > { %5188 = vmatprep.mubr.bf16.mxu0 %v10182_v5  ;;  %5534 = vmatprep.mubr.bf16.mxu1 %v10182_v5 }
 0x340   : > { %v11087_v32 = vpop.f32.mrb[164].mxu0  ;;  %v11089_v49 = vpop.f32.mrb[164].mxu1 }
 0x341   : > { %v11093_v16 = vpop.f32.mrb[165].mxu0  ;;  %v11095_v50 = vpop.f32.mrb[165].mxu1 }
 0x342   : > { %12174 = vst [vmem:[#allocation31_spill] sm:$0xff] %v11093_v16  ;;  %12175 = vst [vmem:[#allocation32_spill] sm:$0xff] %v11095_v50  ;;  %v11099_v30 = vpop.f32.mrb[166].mxu0  ;;  %v11101_v38 = vpop.f32.mrb[166].mxu1 }
 0x343   : > { %12176 = vst [vmem:[#allocation33_spill] sm:$0xff] %v11099_v30  ;;  %12177 = vst [vmem:[#allocation34_spill] sm:$0xff] %v11101_v38  ;;  %v11105_v28 = vpop.f32.mrb[167].mxu0  ;;  %v11107_v51 = vpop.f32.mrb[167].mxu1 }
 0x344   : > { %12178 = vst [vmem:[#allocation35_spill] sm:$0xff] %v11105_v28  ;;  %12179 = vst [vmem:[#allocation36_spill] sm:$0xff] %v11107_v51 }
 0x345   : > { %5189 = vmatmul.mubr.bf16.gmra.mrb[216].mxu0 %v10177_v59  ;;  %5535 = vmatmul.mubr.bf16.gmra.mrb[216].mxu1 %v10177_v59 }
 0x346   : > { %5198 = vmatprep.mubr.bf16.mxu0 %v10206_v4  ;;  %5544 = vmatprep.mubr.bf16.mxu1 %v10206_v4  ;;  %v8230_v4 = vld [vmem:[%s11796_s5 + $0x70] sm:$0xff]  }
 0x347   : > { %7757 = vmatprep.subr.bf16.mxu0 %v8230_v4  ;;  %v8236_v4 = vld [vmem:[%s11796_s5 + $0x140] sm:$0xff]  }
 0x348   : > { %v11115_v61 = vpop.f32.mrb[168].mxu0  ;;  %v11117_v50 = vpop.f32.mrb[168].mxu1 }
 0x349   : > { %12180 = vst [vmem:[#allocation37_spill] sm:$0xff] %v11115_v61  ;;  %12181 = vst [vmem:[#allocation38_spill] sm:$0xff] %v11117_v50  ;;  %v11121_v38 = vpop.f32.mrb[169].mxu0  ;;  %v11123_v30 = vpop.f32.mrb[169].mxu1 }
 0x34a   : > { %12182 = vst [vmem:[#allocation39_spill] sm:$0xff] %v11121_v38  ;;  %12183 = vst [vmem:[#allocation40_spill] sm:$0xff] %v11123_v30  ;;  %v11127_v51 = vpop.f32.mrb[170].mxu0  ;;  %v11129_v59 = vpop.f32.mrb[170].mxu1 }
 0x34b   : > { %12184 = vst [vmem:[#allocation41_spill] sm:$0xff] %v11127_v51  ;;  %12185 = vst [vmem:[#allocation42_spill] sm:$0xff] %v11129_v59  ;;  %v11133_v28 = vpop.f32.mrb[171].mxu0  ;;  %v11135_v16 = vpop.f32.mrb[171].mxu1 }
 0x34c   : > { %12186 = vst [vmem:[#allocation43_spill] sm:$0xff] %v11133_v28  ;;  %12187 = vst [vmem:[#allocation44_spill] sm:$0xff] %v11135_v16 }
 0x34d   : > { %5199 = vmatmul.mubr.bf16.gmra.mrb[220].mxu0 %v10201_v1  ;;  %5545 = vmatmul.mubr.bf16.gmra.mrb[220].mxu1 %v10201_v1 }
 0x34e   : > { %5208 = vmatprep.mubr.bf16.mxu0 %v10230_v22  ;;  %5554 = vmatprep.mubr.bf16.mxu1 %v10230_v22 }
 0x350   : > { %v11143_v14 = vpop.f32.mrb[172].mxu0  ;;  %v11145_v30 = vpop.f32.mrb[172].mxu1 }
 0x351   : > { %12188 = vst [vmem:[#allocation45_spill] sm:$0xff] %v11143_v14  ;;  %12189 = vst [vmem:[#allocation46_spill] sm:$0xff] %v11145_v30  ;;  %v11149_v59 = vpop.f32.mrb[173].mxu0  ;;  %v11151_v51 = vpop.f32.mrb[173].mxu1 }
 0x352   : > { %12190 = vst [vmem:[#allocation47_spill] sm:$0xff] %v11149_v59  ;;  %12191 = vst [vmem:[#allocation48_spill] sm:$0xff] %v11151_v51  ;;  %v11155_v16 = vpop.f32.mrb[174].mxu0  ;;  %v11157_v1 = vpop.f32.mrb[174].mxu1 }
 0x353   : > { %12192 = vst [vmem:[#allocation49_spill] sm:$0xff] %v11155_v16  ;;  %12193 = vst [vmem:[#allocation50_spill] sm:$0xff] %v11157_v1  ;;  %v11161_v28 = vpop.f32.mrb[175].mxu0  ;;  %v11163_v38 = vpop.f32.mrb[175].mxu1 }
 0x354   : > { %12194 = vst [vmem:[#allocation51_spill] sm:$0xff] %v11161_v28  ;;  %12195 = vst [vmem:[#allocation52_spill] sm:$0xff] %v11163_v38 }
 0x355   : > { %5209 = vmatmul.mubr.bf16.gmra.mrb[224].mxu0 %v10225_v3  ;;  %5555 = vmatmul.mubr.bf16.gmra.mrb[224].mxu1 %v10225_v3 }
 0x356   : > { %5218 = vmatprep.mubr.bf16.mxu0 %v10254_v2  ;;  %5564 = vmatprep.mubr.bf16.mxu1 %v10254_v2  ;;  %v8231_v2 = vld [vmem:[%s11796_s5 + $0x30] sm:$0xff]  }
 0x357   : > { %7758 = vmatpush3.bf16.msra.mxu0 %v8231_v2  ;;  %v8232_v2 = vld [vmem:[%s11796_s5 + $0xf0] sm:$0xff]  }
 0x358   : > { %v11171_v5 = vpop.f32.mrb[176].mxu0  ;;  %v11173_v51 = vpop.f32.mrb[176].mxu1  ;;  %7785 = vmatprep.subr.bf16.mxu1 %v8232_v2  ;;  %v12212_v2 = vld [vmem:[#allocation73_spill] sm:$0xff] }
 0x359   : > { %12196 = vst [vmem:[#allocation53_spill] sm:$0xff] %v11171_v5  ;;  %12197 = vst [vmem:[#allocation54_spill] sm:$0xff] %v11173_v51  ;;  %v11177_v1 = vpop.f32.mrb[177].mxu0  ;;  %v11179_v16 = vpop.f32.mrb[177].mxu1  ;;  %v8234_v51 = vld [vmem:[%s11796_s5 + $0x78] sm:$0xff]   ;;  %v12215_v5 = vmax.f32 %v10769_v58, %v10771_v41  ;;  %v12218_v58 = vmax.f32 %v10787_v48, %v10789_v43  ;;  %v12219_v48 = vmax.f32 %v10797_v13, %v10799_v36  ;;  %v8240_v36 = vld [vmem:[%s11796_s5 + $0x148] sm:$0xff]  }
 0x35a   : > { %12198 = vst [vmem:[#allocation55_spill] sm:$0xff] %v11177_v1  ;;  %12199 = vst [vmem:[#allocation56_spill] sm:$0xff] %v11179_v16  ;;  %v11183_v38 = vpop.f32.mrb[178].mxu0  ;;  %v11185_v3 = vpop.f32.mrb[178].mxu1  ;;  %7759 = vmatprep.subr.bf16.mxu0 %v8234_v51  ;;  %v5763_v51 = vld [vmem:[%s11795_s4] sm:$0x3] }
 0x35b   : > { %12200 = vst [vmem:[#allocation57_spill] sm:$0xff] %v11183_v38  ;;  %12201 = vst [vmem:[#allocation58_spill] sm:$0xff] %v11185_v3  ;;  %v11189_v28 = vpop.f32.mrb[179].mxu0  ;;  %v11191_v59 = vpop.f32.mrb[179].mxu1 }
 0x35c   : > { %12202 = vst [vmem:[#allocation59_spill] sm:$0xff] %v11189_v28  ;;  %12203 = vst [vmem:[#allocation60_spill] sm:$0xff] %v11191_v59  ;;  %v8235_v28 = vld [vmem:[%s11796_s5 + $0x38] sm:$0xff]  }
 0x35d   : > { %5219 = vmatmul.mubr.bf16.gmra.mrb[228].mxu0 %v10249_v7  ;;  %5565 = vmatmul.mubr.bf16.gmra.mrb[228].mxu1 %v10249_v7 }
 0x35e   : > { %5228 = vmatprep.mubr.bf16.mxu0 %v12025_v21  ;;  %5574 = vmatprep.mubr.bf16.mxu1 %v12025_v21 }
 0x35f   : > { %7760 = vmatpush3.bf16.msra.mxu0 %v8235_v28  ;;  %v8246_v28 = vld [vmem:[%s11796_s5 + $0x1c0] sm:$0xff]  }
 0x360   : > { %v11205_v3 = vpop.f32.mrb[180].mxu0  ;;  %v11207_v38 = vpop.f32.mrb[180].mxu1  ;;  %7801 = vmatprep.subr.bf16.mxu0 %v8236_v4 }
 0x361   : > { %12204 = vst [vmem:[#allocation61_spill] sm:$0xff] %v11205_v3  ;;  %12205 = vst [vmem:[#allocation62_spill] sm:$0xff] %v11207_v38  ;;  %v11211_v22 = vpop.f32.mrb[181].mxu0  ;;  %v11213_v59 = vpop.f32.mrb[181].mxu1 }
 0x362   : > { %12206 = vst [vmem:[#allocation63_spill] sm:$0xff] %v11211_v22  ;;  %12207 = vst [vmem:[#allocation64_spill] sm:$0xff] %v11213_v59  ;;  %v11217_v16 = vpop.f32.mrb[182].mxu0  ;;  %v11219_v1 = vpop.f32.mrb[182].mxu1  ;;  %v8233_v22 = vld [vmem:[%s11796_s5 + $0xb0] sm:$0xff]   ;;  %v12213_v59 = vsub.s32 0, %v12212_v2 }
 0x363   : > { %12208 = vst [vmem:[#allocation65_spill] sm:$0xff] %v11217_v16  ;;  %12209 = vst [vmem:[#allocation66_spill] sm:$0xff] %v11219_v1  ;;  %v11226_v7 = vpop.f32.mrb[183].mxu0  ;;  %v11228_v38 = vpop.f32.mrb[183].mxu1  ;;  %7786 = vmatpush3.bf16.msra.mxu1 %v8233_v22 }
 0x364   : > { %12210 = vst [vmem:[#allocation67_spill] sm:$0xff] %v11226_v7  ;;  %12211 = vst [vmem:[#allocation68_spill] sm:$0xff] %v11228_v38 }
 0x365   : > { %5229 = vmatmul.mubr.bf16.gmra.mrb[232].mxu0 %v10270_v25  ;;  %5575 = vmatmul.mubr.bf16.gmra.mrb[232].mxu1 %v10270_v25  ;;  %v8238_v25 = vld [vmem:[%s11796_s5 + $0xf8] sm:$0xff]  }
 0x366   : > { %5238 = vmatprep.mubr.bf16.mxu0 %v12025_v21  ;;  %5584 = vmatprep.mubr.bf16.mxu1 %v12025_v21  ;;  %v8239_v21 = vld [vmem:[%s11796_s5 + $0xb8] sm:$0xff]  }
 0x367   : > { %7787 = vmatprep.subr.bf16.mxu1 %v8238_v25  ;;  %v11264_v25 = vrot.slane %v5763_v51, %v12213_v59  ;;  %v12216_v59 = vmax.f32 %v10775_v42, %v10777_v60 }
 0x368   : > { %7788 = vmatpush3.bf16.msra.mxu1 %v8239_v21  ;;  %v12214_v21 = vsub.s32 1, %v12212_v2 }
 0x369   : > { %7829 = vmatprep.subr.bf16.mxu1 %v8246_v28 }
 0x36a   : > { %v11268_v16 = vrot.slane %v5763_v51, %v12214_v21 }
 0x36d   : > { %5239 = vmatmul.mubr.bf16.gmra.mrb[236].mxu0 %v10312_v12  ;;  %5585 = vmatmul.mubr.bf16.gmra.mrb[236].mxu1 %v10312_v12 }
 0x3d8   : > { %v5110_v12 = vpop.f32.mrb[184].mxu0  ;;  %v5456_v22 = vpop.f32.mrb[184].mxu1 }
 0x3d9   : > { %v5651_v4 = vmax.f32 %v5110_v12, %v5456_v22  ;;  %v5112_v38 = vpop.f32.mrb[185].mxu0  ;;  %v5458_v7 = vpop.f32.mrb[185].mxu1 }
 0x3da   : > { %v5652_v1 = vmax.f32 %v5112_v38, %v5458_v7  ;;  %v5114_v3 = vpop.f32.mrb[186].mxu0  ;;  %v5460_v28 = vpop.f32.mrb[186].mxu1  ;;  %v12217_v7 = vmax.f32 %v10781_v53, %v10783_v0 }
 0x3db   : > { %v5707_v30 = vmax.f32 %v12215_v5, %v5651_v4  ;;  %v5653_v14 = vmax.f32 %v5114_v3, %v5460_v28  ;;  %v5116_v50 = vpop.f32.mrb[187].mxu0  ;;  %v5462_v12 = vpop.f32.mrb[187].mxu1 }
 0x3dc   : > { %v5708_v22 = vmax.f32 %v12216_v59, %v5652_v1  ;;  %v5654_v61 = vmax.f32 %v5116_v50, %v5462_v12 }
 0x3dd   : > { %v5775_v38 = vadd.f32 %v11264_v25, %v5707_v30  ;;  %v5709_v51 = vmax.f32 %v12217_v7, %v5653_v14 }
 0x3de   : > { %v5776_v2 = vadd.f32 %v11268_v16, %v5708_v22  ;;  %v5710_v41 = vmax.f32 %v12218_v58, %v5654_v61 }
 0x3df   : > { %v5777_v5 = vadd.f32 %v11264_v25, %v5709_v51  ;;  %v5831_v60 = vmax.f32 %v5775_v38, 0.0  ;;  %v12220_v38 = vmax.f32 %v10803_v15, %v10805_v18  ;;  %v12222_v15 = vmax.f32 %v10815_v17, %v10817_v10  ;;  %v8242_v17 = vld [vmem:[%s11796_s5 + $0x150] sm:$0xff]  }
 0x3e0   : > { %v5778_v3 = vadd.f32 %v11268_v16, %v5710_v41  ;;  %v5120_v4 = vpop.f32.mrb[188].mxu0  ;;  %v5466_v42 = vpop.f32.mrb[188].mxu1  ;;  %v5832_v28 = vmax.f32 %v5776_v2, 0.0  ;;  %v8237_v2 = vld [vmem:[%s11796_s5 + $0x100] sm:$0xff]  }
 0x3e1   : > { %v5833_v50 = vmax.f32 %v5777_v5, 0.0  ;;  %v5655_v1 = vmax.f32 %v5120_v4, %v5466_v42  ;;  %v5122_v30 = vpop.f32.mrb[189].mxu0  ;;  %v5468_v21 = vpop.f32.mrb[189].mxu1 }
 0x3e2   : > { %v5834_v53 = vmax.f32 %v5778_v3, 0.0  ;;  %v5656_v0 = vmax.f32 %v5122_v30, %v5468_v21  ;;  %v5124_v14 = vpop.f32.mrb[190].mxu0  ;;  %v5470_v12 = vpop.f32.mrb[190].mxu1  ;;  %v12221_v3 = vmax.f32 %v10809_v52, %v10811_v55  ;;  %v8241_v52 = vld [vmem:[%s11796_s5 + $0x108] sm:$0xff]  }
 0x3e3   : > { %v5887_v59 = vpack.c.bf16 %v5833_v50, %v5831_v60  ;;  %v5711_v43 = vmax.f32 %v12219_v48, %v5655_v1  ;;  %v5657_v61 = vmax.f32 %v5124_v14, %v5470_v12  ;;  %v5126_v22 = vpop.f32.mrb[191].mxu0  ;;  %v5472_v7 = vpop.f32.mrb[191].mxu1  ;;  %v12223_v48 = vmax.f32 %v10843_v37, %v10845_v57 }
 0x3e4   : > { %v5712_v51 = vmax.f32 %v12220_v38, %v5656_v0  ;;  %v5658_v58 = vmax.f32 %v5126_v22, %v5472_v7  ;;  %v5888_v41 = vpack.c.bf16 %v5834_v53, %v5832_v28  ;;  %v12225_v37 = vmax.f32 %v10861_v24, %v10863_v34  ;;  %v8245_v34 = vld [vmem:[%s11796_s5 + $0x118] sm:$0xff]  }
 0x3e5   : > { %v5779_v5 = vadd.f32 %v11264_v25, %v5711_v43  ;;  %v5713_v13 = vmax.f32 %v12221_v3, %v5657_v61 }
 0x3e6   : > { %v5780_v4 = vadd.f32 %v11268_v16, %v5712_v51  ;;  %v5714_v18 = vmax.f32 %v12222_v15, %v5658_v58  ;;  %6850 = vmatprep.mubr.bf16.mxu0 %v5888_v41  ;;  %v12224_v51 = vmax.f32 %v10855_v33, %v10857_v20  ;;  %v12226_v20 = vmax.f32 %v10867_v19, %v10869_v29  ;;  %v8247_v19 = vld [vmem:[%s11796_s5 + $0x160] sm:$0xff]  }
 0x3e7   : > { %v5781_v42 = vadd.f32 %v11264_v25, %v5713_v13  ;;  %6851 = vmatmul.mubr.bf16.vlgmr.msra.gmra.mrb[240].mxu0 %v5887_v59  ;;  %v5835_v55 = vmax.f32 %v5779_v5, 0.0  ;;  %v8243_v5 = vld [vmem:[%s11796_s5 + $0x110] sm:$0xff]   ;;  %v8244_v13 = vld [vmem:[%s11796_s5 + $0x158] sm:$0xff]  }
 0x3e8   : > { %v5782_v60 = vadd.f32 %v11268_v16, %v5714_v18  ;;  %v5130_v50 = vpop.f32.mrb[192].mxu0  ;;  %v5476_v1 = vpop.f32.mrb[192].mxu1  ;;  %7802 = vmatpush3.bf16.msra.mxu0 %v8237_v2  ;;  %v5836_v10 = vmax.f32 %v5780_v4, 0.0 }
 0x3e9   : > { %v5837_v30 = vmax.f32 %v5781_v42, 0.0  ;;  %v5659_v21 = vmax.f32 %v5130_v50, %v5476_v1  ;;  %v5132_v28 = vpop.f32.mrb[193].mxu0  ;;  %v5478_v53 = vpop.f32.mrb[193].mxu1  ;;  %7803 = vmatprep.subr.bf16.mxu0 %v8240_v36 }
 0x3ea   : > { %v5838_v0 = vmax.f32 %v5782_v60, 0.0  ;;  %v5660_v14 = vmax.f32 %v5132_v28, %v5478_v53  ;;  %v5134_v12 = vpop.f32.mrb[194].mxu0  ;;  %v5480_v59 = vpop.f32.mrb[194].mxu1 }
 0x3eb   : > { %v5715_v43 = vmax.f32 %v12223_v48, %v5659_v21  ;;  %v5661_v61 = vmax.f32 %v5134_v12, %v5480_v59  ;;  %v5136_v22 = vpop.f32.mrb[195].mxu0  ;;  %v5482_v7 = vpop.f32.mrb[195].mxu1  ;;  %v5889_v38 = vpack.c.bf16 %v5837_v30, %v5835_v55  ;;  %v12228_v59 = vmax.f32 %v10907_v39, %v10909_v46  ;;  %v8250_v46 = vld [vmem:[%s11796_s5 + $0x1c8] sm:$0xff]  }
 0x3ec   : > { %v5716_v58 = vmax.f32 %v12224_v51, %v5660_v14  ;;  %v5662_v41 = vmax.f32 %v5136_v22, %v5482_v7  ;;  %7804 = vmatpush3.bf16.msra.mxu0 %v8241_v52  ;;  %v5890_v2 = vpack.c.bf16 %v5838_v0, %v5836_v10  ;;  %v8248_v22 = vld [vmem:[%s11796_s5 + $0x180] sm:$0xff]   ;;  %v8251_v39 = vld [vmem:[%s11796_s5 + $0x168] sm:$0xff]  }
 0x3ed   : > { %v5783_v3 = vadd.f32 %v11264_v25, %v5715_v43  ;;  %v5717_v57 = vmax.f32 %v12225_v37, %v5661_v61  ;;  %7805 = vmatprep.subr.bf16.mxu0 %v8242_v17  ;;  %v12227_v17 = vmax.f32 %v10895_v31, %v10897_v56  ;;  %v8249_v7 = vld [vmem:[%s11796_s5 + $0x120] sm:$0xff]   ;;  %v12229_v31 = vmax.f32 %v10913_v54, %v10915_v62 }
 0x3ee   : > { %v5784_v33 = vadd.f32 %v11268_v16, %v5716_v58  ;;  %v5718_v36 = vmax.f32 %v12226_v20, %v5662_v41  ;;  %6858 = vmatprep.mubr.bf16.mxu0 %v5890_v2  ;;  %v12230_v58 = vld [vmem:[#allocation2_spill] sm:$0xff]  ;;  %v12231_v41 = vld [vmem:[#allocation3_spill] sm:$0xff] }
 0x3ef   : > { %v5785_v4 = vadd.f32 %v11264_v25, %v5717_v57  ;;  %6859 = vmatmul.mubr.bf16.gmra.mrb[244].mxu0 %v5889_v38  ;;  %v5839_v42 = vmax.f32 %v5783_v3, 0.0  ;;  %v12232_v2 = vmax.f32 %v12230_v58, %v12231_v41  ;;  %v8252_v57 = vld [vmem:[%s11796_s5 + $0x188] sm:$0xff]  }
 0x3f0   : > { %v5786_v15 = vadd.f32 %v11268_v16, %v5718_v36  ;;  %v5140_v18 = vpop.f32.mrb[196].mxu0  ;;  %v5486_v24 = vpop.f32.mrb[196].mxu1  ;;  %7806 = vmatpush3.bf16.msra.mxu0 %v8243_v5  ;;  %v5840_v29 = vmax.f32 %v5784_v33, 0.0 }
 0x3f1   : > { %v5841_v60 = vmax.f32 %v5785_v4, 0.0  ;;  %v5663_v50 = vmax.f32 %v5140_v18, %v5486_v24  ;;  %v5142_v1 = vpop.f32.mrb[197].mxu0  ;;  %v5488_v52 = vpop.f32.mrb[197].mxu1  ;;  %7807 = vmatprep.subr.bf16.mxu0 %v8244_v13  ;;  %v8253_v13 = vld [vmem:[%s11796_s5 + $0x128] sm:$0xff]   ;;  %v8254_v18 = vld [vmem:[%s11796_s5 + $0x1d0] sm:$0xff]  }
 0x3f2   : > { %v5842_v55 = vmax.f32 %v5786_v15, 0.0  ;;  %v5664_v30 = vmax.f32 %v5142_v1, %v5488_v52  ;;  %v5144_v21 = vpop.f32.mrb[198].mxu0  ;;  %v5490_v28 = vpop.f32.mrb[198].mxu1  ;;  %v8255_v24 = vld [vmem:[%s11796_s5 + $0x170] sm:$0xff]   ;;  %v12233_v52 = vmax.f32 %v10947_v27, %v10949_v23 }
 0x3f3   : > { %v5891_v53 = vpack.c.bf16 %v5841_v60, %v5839_v42  ;;  %v5719_v10 = vmax.f32 %v12227_v17, %v5663_v50  ;;  %v5665_v0 = vmax.f32 %v5144_v21, %v5490_v28  ;;  %v5146_v14 = vpop.f32.mrb[199].mxu0  ;;  %v5492_v12 = vpop.f32.mrb[199].mxu1  ;;  %v12234_v28 = vmax.f32 %v10953_v45, %v10955_v11  ;;  %v8257_v23 = vld [vmem:[%s11796_s5 + $0x130] sm:$0xff]   ;;  %v8258_v45 = vld [vmem:[%s11796_s5 + $0x1d8] sm:$0xff]  }
 0x3f4   : > { %v5720_v48 = vmax.f32 %v12228_v59, %v5664_v30  ;;  %v5666_v43 = vmax.f32 %v5146_v14, %v5492_v12  ;;  %7808 = vmatpush3.bf16.msra.mxu0 %v8245_v34  ;;  %v5892_v61 = vpack.c.bf16 %v5842_v55, %v5840_v29  ;;  %v12235_v14 = vld [vmem:[#allocation4_spill] sm:$0xff]  ;;  %v8259_v11 = vld [vmem:[%s11796_s5 + $0x178] sm:$0xff]  }
 0x3f5   : > { %v5787_v56 = vadd.f32 %v11264_v25, %v5719_v10  ;;  %v5721_v38 = vmax.f32 %v12229_v31, %v5665_v0  ;;  %7809 = vmatprep.subr.bf16.mxu0 %v8247_v19  ;;  %v8256_v0 = vld [vmem:[%s11796_s5 + $0x190] sm:$0xff]   ;;  %v12236_v12 = vmax.f32 %v10959_v63, %v12235_v14 }
 0x3f6   : > { %v5788_v51 = vadd.f32 %v11268_v16, %v5720_v48  ;;  %v5722_v5 = vmax.f32 %v12232_v2, %v5666_v43  ;;  %6899 = vmatprep.mubr.bf16.mxu1 %v5892_v61  ;;  %v12237_v43 = vld [vmem:[#allocation5_spill] sm:$0xff]  ;;  %v12238_v61 = vld [vmem:[#allocation6_spill] sm:$0xff] }
 0x3f7   : > { %v5789_v3 = vadd.f32 %v11264_v25, %v5721_v38  ;;  %6900 = vmatmul.mubr.bf16.vlgmr.msra.gmra.mrb[240].mxu1 %v5891_v53  ;;  %v5843_v33 = vmax.f32 %v5787_v56, 0.0 }
 0x3f8   : > { %v5790_v54 = vadd.f32 %v11268_v16, %v5722_v5  ;;  %7830 = vmatpush3.bf16.msra.mxu1 %v8248_v22  ;;  %v5150_v62 = vpop.f32.mrb[200].mxu0  ;;  %v5496_v37 = vpop.f32.mrb[200].mxu1  ;;  %7810 = vmatpush3.bf16.msra.mxu0 %v8249_v7  ;;  %v5844_v34 = vmax.f32 %v5788_v51, 0.0  ;;  %v12239_v22 = vmax.f32 %v12237_v43, %v12238_v61 }
 0x3f9   : > { %v5845_v20 = vmax.f32 %v5789_v3, 0.0  ;;  %v5667_v36 = vmax.f32 %v5150_v62, %v5496_v37  ;;  %v5152_v4 = vpop.f32.mrb[201].mxu0  ;;  %v5498_v15 = vpop.f32.mrb[201].mxu1  ;;  %7831 = vmatprep.subr.bf16.mxu1 %v8250_v46  ;;  %7811 = vmatprep.subr.bf16.mxu0 %v8251_v39  ;;  %v8260_v46 = vld [vmem:[%s11796_s5 + $0x198] sm:$0xff]   ;;  %v8262_v3 = vld [vmem:[%s11796_s5 + $0x1e0] sm:$0xff]  }
 0x3fa   : > { %v5846_v42 = vmax.f32 %v5790_v54, 0.0  ;;  %v5668_v60 = vmax.f32 %v5152_v4, %v5498_v15  ;;  %v5154_v50 = vpop.f32.mrb[202].mxu0  ;;  %v5500_v1 = vpop.f32.mrb[202].mxu1  ;;  %v8261_v39 = vld [vmem:[%s11796_s5 + $0x138] sm:$0xff]   ;;  %v8264_v54 = vld [vmem:[%s11796_s5 + $0x240] sm:$0xff]  }
 0x3fb   : > { %v5723_v19 = vmax.f32 %v12233_v52, %v5667_v36  ;;  %v5669_v29 = vmax.f32 %v5154_v50, %v5500_v1  ;;  %v5156_v55 = vpop.f32.mrb[203].mxu0  ;;  %v5502_v30 = vpop.f32.mrb[203].mxu1  ;;  %v5893_v21 = vpack.c.bf16 %v5845_v20, %v5843_v33  ;;  %v12240_v36 = vmax.f32 %v10975_v9, %v10977_v35  ;;  %v8265_v35 = vld [vmem:[%s11796_s5 + $0x200] sm:$0xff]  }
 0x3fc   : > { %v5724_v53 = vmax.f32 %v12234_v28, %v5668_v60  ;;  %v5670_v17 = vmax.f32 %v5156_v55, %v5502_v30  ;;  %7832 = vmatpush3.bf16.msra.mxu1 %v8252_v57  ;;  %7812 = vmatpush3.bf16.msra.mxu0 %v8253_v13  ;;  %v5894_v10 = vpack.c.bf16 %v5846_v42, %v5844_v34  ;;  %v12241_v34 = vld [vmem:[#allocation7_spill] sm:$0xff]  ;;  %v12242_v42 = vld [vmem:[#allocation8_spill] sm:$0xff]  ;;  %v12245_v55 = vld [vmem:[#allocation10_spill] sm:$0xff] }
 0x3fd   : > { %v5791_v27 = vadd.f32 %v11264_v25, %v5723_v19  ;;  %v5725_v59 = vmax.f32 %v12236_v12, %v5669_v29  ;;  %7833 = vmatprep.subr.bf16.mxu1 %v8254_v18  ;;  %7813 = vmatprep.subr.bf16.mxu0 %v8255_v24  ;;  %v12243_v60 = vmax.f32 %v12241_v34, %v12242_v42  ;;  %v8263_v19 = vld [vmem:[%s11796_s5 + $0x1a0] sm:$0xff]   ;;  %v12244_v29 = vld [vmem:[#allocation9_spill] sm:$0xff]  ;;  %v8266_v28 = vld [vmem:[%s11796_s5 + $0x1e8] sm:$0xff]  }
 0x3fe   : > { %v5792_v48 = vadd.f32 %v11268_v16, %v5724_v53  ;;  %v5726_v7 = vmax.f32 %v12239_v22, %v5670_v17  ;;  %6907 = vmatprep.mubr.bf16.mxu1 %v5894_v10  ;;  %v12246_v30 = vmax.f32 %v12244_v29, %v12245_v55  ;;  %v8268_v53 = vld [vmem:[%s11796_s5 + $0x248] sm:$0xff]   ;;  %v8274_v42 = vld [vmem:[%s11796_s5 + $0x1f8] sm:$0xff]  }
 0x3ff   : > { %v5793_v63 = vadd.f32 %v11264_v25, %v5725_v59  ;;  %6908 = vmatmul.mubr.bf16.gmra.mrb[244].mxu1 %v5893_v21  ;;  %v5847_v51 = vmax.f32 %v5791_v27, 0.0  ;;  %v12247_v10 = vld [vmem:[#allocation11_spill] sm:$0xff] }
 0x400   : > { %v5794_v56 = vadd.f32 %v11268_v16, %v5726_v7  ;;  %7834 = vmatpush3.bf16.msra.mxu1 %v8256_v0  ;;  %v5160_v31 = vpop.f32.mrb[204].mxu0  ;;  %v5506_v38 = vpop.f32.mrb[204].mxu1  ;;  %7814 = vmatpush3.bf16.msra.mxu0 %v8257_v23  ;;  %v5848_v62 = vmax.f32 %v5792_v48, 0.0  ;;  %v12248_v0 = vld [vmem:[#allocation12_spill] sm:$0xff]  ;;  %v8269_v48 = vld [vmem:[%s11796_s5 + $0x208] sm:$0xff]  }
 0x401   : > { %v5849_v58 = vmax.f32 %v5793_v63, 0.0  ;;  %v5671_v41 = vmax.f32 %v5160_v31, %v5506_v38  ;;  %v5162_v2 = vpop.f32.mrb[205].mxu0  ;;  %v5508_v5 = vpop.f32.mrb[205].mxu1  ;;  %7835 = vmatprep.subr.bf16.mxu1 %v8258_v45  ;;  %7815 = vmatprep.subr.bf16.mxu0 %v8259_v11  ;;  %v12249_v23 = vmax.f32 %v12247_v10, %v12248_v0  ;;  %v8267_v11 = vld [vmem:[%s11796_s5 + $0x1a8] sm:$0xff]   ;;  %v8272_v31 = vld [vmem:[%s11796_s5 + $0x250] sm:$0xff]  }
 0x402   : > { %v5850_v37 = vmax.f32 %v5794_v56, 0.0  ;;  %v5672_v57 = vmax.f32 %v5162_v2, %v5508_v5  ;;  %v5164_v13 = vpop.f32.mrb[206].mxu0  ;;  %v5510_v33 = vpop.f32.mrb[206].mxu1  ;;  %v8270_v56 = vld [vmem:[%s11796_s5 + $0x1f0] sm:$0xff]  }
 0x403   : > { %v5895_v20 = vpack.c.bf16 %v5849_v58, %v5847_v51  ;;  %v5727_v4 = vmax.f32 %v12240_v36, %v5671_v41  ;;  %v5673_v15 = vmax.f32 %v5164_v13, %v5510_v33  ;;  %v5166_v18 = vpop.f32.mrb[207].mxu0  ;;  %v5512_v24 = vpop.f32.mrb[207].mxu1  ;;  %v12250_v41 = vmax.f32 %v11003_v44, %v11005_v8  ;;  %v8273_v44 = vld [vmem:[%s11796_s5 + $0x210] sm:$0xff]  }
 0x404   : > { %v5728_v50 = vmax.f32 %v12243_v60, %v5672_v57  ;;  %v5674_v1 = vmax.f32 %v5166_v18, %v5512_v24  ;;  %7836 = vmatpush3.bf16.msra.mxu1 %v8260_v46  ;;  %7816 = vmatpush3.bf16.msra.mxu0 %v8261_v39  ;;  %v5896_v52 = vpack.c.bf16 %v5850_v37, %v5848_v62  ;;  %v12251_v37 = vld [vmem:[#allocation13_spill] sm:$0xff]  ;;  %v12252_v57 = vld [vmem:[#allocation14_spill] sm:$0xff]  ;;  %v12255_v18 = vld [vmem:[#allocation16_spill] sm:$0xff] }
 0x405   : > { %v5795_v9 = vadd.f32 %v11264_v25, %v5727_v4  ;;  %v5729_v21 = vmax.f32 %v12246_v30, %v5673_v15  ;;  %7837 = vmatprep.subr.bf16.mxu1 %v8262_v3  ;;  %7857 = vmatprep.subr.bf16.mxu0 %v8264_v54  ;;  %v12253_v13 = vmax.f32 %v12251_v37, %v12252_v57  ;;  %v8271_v4 = vld [vmem:[%s11796_s5 + $0x1b0] sm:$0xff]   ;;  %v12254_v15 = vld [vmem:[#allocation15_spill] sm:$0xff]  ;;  %v8276_v60 = vld [vmem:[%s11796_s5 + $0x258] sm:$0xff]  }
 0x406   : > { %v5796_v17 = vadd.f32 %v11268_v16, %v5728_v50  ;;  %v5730_v27 = vmax.f32 %v12249_v23, %v5674_v1  ;;  %6948 = vmatprep.mubr.bf16.mxu0 %v5896_v52  ;;  %v12256_v24 = vmax.f32 %v12254_v15, %v12255_v18  ;;  %v12257_v1 = vld [vmem:[#allocation17_spill] sm:$0xff]  ;;  %v12258_v52 = vld [vmem:[#allocation18_spill] sm:$0xff]  ;;  %v8283_v37 = vld [vmem:[%s11796_s5 + $0x268] sm:$0xff]  }
 0x407   : > { %v5797_v14 = vadd.f32 %v11264_v25, %v5729_v21  ;;  %6949 = vmatmul.mubr.bf16.vlgmr.msra.gmra.mrb[248].mxu0 %v5895_v20  ;;  %v5851_v43 = vmax.f32 %v5795_v9, 0.0  ;;  %v8275_v21 = vld [vmem:[%s11796_s5 + $0x1b8] sm:$0xff]   ;;  %v8284_v18 = vld [vmem:[%s11796_s5 + $0x288] sm:$0xff]  }
 0x408   : > { %v5798_v12 = vadd.f32 %v11268_v16, %v5730_v27  ;;  %7838 = vmatpush3.bf16.msra.mxu1 %v8263_v19  ;;  %v5170_v59 = vpop.f32.mrb[208].mxu0  ;;  %v5516_v45 = vpop.f32.mrb[208].mxu1  ;;  %7858 = vmatpush3.bf16.msra.mxu0 %v8265_v35  ;;  %v5852_v38 = vmax.f32 %v5796_v17, 0.0  ;;  %v12259_v19 = vmax.f32 %v12257_v1, %v12258_v52  ;;  %v8278_v27 = vld [vmem:[%s11796_s5 + $0x2c0] sm:$0xff]   ;;  %v8286_v52 = vld [vmem:[%s11796_s5 + $0x2d0] sm:$0xff]  }
 0x409   : > { %v5853_v61 = vmax.f32 %v5797_v14, 0.0  ;;  %v5675_v22 = vmax.f32 %v5170_v59, %v5516_v45  ;;  %v5172_v7 = vpop.f32.mrb[209].mxu0  ;;  %v5518_v63 = vpop.f32.mrb[209].mxu1  ;;  %7839 = vmatprep.subr.bf16.mxu1 %v8266_v28  ;;  %7859 = vmatprep.subr.bf16.mxu0 %v8268_v53  ;;  %v8277_v28 = vld [vmem:[%s11796_s5 + $0x218] sm:$0xff]   ;;  %v8279_v14 = vld [vmem:[%s11796_s5 + $0x260] sm:$0xff]  }
 0x40a   : > { %v5854_v46 = vmax.f32 %v5798_v12, 0.0  ;;  %v5676_v39 = vmax.f32 %v5172_v7, %v5518_v63  ;;  %v5174_v51 = vpop.f32.mrb[210].mxu0  ;;  %v5520_v58 = vpop.f32.mrb[210].mxu1 }
 0x40b   : > { %v5731_v2 = vmax.f32 %v12250_v41, %v5675_v22  ;;  %v5677_v5 = vmax.f32 %v5174_v51, %v5520_v58  ;;  %v5176_v3 = vpop.f32.mrb[211].mxu0  ;;  %v5522_v54 = vpop.f32.mrb[211].mxu1  ;;  %v5897_v62 = vpack.c.bf16 %v5853_v61, %v5851_v43  ;;  %v12260_v61 = vmax.f32 %v11031_v26, %v11033_v47  ;;  %v8280_v41 = vld [vmem:[%s11796_s5 + $0x280] sm:$0xff]  }
 0x40c   : > { %v5732_v33 = vmax.f32 %v12253_v13, %v5676_v39  ;;  %v5678_v20 = vmax.f32 %v5176_v3, %v5522_v54  ;;  %7840 = vmatpush3.bf16.msra.mxu1 %v8267_v11  ;;  %7860 = vmatpush3.bf16.msra.mxu0 %v8269_v48  ;;  %v5898_v36 = vpack.c.bf16 %v5854_v46, %v5852_v38  ;;  %v12262_v38 = vld [vmem:[#allocation20_spill] sm:$0xff]  ;;  %v8281_v26 = vld [vmem:[%s11796_s5 + $0x220] sm:$0xff]   ;;  %v12267_v13 = vld [vmem:[#allocation23_spill] sm:$0xff] }
 0x40d   : > { %v5799_v8 = vadd.f32 %v11264_v25, %v5731_v2  ;;  %v5733_v34 = vmax.f32 %v12256_v24, %v5677_v5  ;;  %7841 = vmatprep.subr.bf16.mxu1 %v8270_v56  ;;  %7861 = vmatprep.subr.bf16.mxu0 %v8272_v31  ;;  %v12261_v31 = vld [vmem:[#allocation19_spill] sm:$0xff]  ;;  %v12264_v2 = vld [vmem:[#allocation21_spill] sm:$0xff]  ;;  %v12265_v5 = vld [vmem:[#allocation22_spill] sm:$0xff] }
 0x40e   : > { %v5800_v50 = vadd.f32 %v11268_v16, %v5732_v33  ;;  %v5734_v35 = vmax.f32 %v12259_v19, %v5678_v20  ;;  %6956 = vmatprep.mubr.bf16.mxu0 %v5898_v36  ;;  %v12263_v46 = vmax.f32 %v12261_v31, %v12262_v38  ;;  %v12266_v3 = vmax.f32 %v12264_v2, %v12265_v5  ;;  %v12268_v33 = vld [vmem:[#allocation24_spill] sm:$0xff]  ;;  %v8285_v24 = vld [vmem:[%s11796_s5 + $0x228] sm:$0xff]   ;;  %v12277_v31 = vld [vmem:[#allocation29_spill] sm:$0xff] }
 0x40f   : > { %v5801_v9 = vadd.f32 %v11264_v25, %v5733_v34  ;;  %6957 = vmatmul.mubr.bf16.gmra.mrb[252].mxu0 %v5897_v62  ;;  %v5855_v53 = vmax.f32 %v5799_v8, 0.0  ;;  %v8282_v62 = vld [vmem:[%s11796_s5 + $0x2c8] sm:$0xff]   ;;  %v12269_v20 = vmax.f32 %v12267_v13, %v12268_v33  ;;  %v8287_v19 = vld [vmem:[%s11796_s5 + $0x270] sm:$0xff]   ;;  %v12278_v38 = vld [vmem:[#allocation30_spill] sm:$0xff] }
 0x410   : > { %v5802_v29 = vadd.f32 %v11268_v16, %v5734_v35  ;;  %7842 = vmatpush3.bf16.msra.mxu1 %v8271_v4  ;;  %v5180_v55 = vpop.f32.mrb[212].mxu0  ;;  %v5526_v30 = vpop.f32.mrb[212].mxu1  ;;  %7862 = vmatpush3.bf16.msra.mxu0 %v8273_v44  ;;  %v5856_v12 = vmax.f32 %v5800_v50, 0.0  ;;  %v8293_v2 = vld [vmem:[%s11796_s5 + $0x238] sm:$0xff]   ;;  %v11582_v13 = vld [vmem:[%s11796_s5 + $0x340] sm:$0xff]  }
 0x411   : > { %v5857_v17 = vmax.f32 %v5801_v9, 0.0  ;;  %v5679_v10 = vmax.f32 %v5180_v55, %v5526_v30  ;;  %v5182_v0 = vpop.f32.mrb[213].mxu0  ;;  %v5528_v23 = vpop.f32.mrb[213].mxu1  ;;  %7843 = vmatprep.subr.bf16.mxu1 %v8274_v42  ;;  %7863 = vmatprep.subr.bf16.mxu0 %v8276_v60 }
 0x412   : > { %v5858_v59 = vmax.f32 %v5802_v29, 0.0  ;;  %v5680_v45 = vmax.f32 %v5182_v0, %v5528_v23  ;;  %v5184_v11 = vpop.f32.mrb[214].mxu0  ;;  %v5530_v48 = vpop.f32.mrb[214].mxu1  ;;  %v12271_v23 = vld [vmem:[#allocation25_spill] sm:$0xff] }
 0x413   : > { %v5899_v43 = vpack.c.bf16 %v5857_v17, %v5855_v53  ;;  %v5735_v22 = vmax.f32 %v12260_v61, %v5679_v10  ;;  %v5681_v7 = vmax.f32 %v5184_v11, %v5530_v48  ;;  %v5186_v63 = vpop.f32.mrb[215].mxu0  ;;  %v5532_v56 = vpop.f32.mrb[215].mxu1  ;;  %v8288_v11 = vld [vmem:[%s11796_s5 + $0x290] sm:$0xff]   ;;  %v12274_v48 = vld [vmem:[#allocation27_spill] sm:$0xff] }
 0x414   : > { %v5736_v39 = vmax.f32 %v12263_v46, %v5680_v45  ;;  %v5682_v51 = vmax.f32 %v5186_v63, %v5532_v56  ;;  %7844 = vmatpush3.bf16.msra.mxu1 %v8275_v21  ;;  %7864 = vmatpush3.bf16.msra.mxu0 %v8277_v28  ;;  %v5900_v58 = vpack.c.bf16 %v5858_v59, %v5856_v12  ;;  %v8291_v63 = vld [vmem:[%s11796_s5 + $0x278] sm:$0xff]  }
 0x415   : > { %v5803_v47 = vadd.f32 %v11264_v25, %v5735_v22  ;;  %v5737_v54 = vmax.f32 %v12266_v3, %v5681_v7  ;;  %7885 = vmatprep.subr.bf16.mxu1 %v8278_v27  ;;  %7865 = vmatprep.subr.bf16.mxu0 %v8279_v14  ;;  %v12270_v21 = vmax.f32 %v11059_v6, %v11061_v40  ;;  %v12272_v27 = vld [vmem:[#allocation26_spill] sm:$0xff]  ;;  %v8289_v40 = vld [vmem:[%s11796_s5 + $0x230] sm:$0xff]   ;;  %v8290_v7 = vld [vmem:[%s11796_s5 + $0x2d8] sm:$0xff]  }
 0x416   : > { %v5804_v57 = vadd.f32 %v11268_v16, %v5736_v39  ;;  %v5738_v36 = vmax.f32 %v12269_v20, %v5682_v51  ;;  %6997 = vmatprep.mubr.bf16.mxu1 %v5900_v58  ;;  %v12273_v14 = vmax.f32 %v12271_v23, %v12272_v27  ;;  %v12279_v46 = vmax.f32 %v12277_v31, %v12278_v38 }
 0x417   : > { %v5805_v4 = vadd.f32 %v11264_v25, %v5737_v54  ;;  %6998 = vmatmul.mubr.bf16.vlgmr.msra.gmra.mrb[248].mxu1 %v5899_v43  ;;  %v5859_v34 = vmax.f32 %v5803_v47, 0.0  ;;  %v12275_v43 = vld [vmem:[#allocation28_spill] sm:$0xff]  ;;  %v8292_v47 = vld [vmem:[%s11796_s5 + $0x298] sm:$0xff]  }
 0x418   : > { %v5806_v44 = vadd.f32 %v11268_v16, %v5738_v36  ;;  %7886 = vmatpush3.bf16.msra.mxu1 %v8280_v41  ;;  %v5190_v8 = vpop.f32.mrb[216].mxu0  ;;  %v5536_v15 = vpop.f32.mrb[216].mxu1  ;;  %7866 = vmatpush3.bf16.msra.mxu0 %v8281_v26  ;;  %v5860_v35 = vmax.f32 %v5804_v57, 0.0  ;;  %v12276_v61 = vmax.f32 %v12274_v48, %v12275_v43  ;;  %v8294_v57 = vld [vmem:[%s11796_s5 + $0x2e0] sm:$0xff]  }
 0x419   : > { %v5861_v42 = vmax.f32 %v5805_v4, 0.0  ;;  %v5683_v60 = vmax.f32 %v5190_v8, %v5536_v15  ;;  %v5192_v50 = vpop.f32.mrb[217].mxu0  ;;  %v5538_v1 = vpop.f32.mrb[217].mxu1  ;;  %7887 = vmatprep.subr.bf16.mxu1 %v8282_v62  ;;  %7867 = vmatprep.subr.bf16.mxu0 %v8283_v37  ;;  %v12280_v15 = vmax.f32 %v11087_v32, %v11089_v49  ;;  %v11596_v49 = vld [vmem:[%s11796_s5 + $0x300] sm:$0xff]  }
 0x41a   : > { %v5862_v9 = vmax.f32 %v5806_v44, 0.0  ;;  %v5684_v29 = vmax.f32 %v5192_v50, %v5538_v1  ;;  %v5194_v55 = vpop.f32.mrb[218].mxu0  ;;  %v5540_v30 = vpop.f32.mrb[218].mxu1  ;;  %v12282_v50 = vld [vmem:[#allocation32_spill] sm:$0xff] }
 0x41b   : > { %v5739_v28 = vmax.f32 %v12270_v21, %v5683_v60  ;;  %v5685_v53 = vmax.f32 %v5194_v55, %v5540_v30  ;;  %v5196_v17 = vpop.f32.mrb[219].mxu0  ;;  %v5542_v10 = vpop.f32.mrb[219].mxu1  ;;  %v5901_v0 = vpack.c.bf16 %v5861_v42, %v5859_v34  ;;  %v12281_v60 = vld [vmem:[#allocation31_spill] sm:$0xff]  ;;  %v12285_v55 = vld [vmem:[#allocation34_spill] sm:$0xff] }
 0x41c   : > { %v5740_v12 = vmax.f32 %v12273_v14, %v5684_v29  ;;  %v5686_v59 = vmax.f32 %v5196_v17, %v5542_v10  ;;  %7888 = vmatpush3.bf16.msra.mxu1 %v8284_v18  ;;  %7868 = vmatpush3.bf16.msra.mxu0 %v8285_v24  ;;  %v5902_v45 = vpack.c.bf16 %v5862_v9, %v5860_v35  ;;  %v8295_v9 = vld [vmem:[%s11796_s5 + $0x2a0] sm:$0xff]   ;;  %v12284_v29 = vld [vmem:[#allocation33_spill] sm:$0xff]  ;;  %v12287_v10 = vld [vmem:[#allocation35_spill] sm:$0xff] }
 0x41d   : > { %v5807_v6 = vadd.f32 %v11264_v25, %v5739_v28  ;;  %v5741_v22 = vmax.f32 %v12276_v61, %v5685_v53  ;;  %7889 = vmatprep.subr.bf16.mxu1 %v8286_v52  ;;  %7869 = vmatprep.subr.bf16.mxu0 %v8287_v19  ;;  %v12283_v1 = vmax.f32 %v12281_v60, %v12282_v50  ;;  %v8298_v28 = vld [vmem:[%s11796_s5 + $0x2e8] sm:$0xff]  }
 0x41e   : > { %v5808_v56 = vadd.f32 %v11268_v16, %v5740_v12  ;;  %v5742_v39 = vmax.f32 %v12279_v46, %v5686_v59  ;;  %7005 = vmatprep.mubr.bf16.mxu1 %v5902_v45  ;;  %v12286_v30 = vmax.f32 %v12284_v29, %v12285_v55  ;;  %v11609_v53 = vld [vmem:[%s11796_s5 + $0x348] sm:$0xff]   ;;  %v8307_v55 = vld [vmem:[%s11796_s5 + $0x2b8] sm:$0xff]  }
 0x41f   : > { %v5809_v51 = vadd.f32 %v11264_v25, %v5741_v22  ;;  %7006 = vmatmul.mubr.bf16.gmra.mrb[252].mxu1 %v5901_v0  ;;  %v5863_v5 = vmax.f32 %v5807_v6, 0.0  ;;  %v12288_v0 = vld [vmem:[#allocation36_spill] sm:$0xff]  ;;  %v12299_v50 = vld [vmem:[#allocation43_spill] sm:$0xff] }
 0x420   : > { %v5810_v58 = vadd.f32 %v11268_v16, %v5742_v39  ;;  %7890 = vmatpush3.bf16.msra.mxu1 %v8288_v11  ;;  %v5200_v41 = vpop.f32.mrb[220].mxu0  ;;  %v5546_v26 = vpop.f32.mrb[220].mxu1  ;;  %7870 = vmatpush3.bf16.msra.mxu0 %v8289_v40  ;;  %v5864_v33 = vmax.f32 %v5808_v56, 0.0  ;;  %v12289_v23 = vmax.f32 %v12287_v10, %v12288_v0  ;;  %v8299_v11 = vld [vmem:[%s11796_s5 + $0x2a8] sm:$0xff]  }
 0x421   : > { %v5865_v3 = vmax.f32 %v5809_v51, 0.0  ;;  %v5687_v54 = vmax.f32 %v5200_v41, %v5546_v26  ;;  %v5202_v62 = vpop.f32.mrb[221].mxu0  ;;  %v5548_v37 = vpop.f32.mrb[221].mxu1  ;;  %7891 = vmatprep.subr.bf16.mxu1 %v8290_v7  ;;  %7871 = vmatprep.subr.bf16.mxu0 %v8291_v63  ;;  %v11624_v40 = vld [vmem:[%s11796_s5 + $0x308] sm:$0xff]   ;;  %v8302_v7 = vld [vmem:[%s11796_s5 + $0x2f0] sm:$0xff]   ;;  %v12291_v41 = vld [vmem:[#allocation38_spill] sm:$0xff] }
 0x422   : > { %v5866_v20 = vmax.f32 %v5810_v58, 0.0  ;;  %v5688_v36 = vmax.f32 %v5202_v62, %v5548_v37  ;;  %v5204_v4 = vpop.f32.mrb[222].mxu0  ;;  %v5550_v44 = vpop.f32.mrb[222].mxu1  ;;  %v11633_v63 = vld [vmem:[%s11796_s5 + $0x350] sm:$0xff]   ;;  %v12290_v58 = vld [vmem:[#allocation37_spill] sm:$0xff] }
 0x423   : > { %v5903_v8 = vpack.c.bf16 %v5865_v3, %v5863_v5  ;;  %v5743_v18 = vmax.f32 %v12280_v15, %v5687_v54  ;;  %v5689_v24 = vmax.f32 %v5204_v4, %v5550_v44  ;;  %v5206_v34 = vpop.f32.mrb[223].mxu0  ;;  %v5552_v42 = vpop.f32.mrb[223].mxu1  ;;  %v12292_v26 = vmax.f32 %v12290_v58, %v12291_v41  ;;  %v12293_v54 = vld [vmem:[#allocation39_spill] sm:$0xff]  ;;  %v12294_v62 = vld [vmem:[#allocation40_spill] sm:$0xff]  ;;  %v12297_v15 = vld [vmem:[#allocation42_spill] sm:$0xff] }
 0x424   : > { %v5744_v52 = vmax.f32 %v12283_v1, %v5688_v36  ;;  %v5690_v19 = vmax.f32 %v5206_v34, %v5552_v42  ;;  %7892 = vmatpush3.bf16.msra.mxu1 %v8292_v47  ;;  %7872 = vmatpush3.bf16.msra.mxu0 %v8293_v2  ;;  %v5904_v35 = vpack.c.bf16 %v5866_v20, %v5864_v33  ;;  %v8303_v36 = vld [vmem:[%s11796_s5 + $0x2b0] sm:$0xff]   ;;  %v8306_v34 = vld [vmem:[%s11796_s5 + $0x2f8] sm:$0xff]   ;;  %v11694_v41 = vld [vmem:[%s11796_s5 + $0x320] sm:$0xff]  }
 0x425   : > { %v5811_v32 = vadd.f32 %v11264_v25, %v5743_v18  ;;  %v5745_v21 = vmax.f32 %v12286_v30, %v5689_v24  ;;  %7893 = vmatprep.subr.bf16.mxu1 %v8294_v57  ;;  %7913 = vmatprep.subr.bf16.mxu0 %v11582_v13  ;;  %v12295_v37 = vmax.f32 %v12293_v54, %v12294_v62  ;;  %v11648_v4 = vld [vmem:[%s11796_s5 + $0x310] sm:$0xff]   ;;  %v11661_v42 = vld [vmem:[%s11796_s5 + $0x358] sm:$0xff]   ;;  %v11705_v54 = vld [vmem:[%s11796_s5 + $0x368] sm:$0xff]  }
 0x426   : > { %v5812_v17 = vadd.f32 %v11268_v16, %v5744_v52  ;;  %v5746_v27 = vmax.f32 %v12289_v23, %v5690_v19  ;;  %7046 = vmatprep.mubr.bf16.mxu0 %v5904_v35  ;;  %v12300_v1 = vld [vmem:[#allocation44_spill] sm:$0xff]  ;;  %v11676_v30 = vld [vmem:[%s11796_s5 + $0x318] sm:$0xff]   ;;  %v11682_v23 = vld [vmem:[%s11796_s5 + $0x360] sm:$0xff]  }
 0x427   : > { %v5813_v14 = vadd.f32 %v11264_v25, %v5745_v21  ;;  %7047 = vmatmul.mubr.bf16.vlgmr.msra.gmra.mrb[0].mxu0 %v5903_v8  ;;  %v5867_v6 = vmax.f32 %v5811_v32, 0.0  ;;  %v12296_v8 = vld [vmem:[#allocation41_spill] sm:$0xff]  ;;  %v12301_v52 = vmax.f32 %v12299_v50, %v12300_v1 }
 0x428   : > { %v5814_v12 = vadd.f32 %v11268_v16, %v5746_v27  ;;  %7894 = vmatpush3.bf16.msra.mxu1 %v8295_v9  ;;  %v5210_v59 = vpop.f32.mrb[224].mxu0  ;;  %v5556_v45 = vpop.f32.mrb[224].mxu1  ;;  %7914 = vmatpush3.bf16.msra.mxu0 %v11596_v49  ;;  %v5868_v56 = vmax.f32 %v5812_v17, 0.0  ;;  %v12298_v18 = vmax.f32 %v12296_v8, %v12297_v15  ;;  %v11718_v15 = vld [vmem:[%s11796_s5 + $0x328] sm:$0xff]  }
 0x429   : > { %v5869_v48 = vmax.f32 %v5813_v14, 0.0  ;;  %v5691_v43 = vmax.f32 %v5210_v59, %v5556_v45  ;;  %v5212_v61 = vpop.f32.mrb[225].mxu0  ;;  %v5558_v22 = vpop.f32.mrb[225].mxu1  ;;  %7895 = vmatprep.subr.bf16.mxu1 %v8298_v28  ;;  %7915 = vmatprep.subr.bf16.mxu0 %v11609_v53 }
 0x42a   : > { %v5870_v31 = vmax.f32 %v5814_v12, 0.0  ;;  %v5692_v38 = vmax.f32 %v5212_v61, %v5558_v22  ;;  %v5214_v46 = vpop.f32.mrb[226].mxu0  ;;  %v5560_v39 = vpop.f32.mrb[226].mxu1 }
 0x42b   : > { %v5905_v51 = vpack.c.bf16 %v5869_v48, %v5867_v6  ;;  %v5747_v47 = vmax.f32 %v12292_v26, %v5691_v43  ;;  %v5693_v2 = vmax.f32 %v5214_v46, %v5560_v39  ;;  %v5216_v5 = vpop.f32.mrb[227].mxu0  ;;  %v5562_v3 = vpop.f32.mrb[227].mxu1  ;;  %v12302_v6 = vld [vmem:[#allocation45_spill] sm:$0xff]  ;;  %v12303_v48 = vld [vmem:[#allocation46_spill] sm:$0xff] }
 0x42c   : > { %v5748_v57 = vmax.f32 %v12295_v37, %v5692_v38  ;;  %v5694_v33 = vmax.f32 %v5216_v5, %v5562_v3  ;;  %7896 = vmatpush3.bf16.msra.mxu1 %v8299_v11  ;;  %7916 = vmatpush3.bf16.msra.mxu0 %v11624_v40  ;;  %v5906_v20 = vpack.c.bf16 %v5870_v31, %v5868_v56  ;;  %v12305_v31 = vld [vmem:[#allocation47_spill] sm:$0xff]  ;;  %v12306_v38 = vld [vmem:[#allocation48_spill] sm:$0xff] }
 0x42d   : > { %v5815_v44 = vadd.f32 %v11264_v25, %v5747_v47  ;;  %v5749_v24 = vmax.f32 %v12298_v18, %v5693_v2  ;;  %7897 = vmatprep.subr.bf16.mxu1 %v8302_v7  ;;  %7917 = vmatprep.subr.bf16.mxu0 %v11633_v63  ;;  %v12304_v43 = vmax.f32 %v12302_v6, %v12303_v48  ;;  %v12308_v47 = vld [vmem:[#allocation49_spill] sm:$0xff]  ;;  %v12309_v2 = vld [vmem:[#allocation50_spill] sm:$0xff]  ;;  %v12311_v37 = vld [vmem:[#allocation51_spill] sm:$0xff] }
 0x42e   : > { %v5816_v60 = vadd.f32 %v11268_v16, %v5748_v57  ;;  %v5750_v19 = vmax.f32 %v12301_v52, %v5694_v33  ;;  %7054 = vmatprep.mubr.bf16.mxu0 %v5906_v20  ;;  %v12307_v46 = vmax.f32 %v12305_v31, %v12306_v38  ;;  %v12310_v5 = vmax.f32 %v12308_v47, %v12309_v2  ;;  %v12312_v57 = vld [vmem:[#allocation52_spill] sm:$0xff]  ;;  %v12320_v48 = vld [vmem:[#allocation57_spill] sm:$0xff] }
 0x42f   : > { %v5817_v35 = vadd.f32 %v11264_v25, %v5749_v24  ;;  %7055 = vmatmul.mubr.bf16.gmra.mrb[4].mxu0 %v5905_v51  ;;  %v5871_v21 = vmax.f32 %v5815_v44, 0.0  ;;  %v12313_v33 = vmax.f32 %v12311_v37, %v12312_v57  ;;  %v12324_v31 = vld [vmem:[#allocation60_spill] sm:$0xff] }
 0x430   : > { %v5818_v9 = vadd.f32 %v11268_v16, %v5750_v19  ;;  %7898 = vmatpush3.bf16.msra.mxu1 %v8303_v36  ;;  %v5220_v32 = vpop.f32.mrb[228].mxu0  ;;  %v5566_v29 = vpop.f32.mrb[228].mxu1  ;;  %7918 = vmatpush3.bf16.msra.mxu0 %v11648_v4  ;;  %v5872_v27 = vmax.f32 %v5816_v60, 0.0 }
 0x431   : > { %v5873_v28 = vmax.f32 %v5817_v35, 0.0  ;;  %v5695_v17 = vmax.f32 %v5220_v32, %v5566_v29  ;;  %v5222_v10 = vpop.f32.mrb[229].mxu0  ;;  %v5568_v0 = vpop.f32.mrb[229].mxu1  ;;  %7899 = vmatprep.subr.bf16.mxu1 %v8306_v34  ;;  %7919 = vmatprep.subr.bf16.mxu0 %v11661_v42  ;;  %v12314_v29 = vld [vmem:[#allocation53_spill] sm:$0xff] }
 0x432   : > { %v5874_v14 = vmax.f32 %v5818_v9, 0.0  ;;  %v5696_v12 = vmax.f32 %v5222_v10, %v5568_v0  ;;  %v5224_v59 = vpop.f32.mrb[230].mxu0  ;;  %v5570_v45 = vpop.f32.mrb[230].mxu1  ;;  %v12317_v0 = vld [vmem:[#allocation55_spill] sm:$0xff] }
 0x433   : > { %v5907_v11 = vpack.c.bf16 %v5873_v28, %v5871_v21  ;;  %v5751_v61 = vmax.f32 %v12304_v43, %v5695_v17  ;;  %v5697_v22 = vmax.f32 %v5224_v59, %v5570_v45  ;;  %v5226_v7 = vpop.f32.mrb[231].mxu0  ;;  %v5572_v56 = vpop.f32.mrb[231].mxu1  ;;  %v12321_v43 = vld [vmem:[#allocation58_spill] sm:$0xff] }
 0x434   : > { %v5752_v39 = vmax.f32 %v12307_v46, %v5696_v12  ;;  %v5698_v51 = vmax.f32 %v5226_v7, %v5572_v56  ;;  %7900 = vmatpush3.bf16.msra.mxu1 %v8307_v55  ;;  %7920 = vmatpush3.bf16.msra.mxu0 %v11676_v30  ;;  %v5908_v58 = vpack.c.bf16 %v5874_v14, %v5872_v27  ;;  %v12315_v55 = vld [vmem:[#allocation54_spill] sm:$0xff]  ;;  %v12318_v27 = vld [vmem:[#allocation56_spill] sm:$0xff]  ;;  %v12323_v56 = vld [vmem:[#allocation59_spill] sm:$0xff] }
 0x435   : > { %v5819_v26 = vadd.f32 %v11264_v25, %v5751_v61  ;;  %v5753_v3 = vmax.f32 %v12310_v5, %v5697_v22  ;;  %7941 = vmatprep.subr.bf16.mxu1 %v11582_v13  ;;  %7921 = vmatprep.subr.bf16.mxu0 %v11682_v23  ;;  %v12316_v21 = vmax.f32 %v12314_v29, %v12315_v55  ;;  %v12333_v29 = vld [vmem:[#allocation66_spill] sm:$0xff] }
 0x436   : > { %v5820_v62 = vadd.f32 %v11268_v16, %v5752_v39  ;;  %v5754_v20 = vmax.f32 %v12313_v33, %v5698_v51  ;;  %7095 = vmatprep.mubr.bf16.mxu1 %v5908_v58  ;;  %v12319_v14 = vmax.f32 %v12317_v0, %v12318_v27  ;;  %v12322_v61 = vmax.f32 %v12320_v48, %v12321_v43 }
 0x437   : > { %v5821_v36 = vadd.f32 %v11264_v25, %v5753_v3  ;;  %7096 = vmatmul.mubr.bf16.vlgmr.msra.gmra.mrb[0].mxu1 %v5907_v11  ;;  %v5875_v18 = vmax.f32 %v5819_v26, 0.0  ;;  %v8315_v11 = vld [vmem:[%s11796_s5 + $0x330] sm:$0xff]   ;;  %v12325_v38 = vmax.f32 %v12323_v56, %v12324_v31  ;;  %v8317_v26 = vld [vmem:[%s11796_s5 + $0x338] sm:$0xff]  }
 0x438   : > { %v5822_v44 = vadd.f32 %v11268_v16, %v5754_v20  ;;  %7949 = vmatpush3.bf16.msra.mxu1 %v11596_v49  ;;  %v5230_v13 = vpop.f32.mrb[232].mxu0  ;;  %v5576_v8 = vpop.f32.mrb[232].mxu1  ;;  %7922 = vmatpush3.bf16.msra.mxu0 %v11694_v41  ;;  %v11725_v49 = vld [vmem:[%s11796_s5 + $0x370] sm:$0xff]   ;;  %v5876_v1 = vmax.f32 %v5820_v62, 0.0 }
 0x439   : > { %v5877_v24 = vmax.f32 %v5821_v36, 0.0  ;;  %v5699_v34 = vmax.f32 %v5230_v13, %v5576_v8  ;;  %v5232_v60 = vpop.f32.mrb[233].mxu0  ;;  %v5578_v50 = vpop.f32.mrb[233].mxu1  ;;  %7942 = vmatprep.subr.bf16.mxu1 %v11609_v53  ;;  %7923 = vmatprep.subr.bf16.mxu0 %v11705_v54  ;;  %v12327_v13 = vld [vmem:[#allocation62_spill] sm:$0xff] }
 0x43a   : > { %v5878_v52 = vmax.f32 %v5822_v44, 0.0  ;;  %v5700_v19 = vmax.f32 %v5232_v60, %v5578_v50  ;;  %v5234_v35 = vpop.f32.mrb[234].mxu0  ;;  %v5580_v9 = vpop.f32.mrb[234].mxu1  ;;  %v12326_v44 = vld [vmem:[#allocation61_spill] sm:$0xff]  ;;  %v12329_v50 = vld [vmem:[#allocation63_spill] sm:$0xff] }
 0x43b   : > { %v5909_v32 = vpack.c.bf16 %v5877_v24, %v5875_v18  ;;  %v5755_v28 = vmax.f32 %v12316_v21, %v5699_v34  ;;  %v5701_v17 = vmax.f32 %v5234_v35, %v5580_v9  ;;  %v5236_v10 = vpop.f32.mrb[235].mxu0  ;;  %v5582_v53 = vpop.f32.mrb[235].mxu1  ;;  %v12328_v8 = vmax.f32 %v12326_v44, %v12327_v13 }
 0x43c   : > { %v5756_v12 = vmax.f32 %v12319_v14, %v5700_v19  ;;  %v5702_v59 = vmax.f32 %v5236_v10, %v5582_v53  ;;  %7950 = vmatpush3.bf16.msra.mxu1 %v11624_v40  ;;  %7924 = vmatpush3.bf16.msra.mxu0 %v11718_v15  ;;  %v5910_v45 = vpack.c.bf16 %v5878_v52, %v5876_v1  ;;  %v8316_v40 = vld [vmem:[%s11796_s5 + $0x378] sm:$0xff]   ;;  %v12330_v1 = vld [vmem:[#allocation64_spill] sm:$0xff] }
 0x43d   : > { %v5823_v6 = vadd.f32 %v11264_v25, %v5755_v28  ;;  %v5757_v22 = vmax.f32 %v12322_v61, %v5701_v17  ;;  %7943 = vmatprep.subr.bf16.mxu1 %v11633_v63  ;;  %7925 = vmatprep.subr.bf16.mxu0 %v11725_v49  ;;  %v12331_v52 = vmax.f32 %v12329_v50, %v12330_v1  ;;  %v12335_v17 = vld [vmem:[#allocation67_spill] sm:$0xff]  ;;  %v12336_v10 = vld [vmem:[#allocation68_spill] sm:$0xff] }
 0x43e   : > { %v5824_v7 = vadd.f32 %v11268_v16, %v5756_v12  ;;  %v5758_v46 = vmax.f32 %v12325_v38, %v5702_v59  ;;  %7103 = vmatprep.mubr.bf16.mxu1 %v5910_v45  ;;  %v12337_v53 = vmax.f32 %v12335_v17, %v12336_v10 }
 0x43f   : > { %v5825_v39 = vadd.f32 %v11264_v25, %v5757_v22  ;;  %7104 = vmatmul.mubr.bf16.gmra.mrb[4].mxu1 %v5909_v32  ;;  %v5879_v47 = vmax.f32 %v5823_v6, 0.0  ;;  %v12332_v32 = vld [vmem:[#allocation65_spill] sm:$0xff] }
 0x440   : > { %v5826_v51 = vadd.f32 %v11268_v16, %v5758_v46  ;;  %7951 = vmatpush3.bf16.msra.mxu1 %v11648_v4  ;;  %v5240_v63 = vpop.f32.mrb[236].mxu0  ;;  %v5586_v58 = vpop.f32.mrb[236].mxu1  ;;  %7926 = vmatpush3.bf16.msra.mxu0 %v8315_v11  ;;  %v5880_v37 = vmax.f32 %v5824_v7, 0.0  ;;  %v12334_v55 = vmax.f32 %v12332_v32, %v12333_v29 }
 0x441   : > { %v5881_v2 = vmax.f32 %v5825_v39, 0.0  ;;  %v5703_v5 = vmax.f32 %v5240_v63, %v5586_v58  ;;  %v5242_v3 = vpop.f32.mrb[237].mxu0  ;;  %v5588_v62 = vpop.f32.mrb[237].mxu1  ;;  %7944 = vmatprep.subr.bf16.mxu1 %v11661_v42  ;;  %7927 = vmatprep.subr.bf16.mxu0 %v8316_v40 }
 0x442   : > { %v5882_v57 = vmax.f32 %v5826_v51, 0.0  ;;  %v5704_v33 = vmax.f32 %v5242_v3, %v5588_v62  ;;  %v5244_v20 = vpop.f32.mrb[238].mxu0  ;;  %v5590_v4 = vpop.f32.mrb[238].mxu1 }
 0x443   : > { %v5911_v36 = vpack.c.bf16 %v5881_v2, %v5879_v47  ;;  %v5759_v18 = vmax.f32 %v12328_v8, %v5703_v5  ;;  %v5705_v24 = vmax.f32 %v5244_v20, %v5590_v4  ;;  %v5246_v34 = vpop.f32.mrb[239].mxu0  ;;  %v5592_v60 = vpop.f32.mrb[239].mxu1 }
 0x444   : > { %v5760_v19 = vmax.f32 %v12331_v52, %v5704_v33  ;;  %v5706_v35 = vmax.f32 %v5246_v34, %v5592_v60  ;;  %7952 = vmatpush3.bf16.msra.mxu1 %v11676_v30  ;;  %7928 = vmatpush3.bf16.msra.mxu0 %v8317_v26  ;;  %v5912_v42 = vpack.c.bf16 %v5882_v57, %v5880_v37 }
 0x445   : > { %v5827_v9 = vadd.f32 %v11264_v25, %v5759_v18  ;;  %v5761_v21 = vmax.f32 %v12334_v55, %v5705_v24  ;;  %7945 = vmatprep.subr.bf16.mxu1 %v11682_v23 }
 0x446   : > { %v5828_v28 = vadd.f32 %v11268_v16, %v5760_v19  ;;  %v5762_v0 = vmax.f32 %v12337_v53, %v5706_v35  ;;  %7144 = vmatprep.mubr.bf16.mxu0 %v5912_v42 }
 0x447   : > { %v5829_v27 = vadd.f32 %v11264_v25, %v5761_v21  ;;  %7145 = vmatmul.mubr.bf16.vlgmr.msra.gmra.mrb[8].mxu0 %v5911_v36  ;;  %v5883_v14 = vmax.f32 %v5827_v9, 0.0 }
 0x448   : > { %v5830_v30 = vadd.f32 %v11268_v16, %v5762_v0  ;;  %7953 = vmatpush3.bf16.msra.mxu1 %v11694_v41  ;;  %v5884_v59 = vmax.f32 %v5828_v28, 0.0 }
 0x449   : > { %v5885_v12 = vmax.f32 %v5829_v27, 0.0  ;;  %7946 = vmatprep.subr.bf16.mxu1 %v11705_v54 }
 0x44a   : > { %v5886_v23 = vmax.f32 %v5830_v30, 0.0 }
 0x44b   : > { %v5913_v45 = vpack.c.bf16 %v5885_v12, %v5883_v14 }
 0x44c   : > { %7954 = vmatpush3.bf16.msra.mxu1 %v11718_v15  ;;  %v5914_v6 = vpack.c.bf16 %v5886_v23, %v5884_v59 }
 0x44d   : > { %7947 = vmatprep.subr.bf16.mxu1 %v11725_v49  ;;  %v7630_v49 = vld [vmem:[%s11797_s6] ss:$0 sm:$0xff] }
 0x44e   : > { %7152 = vmatprep.mubr.bf16.mxu1 %v5914_v6 }
 0x450   : > { %7955 = vmatpush3.bf16.msra.mxu1 %v8315_v11 }
 0x451   : > { %7948 = vmatprep.subr.bf16.mxu1 %v8316_v40 }
 0x454   : > { %7956 = vmatpush3.bf16.msra.mxu1 %v8317_v26 }
 0x457   : > { %7153 = vmatmul.mubr.bf16.vlgmr.msra.gmra.mrb[8].mxu1 %v5913_v45 }
 0x4ba   : > { %v7761_v16 = vpop.f32.mrb[240].mxu0 }
 0x4bb   : > { %v7762_v25 = vpop.f32.mrb[241].mxu0 }
 0x4bc   : > { %v7763_v41 = vadd.f32 %v7762_v25, %v7761_v16  ;;  %v7764_v48 = vpop.f32.mrb[242].mxu0 }
 0x4bd   : > { %v7765_v43 = vpop.f32.mrb[243].mxu0 }
 0x4be   : > { %v7766_v61 = vadd.f32 %v7765_v43, %v7764_v48  ;;  %v6853_v38 = vadd.f32 %v7763_v41, %v7630_v49 }
 0x4c0   : > { %v6856_v63 = vadd.f32 %v7766_v61, %v7630_v49 }
 0x4c2   : > { %v7767_v54 = vpop.f32.mrb[244].mxu0 }
 0x4c3   : > { %v7768_v22 = vpop.f32.mrb[245].mxu0 }
 0x4c4   : > { %v7769_v7 = vadd.f32 %v7768_v22, %v7767_v54  ;;  %v7770_v56 = vpop.f32.mrb[246].mxu0 }
 0x4c5   : > { %v7771_v31 = vpop.f32.mrb[247].mxu0 }
 0x4c6   : > { %v7772_v15 = vadd.f32 %v7771_v31, %v7770_v56  ;;  %v6861_v3 = vadd.f32 %v7769_v7, %v7630_v49 }
 0x4c8   : > { %v6864_v33 = vadd.f32 %v7772_v15, %v7630_v49 }
 0x4ca   : > { %v7789_v11 = vpop.f32.mrb[240].mxu1 }
 0x4cb   : > { %v7790_v40 = vpop.f32.mrb[241].mxu1 }
 0x4cc   : > { %v7791_v46 = vadd.f32 %v7790_v40, %v7789_v11  ;;  %v7792_v39 = vpop.f32.mrb[242].mxu1 }
 0x4cd   : > { %v7793_v51 = vpop.f32.mrb[243].mxu1 }
 0x4ce   : > { %v6902_v58 = vadd.f32 %v7791_v46, %v6853_v38  ;;  %v7794_v26 = vadd.f32 %v7793_v51, %v7792_v39 }
 0x4d0   : > { %v6905_v47 = vadd.f32 %v7794_v26, %v6856_v63 }
 0x4d2   : > { %v7795_v2 = vpop.f32.mrb[244].mxu1 }
 0x4d3   : > { %v7796_v5 = vpop.f32.mrb[245].mxu1 }
 0x4d4   : > { %v7797_v62 = vadd.f32 %v7796_v5, %v7795_v2  ;;  %v7798_v37 = vpop.f32.mrb[246].mxu1 }
 0x4d5   : > { %v7799_v57 = vpop.f32.mrb[247].mxu1 }
 0x4d6   : > { %v6910_v20 = vadd.f32 %v7797_v62, %v6861_v3  ;;  %v7800_v4 = vadd.f32 %v7799_v57, %v7798_v37 }
 0x4d8   : > { %v6913_v36 = vadd.f32 %v7800_v4, %v6864_v33 }
 0x4da   : > { %v7817_v44 = vpop.f32.mrb[248].mxu0 }
 0x4db   : > { %v7818_v13 = vpop.f32.mrb[249].mxu0 }
 0x4dc   : > { %v7819_v8 = vadd.f32 %v7818_v13, %v7817_v44  ;;  %v7820_v18 = vpop.f32.mrb[250].mxu0 }
 0x4dd   : > { %v7821_v24 = vpop.f32.mrb[251].mxu0 }
 0x4de   : > { %v6951_v34 = vadd.f32 %v7819_v8, %v6902_v58  ;;  %v7822_v60 = vadd.f32 %v7821_v24, %v7820_v18 }
 0x4e0   : > { %v6954_v50 = vadd.f32 %v7822_v60, %v6905_v47 }
 0x4e2   : > { %v7823_v1 = vpop.f32.mrb[252].mxu0 }
 0x4e3   : > { %v7824_v52 = vpop.f32.mrb[253].mxu0 }
 0x4e4   : > { %v7825_v19 = vadd.f32 %v7824_v52, %v7823_v1  ;;  %v7826_v35 = vpop.f32.mrb[254].mxu0 }
 0x4e5   : > { %v7827_v42 = vpop.f32.mrb[255].mxu0 }
 0x4e6   : > { %v6959_v9 = vadd.f32 %v7825_v19, %v6910_v20  ;;  %v7828_v32 = vadd.f32 %v7827_v42, %v7826_v35 }
 0x4e8   : > { %v6962_v29 = vadd.f32 %v7828_v32, %v6913_v36 }
 0x4ea   : > { %v7845_v55 = vpop.f32.mrb[248].mxu1 }
 0x4eb   : > { %v7846_v21 = vpop.f32.mrb[249].mxu1 }
 0x4ec   : > { %v7847_v28 = vadd.f32 %v7846_v21, %v7845_v55  ;;  %v7848_v17 = vpop.f32.mrb[250].mxu1 }
 0x4ed   : > { %v7849_v10 = vpop.f32.mrb[251].mxu1 }
 0x4ee   : > { %v7000_v53 = vadd.f32 %v7847_v28, %v6951_v34  ;;  %v7850_v0 = vadd.f32 %v7849_v10, %v7848_v17 }
 0x4f0   : > { %v7003_v27 = vadd.f32 %v7850_v0, %v6954_v50 }
 0x4f2   : > { %v7851_v30 = vpop.f32.mrb[252].mxu1 }
 0x4f3   : > { %v7852_v14 = vpop.f32.mrb[253].mxu1 }
 0x4f4   : > { %v7853_v12 = vadd.f32 %v7852_v14, %v7851_v30  ;;  %v7854_v59 = vpop.f32.mrb[254].mxu1 }
 0x4f5   : > { %v7855_v23 = vpop.f32.mrb[255].mxu1 }
 0x4f6   : > { %v7008_v45 = vadd.f32 %v7853_v12, %v6959_v9  ;;  %v7856_v6 = vadd.f32 %v7855_v23, %v7854_v59 }
 0x4f8   : > { %v7011_v16 = vadd.f32 %v7856_v6, %v6962_v29 }
 0x4fa   : > { %v7873_v25 = vpop.f32.mrb[0].mxu0 }
 0x4fb   : > { %v7874_v41 = vpop.f32.mrb[1].mxu0 }
 0x4fc   : > { %v7875_v48 = vadd.f32 %v7874_v41, %v7873_v25  ;;  %v7876_v43 = vpop.f32.mrb[2].mxu0 }
 0x4fd   : > { %v7877_v61 = vpop.f32.mrb[3].mxu0 }
 0x4fe   : > { %v7049_v54 = vadd.f32 %v7875_v48, %v7000_v53  ;;  %v7878_v22 = vadd.f32 %v7877_v61, %v7876_v43 }
 0x500   : > { %v7052_v7 = vadd.f32 %v7878_v22, %v7003_v27 }
 0x502   : > { %v7879_v56 = vpop.f32.mrb[4].mxu0 }
 0x503   : > { %v7880_v31 = vpop.f32.mrb[5].mxu0 }
 0x504   : > { %v7881_v15 = vadd.f32 %v7880_v31, %v7879_v56  ;;  %v7882_v49 = vpop.f32.mrb[6].mxu0 }
 0x505   : > { %v7883_v11 = vpop.f32.mrb[7].mxu0 }
 0x506   : > { %v7057_v40 = vadd.f32 %v7881_v15, %v7008_v45  ;;  %v7884_v38 = vadd.f32 %v7883_v11, %v7882_v49 }
 0x508   : > { %v7060_v46 = vadd.f32 %v7884_v38, %v7011_v16 }
 0x50a   : > { %v7901_v39 = vpop.f32.mrb[0].mxu1 }
 0x50b   : > { %v7902_v51 = vpop.f32.mrb[1].mxu1 }
 0x50c   : > { %v7903_v63 = vadd.f32 %v7902_v51, %v7901_v39  ;;  %v7904_v58 = vpop.f32.mrb[2].mxu1 }
 0x50d   : > { %v7905_v26 = vpop.f32.mrb[3].mxu1 }
 0x50e   : > { %v7098_v47 = vadd.f32 %v7903_v63, %v7049_v54  ;;  %v7906_v2 = vadd.f32 %v7905_v26, %v7904_v58 }
 0x510   : > { %v7101_v5 = vadd.f32 %v7906_v2, %v7052_v7 }
 0x512   : > { %v7907_v3 = vpop.f32.mrb[4].mxu1 }
 0x513   : > { %v7908_v62 = vpop.f32.mrb[5].mxu1 }
 0x514   : > { %v7909_v37 = vadd.f32 %v7908_v62, %v7907_v3  ;;  %v7910_v57 = vpop.f32.mrb[6].mxu1 }
 0x515   : > { %v7911_v33 = vpop.f32.mrb[7].mxu1 }
 0x516   : > { %v7106_v20 = vadd.f32 %v7909_v37, %v7057_v40  ;;  %v7912_v4 = vadd.f32 %v7911_v33, %v7910_v57 }
 0x518   : > { %v7109_v36 = vadd.f32 %v7912_v4, %v7060_v46 }
 0x51a   : > { %v7929_v44 = vpop.f32.mrb[8].mxu0 }
 0x51b   : > { %v7930_v13 = vpop.f32.mrb[9].mxu0 }
 0x51c   : > { %v7931_v8 = vadd.f32 %v7930_v13, %v7929_v44  ;;  %v7932_v18 = vpop.f32.mrb[10].mxu0 }
 0x51d   : > { %v7933_v24 = vpop.f32.mrb[11].mxu0 }
 0x51e   : > { %v7147_v34 = vadd.f32 %v7931_v8, %v7098_v47  ;;  %v7934_v60 = vadd.f32 %v7933_v24, %v7932_v18 }
 0x520   : > { %7161 = vst [vmem:[%s280_s25] sm:$0xff] %v7147_v34  ;;  %v7150_v50 = vadd.f32 %v7934_v60, %v7101_v5 }
 0x522   : > { %7162 = vst [vmem:[%s280_s25 + $0x8] sm:$0xff] %v7150_v50 }
 0x52a   : > { %v7935_v1 = vpop.f32.mrb[8].mxu1 }
 0x52b   : > { %v7936_v52 = vpop.f32.mrb[9].mxu1 }
 0x52c   : > { %v7937_v19 = vadd.f32 %v7936_v52, %v7935_v1  ;;  %v7938_v35 = vpop.f32.mrb[10].mxu1 }
 0x52d   : > { %v7939_v42 = vpop.f32.mrb[11].mxu1 }
 0x52e   : > { %v7155_v9 = vadd.f32 %v7937_v19, %v7106_v20  ;;  %v7940_v32 = vadd.f32 %v7939_v42, %v7938_v35 }
 0x530   : > { %7163 = vst [vmem:[%s280_s25 + $0x10] sm:$0xff] %v7155_v9  ;;  %v7158_v29 = vadd.f32 %v7940_v32, %v7109_v36 }
 0x532   : > { %7164 = vst [vmem:[%s280_s25 + $0x18] sm:$0xff] %v7158_v29 }
 0x533 PF: > { %s17_s24 = sadd.s32 1, %s8327_s24  }
 0x534   : > { %p14_p5 = scmp.ge.s32.totalorder %s17_s24, 4  }
 0x536   :  { %16 = sbr.rel (!%p14_p5) target bundleno = 1 (0x1), region = 78 }

</bundles_post_ra>
